<compile_context>
chip_gen: v7x
topology: tpu7x:2x2x1
jax: 0.10.0
libtpu: 0.0.40
codegen_flags: <defaults>
</compile_context>

<pallas_src>
import jax
import jax.numpy as jnp
from jax.experimental import pallas as pl
from jax.experimental.pallas import tpu as pltpu

BN_EPS = 1e-5
LANES = 128          # classifier feature dims padded to the 128-wide lane dim
NEG_BIG = -1e30      # logit value for padded classifier columns

# Static geometry implied by num_features = 2*2*128 (28x28 RGB input).
H_IN = 28
K1, C1_OUT = 5, 64          # conv1: 5x5, 3   -> 64
K2, C2_OUT = 5, 64          # conv2: 5x5, 64  -> 64
K3, C3_OUT = 3, 128         # conv3: 3x3, 64  -> 128
H1 = H_IN - K1 + 1          # 24   conv1 output side
P1 = H1 // 2                # 12   pool1 output side
H2 = P1 - K2 + 1            # 8    conv2 output side
P2 = H2 // 2                # 4    pool2 output side
H3 = P2 - K3 + 1            # 2    conv3 output side
FEAT = H3 * H3 * C3_OUT     # 512


# ----------------------------- Pallas kernels ------------------------------

def _feature_kernel(x_ref, w1_ref, b1_ref, w2_ref, b2_ref, w3_ref, b3_ref,
                    o_ref, a1_ref, p1_ref, a2_ref):
    """Fused feature extractor for one image (one grid step).

    x_ref : (1, 576, 75) bf16  im2col patches of the 28x28x3 image
    w1    : (75, 64)     bf16  conv1 weight (BN folded)     b1: (1, 64) f32
    w2    : (25, 64, 64) bf16  conv2 tap weights (BN folded) b2: (1, 64) f32
    w3    : (9, 64, 128) bf16  conv3 tap weights             b3: (1,128) f32
    o_ref : (1, 4, 128)  f32   conv3 output, rows = (h,w) raster
    a1_ref: (576, 64) f32 scratch  conv1 output (24x24 raster)
    p1_ref: (12,12,64) f32 scratch pool1 output
    a2_ref: (64, 64)  f32 scratch  conv2 output (8x8 raster)
    """
    # ---- conv1 (+BN folded): one GEMM, M=576, K=75 -------------------------
    a1_ref[...] = jnp.dot(x_ref[0], w1_ref[...],
                          preferred_element_type=jnp.float32) + b1_ref[...]

    # ---- MaxPool2d(2) + ReLU : 24x24 -> 12x12 (strided loads + VPU max) ----
    for r in range(P1):
        top = 2 * r * H1
        bot = top + H1
        v = jnp.maximum(
            jnp.maximum(a1_ref[pl.ds(top, P1, stride=2), :],
                        a1_ref[pl.ds(top + 1, P1, stride=2), :]),
            jnp.maximum(a1_ref[pl.ds(bot, P1, stride=2), :],
                        a1_ref[pl.ds(bot + 1, P1, stride=2), :]))
        p1_ref[r] = jnp.maximum(v, 0.0)

    # ---- conv2 (+BN folded): 25 tap GEMMs with M=64, K=64 ------------------
    acc2 = jnp.zeros((H2 * H2, C2_OUT), jnp.float32)
    for di in range(K2):
        for dj in range(K2):
            pieces = [p1_ref[di + i, dj:dj + H2, :] for i in range(H2)]
            win = jnp.concatenate(pieces, axis=0).astype(jnp.bfloat16)  # (64,64)
            acc2 = acc2 + jnp.dot(win, w2_ref[di * K2 + dj],
                                  preferred_element_type=jnp.float32)
    a2_ref[...] = acc2 + b2_ref[...]

    # ---- MaxPool2d(2) + ReLU : 8x8 -> 4x4 ----------------------------------
    p2_rows = []
    for r in range(P2):
        top = 2 * r * H2
        bot = top + H2
        v = jnp.maximum(
            jnp.maximum(a2_ref[pl.ds(top, P2, stride=2), :],
                        a2_ref[pl.ds(top + 1, P2, stride=2), :]),
            jnp.maximum(a2_ref[pl.ds(bot, P2, stride=2), :],
                        a2_ref[pl.ds(bot + 1, P2, stride=2), :]))
        p2_rows.append(jnp.maximum(v, 0.0).astype(jnp.bfloat16))        # (4,64)

    # ---- conv3: 3x3, 64 -> 128, 2x2 output ---------------------------------
    for oi in range(H3):
        acc3 = jnp.zeros((H3, C3_OUT), jnp.float32)
        for di in range(K3):
            row = p2_rows[oi + di]                                      # (4,64)
            for dj in range(K3):
                win = row[dj:dj + H3, :]                                # (2,64)
                acc3 = acc3 + jnp.dot(win, w3_ref[di * K3 + dj],
                                      preferred_element_type=jnp.float32)
        # NHWC flatten order (h, w, c): rows [h0w0, h0w1, h1w0, h1w1]
        o_ref[0, pl.ds(H3 * oi, H3), :] = acc3 + b3_ref[...]


def _fc_stack_kernel(x_ref, w1_ref, b1_ref, w2_ref, b2_ref, w3_ref, b3_ref,
                     o_ref):
    """Fused classifier: (Linear+BN+ReLU) x2 -> Linear -> LogSoftmax.

    Padded output columns (>=100 / >=10) carry zeros or NEG_BIG bias, so the
    log-softmax over all 128 lanes equals the log-softmax over the real 10.
    """
    h = jnp.dot(x_ref[...].astype(jnp.bfloat16), w1_ref[...],
                preferred_element_type=jnp.float32) + b1_ref[...]
    h = jnp.maximum(h, 0.0)
    h = jnp.dot(h.astype(jnp.bfloat16), w2_ref[...],
                preferred_element_type=jnp.float32) + b2_ref[...]
    h = jnp.maximum(h, 0.0)
    z = jnp.dot(h.astype(jnp.bfloat16), w3_ref[...],
                preferred_element_type=jnp.float32) + b3_ref[...]
    m = jnp.max(z, axis=1, keepdims=True)
    lse = jnp.log(jnp.sum(jnp.exp(z - m), axis=1, keepdims=True)) + m
    o_ref[...] = z - lse


# ------------------------------- wrappers -----------------------------------

def _im2col_conv1(x_nhwc):
    """(B,28,28,3) f32 -> (B,576,75) bf16 patches, feature order (di,dj,c)."""
    B = x_nhwc.shape[0]
    slabs = [x_nhwc[:, di:di + H1, dj:dj + H1, :]
             for di in range(K1) for dj in range(K1)]
    patches = jnp.concatenate(slabs, axis=-1)                 # (B,24,24,75)
    return patches.reshape(B, H1 * H1, K1 * K1 * 3).astype(jnp.bfloat16)


def feature_extractor(patches, w1, b1, w2, b2, w3, b3):
    """One fused pallas_call over the batch; returns (B, 512) f32 features."""
    B = patches.shape[0]
    out = pl.pallas_call(
        _feature_kernel,
        grid=(B,),
        in_specs=[
            pl.BlockSpec((1, H1 * H1, K1 * K1 * 3), lambda b: (b, 0, 0)),
            pl.BlockSpec((K1 * K1 * 3, C1_OUT), lambda b: (0, 0)),
            pl.BlockSpec((1, C1_OUT), lambda b: (0, 0)),
            pl.BlockSpec((K2 * K2, C2_OUT, C2_OUT), lambda b: (0, 0, 0)),
            pl.BlockSpec((1, C2_OUT), lambda b: (0, 0)),
            pl.BlockSpec((K3 * K3, C2_OUT, C3_OUT), lambda b: (0, 0, 0)),
            pl.BlockSpec((1, C3_OUT), lambda b: (0, 0)),
        ],
        out_specs=pl.BlockSpec((1, H3 * H3, C3_OUT), lambda b: (b, 0, 0)),
        out_shape=jax.ShapeDtypeStruct((B, H3 * H3, C3_OUT), jnp.float32),
        scratch_shapes=[
            pltpu.VMEM((H1 * H1, C1_OUT), jnp.float32),   # conv1 out (24x24)
            pltpu.VMEM((P1, P1, C1_OUT), jnp.float32),    # pool1 out (12x12)
            pltpu.VMEM((H2 * H2, C2_OUT), jnp.float32),   # conv2 out (8x8)
        ],
        compiler_params=pltpu.CompilerParams(
            dimension_semantics=("parallel",)),
    )(patches, w1, b1, w2, b2, w3, b3)
    return out.reshape(B, FEAT)


def fc_stack(feat, w1, b1, w2, b2, w3, b3):
    """Fused classifier; tiles over batch (M) with a parallel grid axis."""
    M, K = feat.shape
    N = w1.shape[1]
    TM = M if M <= 256 else 256
    Mp = pl.cdiv(M, TM) * TM
    if Mp != M:
        feat = jnp.pad(feat, ((0, Mp - M), (0, 0)))
    out = pl.pallas_call(
        _fc_stack_kernel,
        grid=(Mp // TM,),
        in_specs=[
            pl.BlockSpec((TM, K), lambda i: (i, 0)),
            pl.BlockSpec((K, N), lambda i: (0, 0)),
            pl.BlockSpec((1, N), lambda i: (0, 0)),
            pl.BlockSpec((N, N), lambda i: (0, 0)),
            pl.BlockSpec((1, N), lambda i: (0, 0)),
            pl.BlockSpec((N, N), lambda i: (0, 0)),
            pl.BlockSpec((1, N), lambda i: (0, 0)),
        ],
        out_specs=pl.BlockSpec((TM, N), lambda i: (i, 0)),
        out_shape=jax.ShapeDtypeStruct((Mp, N), jnp.float32),
        compiler_params=pltpu.CompilerParams(dimension_semantics=("parallel",)),
    )(feat, w1, b1, w2, b2, w3, b3)
    return out[:M]


# --------------------------- parameter folding -------------------------------

def _bn_scale_shift(bn):
    gamma, beta, mean, var = bn
    scale = gamma / jnp.sqrt(var + BN_EPS)
    return scale, beta - mean * scale


def _fold_conv(w_pt, b, scale, shift):
    """(Cout,Cin,k,k) torch conv [+ folded BN] -> taps (k*k,Cin,Cout) bf16 + bias."""
    cout, cin, k, _ = w_pt.shape
    if scale is None:
        w_eff, b_eff = w_pt, b
    else:
        w_eff = w_pt * scale[:, None, None, None]
        b_eff = b * scale + shift
    taps = jnp.transpose(w_eff, (2, 3, 1, 0)).reshape(k * k, cin, cout)
    return taps.astype(jnp.bfloat16), b_eff.reshape(1, cout).astype(jnp.float32)


def prepare_params(p):
    """Fold eval-mode BatchNorm into weights; bf16 weights; permute fc1."""
    s1, t1 = _bn_scale_shift(p['bn1'])
    w1_taps, b1 = _fold_conv(p['conv1_w'], p['conv1_b'], s1, t1)
    w1 = w1_taps.reshape(K1 * K1 * 3, C1_OUT)                 # (75, 64)

    s2, t2 = _bn_scale_shift(p['bn2'])
    w2, b2 = _fold_conv(p['conv2_w'], p['conv2_b'], s2, t2)   # (25, 64, 64)

    w3, b3 = _fold_conv(p['conv3_w'], p['conv3_b'], None, None)  # (9, 64, 128)

    # fc1: fold BN1d; reorder input dim from NCHW flatten (c,h,w) to NHWC (h,w,c)
    sf1, tf1 = _bn_scale_shift(p['bn_fc1'])
    fw1 = p['fc1_w'] * sf1[:, None]                           # (100, 512)
    fb1 = p['fc1_b'] * sf1 + tf1
    fw1 = fw1.reshape(100, C3_OUT, H3, H3)                    # (out, c, h, w)
    fw1 = jnp.transpose(fw1, (2, 3, 1, 0)).reshape(FEAT, 100)  # (h*w*c, out)
    fc1_w = jnp.pad(fw1, ((0, 0), (0, LANES - 100))).astype(jnp.bfloat16)
    fc1_b = jnp.pad(fb1, (0, LANES - 100)).reshape(1, LANES)

    sf2, tf2 = _bn_scale_shift(p['bn_fc2'])
    fw2 = (p['fc2_w'] * sf2[:, None]).T                       # (100, 100)
    fb2 = p['fc2_b'] * sf2 + tf2
    fc2_w = jnp.pad(fw2, ((0, LANES - 100), (0, LANES - 100))).astype(jnp.bfloat16)
    fc2_b = jnp.pad(fb2, (0, LANES - 100)).reshape(1, LANES)

    fw3 = p['fc3_w'].T                                        # (100, 10)
    fc3_w = jnp.pad(fw3, ((0, LANES - 100), (0, LANES - 10))).astype(jnp.bfloat16)
    fc3_b = jnp.concatenate(
        [p['fc3_b'], jnp.full((LANES - 10,), NEG_BIG, jnp.float32)]).reshape(1, LANES)

    return dict(w1=w1, b1=b1, w2=w2, b2=b2, w3=w3, b3=b3,
                fc1_w=fc1_w, fc1_b=fc1_b, fc2_w=fc2_w, fc2_b=fc2_b,
                fc3_w=fc3_w, fc3_b=fc3_b)


# ------------------------------- full model ---------------------------------

# TODO(synk): training-mode Dropout/Dropout2d and batch-statistic BatchNorm are
# not implemented; forward uses eval-mode semantics (dropout=identity, BN
# folded as a running-stats affine).

def cnn_forward(params, x_nchw):
    p = prepare_params(params)
    x = jnp.transpose(x_nchw, (0, 2, 3, 1)).astype(jnp.float32)   # NCHW -> NHWC
    patches = _im2col_conv1(x)                                    # (B,576,75) bf16

    feat = feature_extractor(patches, p['w1'], p['b1'], p['w2'], p['b2'],
                             p['w3'], p['b3'])                    # (B, 512)

    out = fc_stack(feat, p['fc1_w'], p['fc1_b'], p['fc2_w'], p['fc2_b'],
                   p['fc3_w'], p['fc3_b'])                        # (B, 128)
    return out[:, :10]


def init_params(key):
    keys = jax.random.split(key, 16)

    def n(k, shape, scale=0.05):
        return jax.random.normal(k, shape, dtype=jnp.float32) * scale

    def bn(k, c):
        k1, k2, k3, k4 = jax.random.split(k, 4)
        gamma = 1.0 + 0.1 * jax.random.normal(k1, (c,), jnp.float32)
        beta = 0.1 * jax.random.normal(k2, (c,), jnp.float32)
        mean = 0.1 * jax.random.normal(k3, (c,), jnp.float32)
        var = 1.0 + 0.1 * jax.random.uniform(k4, (c,), jnp.float32)
        return (gamma, beta, mean, var)

    return dict(
        conv1_w=n(keys[0], (64, 3, 5, 5)), conv1_b=n(keys[1], (64,)),
        bn1=bn(keys[2], 64),
        conv2_w=n(keys[3], (64, 64, 5, 5)), conv2_b=n(keys[4], (64,)),
        bn2=bn(keys[5], 64),
        conv3_w=n(keys[6], (128, 64, 3, 3)), conv3_b=n(keys[7], (128,)),
        fc1_w=n(keys[8], (100, 512)), fc1_b=n(keys[9], (100,)),
        bn_fc1=bn(keys[10], 100),
        fc2_w=n(keys[11], (100, 100)), fc2_b=n(keys[12], (100,)),
        bn_fc2=bn(keys[13], 100),
        fc3_w=n(keys[14], (10, 100)), fc3_b=n(keys[15], (10,)),
    )


if __name__ == "__main__":
    key = jax.random.PRNGKey(0)
    pkey, xkey = jax.random.split(key)
    params = init_params(pkey)
    # 28x28 RGB input implied by num_features = 2*2*128 after the extractor
    x = jax.random.normal(xkey, (2, 3, 28, 28), dtype=jnp.float32)

    out = jax.jit(cnn_forward)(params, x)
    out = jax.block_until_ready(out)

    assert out.shape == (2, 10), out.shape
    assert bool(jnp.all(jnp.isfinite(out)))
    # rows of a log-softmax must exp-sum to 1
    assert bool(jnp.allclose(jnp.sum(jnp.exp(out), axis=1), 1.0, atol=1e-4))
    print("KERNEL_OK")
</pallas_src>

<mosaic_0001>
module attributes {stable_mosaic.version = 11 : i64} {
  func.func @_feature_kernel(%arg0: i32, %arg1: memref<1x576x75xbf16, #tpu.memory_space<vmem>>, %arg2: memref<75x64xbf16, #tpu.memory_space<vmem>>, %arg3: memref<1x64xf32, #tpu.memory_space<vmem>>, %arg4: memref<25x64x64xbf16, #tpu.memory_space<vmem>>, %arg5: memref<1x64xf32, #tpu.memory_space<vmem>>, %arg6: memref<9x64x128xbf16, #tpu.memory_space<vmem>>, %arg7: memref<1x128xf32, #tpu.memory_space<vmem>>, %arg8: memref<1x4x128xf32, #tpu.memory_space<vmem>>, %arg9: memref<576x64xf32, #tpu.memory_space<vmem>>, %arg10: memref<12x12x64xf32, #tpu.memory_space<vmem>>, %arg11: memref<64x64xf32, #tpu.memory_space<vmem>>) attributes {dimension_semantics = [#tpu.dimension_semantics<parallel>], iteration_bounds = array<i64: 2>, scalar_prefetch = 0 : i64, scratch_operands = 3 : i64, tpu.core_type = #tpu.core_type<tc>, window_params = [{transform_indices = @transform_0, window_bounds = array<i64: 1, 576, 75>}, {pipeline_mode = #tpu.pipeline_mode<synchronous>, transform_indices = @transform_1, window_bounds = array<i64: 75, 64>}, {pipeline_mode = #tpu.pipeline_mode<synchronous>, transform_indices = @transform_2, window_bounds = array<i64: 1, 64>}, {pipeline_mode = #tpu.pipeline_mode<synchronous>, transform_indices = @transform_3, window_bounds = array<i64: 25, 64, 64>}, {pipeline_mode = #tpu.pipeline_mode<synchronous>, transform_indices = @transform_4, window_bounds = array<i64: 1, 64>}, {pipeline_mode = #tpu.pipeline_mode<synchronous>, transform_indices = @transform_5, window_bounds = array<i64: 9, 64, 128>}, {pipeline_mode = #tpu.pipeline_mode<synchronous>, transform_indices = @transform_6, window_bounds = array<i64: 1, 128>}, {transform_indices = @transform_7, window_bounds = array<i64: 1, 4, 128>}]} {
    %c0 = arith.constant 0 : index
    %c0_0 = arith.constant 0 : index
    %c0_1 = arith.constant 0 : index
    %0 = vector.load %arg1[%c0, %c0_0, %c0_1] : memref<1x576x75xbf16, #tpu.memory_space<vmem>>, vector<1x576x75xbf16>
    %1 = vector.shape_cast %0 : vector<1x576x75xbf16> to vector<576x75xbf16>
    %c0_2 = arith.constant 0 : index
    %c0_3 = arith.constant 0 : index
    %2 = vector.load %arg2[%c0_2, %c0_3] : memref<75x64xbf16, #tpu.memory_space<vmem>>, vector<75x64xbf16>
    %cst = arith.constant dense<0.000000e+00> : vector<576x64xf32>
    %3 = tpu.matmul %1, %2, %cst {dimension_numbers = #tpu.dot_dimension_numbers<[1], [0], [0], [1], [0, 0, 1, 1], [], []>} : vector<576x75xbf16>, vector<75x64xbf16>, vector<576x64xf32> -> vector<576x64xf32>
    %c0_4 = arith.constant 0 : index
    %c0_5 = arith.constant 0 : index
    %4 = vector.load %arg3[%c0_4, %c0_5] : memref<1x64xf32, #tpu.memory_space<vmem>>, vector<1x64xf32>
    %5 = vector.broadcast %4 : vector<1x64xf32> to vector<576x64xf32>
    %6 = arith.addf %3, %5 : vector<576x64xf32>
    %c0_6 = arith.constant 0 : index
    %c0_7 = arith.constant 0 : index
    %7 = vector.load %arg9[%c0_6, %c0_7] : memref<576x64xf32, #tpu.memory_space<vmem>>, vector<576x64xf32>
    tpu.vector_store %arg9[%c0_6, %c0_7], %6 {strides = array<i32>} : memref<576x64xf32, #tpu.memory_space<vmem>>, vector<576x64xf32>,
    %c0_8 = arith.constant 0 : index
    %c0_9 = arith.constant 0 : index
    %8 = tpu.strided_load %arg9[%c0_8, %c0_9] {strides = array<i32: 2, 1>} : memref<576x64xf32, #tpu.memory_space<vmem>>, vector<12x64xf32>
    %c1 = arith.constant 1 : index
    %c0_10 = arith.constant 0 : index
    %9 = tpu.strided_load %arg9[%c1, %c0_10] {strides = array<i32: 2, 1>} : memref<576x64xf32, #tpu.memory_space<vmem>>, vector<12x64xf32>
    %10 = arith.maximumf %8, %9 : vector<12x64xf32>
    %c24 = arith.constant 24 : index
    %c0_11 = arith.constant 0 : index
    %11 = tpu.strided_load %arg9[%c24, %c0_11] {strides = array<i32: 2, 1>} : memref<576x64xf32, #tpu.memory_space<vmem>>, vector<12x64xf32>
    %c25 = arith.constant 25 : index
    %c0_12 = arith.constant 0 : index
    %12 = tpu.strided_load %arg9[%c25, %c0_12] {strides = array<i32: 2, 1>} : memref<576x64xf32, #tpu.memory_space<vmem>>, vector<12x64xf32>
    %13 = arith.maximumf %11, %12 : vector<12x64xf32>
    %14 = arith.maximumf %10, %13 : vector<12x64xf32>
    %cst_13 = arith.constant 0.000000e+00 : f32
    %15 = vector.broadcast %cst_13 : f32 to vector<12x64xf32>
    %16 = arith.maximumf %14, %15 : vector<12x64xf32>
    %c0_14 = arith.constant 0 : index
    %c0_15 = arith.constant 0 : index
    %c0_16 = arith.constant 0 : index
    %17 = vector.load %arg10[%c0_14, %c0_15, %c0_16] : memref<12x12x64xf32, #tpu.memory_space<vmem>>, vector<1x12x64xf32>
    %18 = vector.shape_cast %17 : vector<1x12x64xf32> to vector<12x64xf32>
    %19 = vector.shape_cast %16 : vector<12x64xf32> to vector<1x12x64xf32>
    tpu.vector_store %arg10[%c0_14, %c0_15, %c0_16], %19 {strides = array<i32>} : memref<12x12x64xf32, #tpu.memory_space<vmem>>, vector<1x12x64xf32>,
    %c48 = arith.constant 48 : index
    %c0_17 = arith.constant 0 : index
    %20 = tpu.strided_load %arg9[%c48, %c0_17] {strides = array<i32: 2, 1>} : memref<576x64xf32, #tpu.memory_space<vmem>>, vector<12x64xf32>
    %c49 = arith.constant 49 : index
    %c0_18 = arith.constant 0 : index
    %21 = tpu.strided_load %arg9[%c49, %c0_18] {strides = array<i32: 2, 1>} : memref<576x64xf32, #tpu.memory_space<vmem>>, vector<12x64xf32>
    %22 = arith.maximumf %20, %21 : vector<12x64xf32>
    %c72 = arith.constant 72 : index
    %c0_19 = arith.constant 0 : index
    %23 = tpu.strided_load %arg9[%c72, %c0_19] {strides = array<i32: 2, 1>} : memref<576x64xf32, #tpu.memory_space<vmem>>, vector<12x64xf32>
    %c73 = arith.constant 73 : index
    %c0_20 = arith.constant 0 : index
    %24 = tpu.strided_load %arg9[%c73, %c0_20] {strides = array<i32: 2, 1>} : memref<576x64xf32, #tpu.memory_space<vmem>>, vector<12x64xf32>
    %25 = arith.maximumf %23, %24 : vector<12x64xf32>
    %26 = arith.maximumf %22, %25 : vector<12x64xf32>
    %cst_21 = arith.constant 0.000000e+00 : f32
    %27 = vector.broadcast %cst_21 : f32 to vector<12x64xf32>
    %28 = arith.maximumf %26, %27 : vector<12x64xf32>
    %c1_22 = arith.constant 1 : index
    %c0_23 = arith.constant 0 : index
    %c0_24 = arith.constant 0 : index
    %29 = vector.load %arg10[%c1_22, %c0_23, %c0_24] : memref<12x12x64xf32, #tpu.memory_space<vmem>>, vector<1x12x64xf32>
    %30 = vector.shape_cast %29 : vector<1x12x64xf32> to vector<12x64xf32>
    %31 = vector.shape_cast %28 : vector<12x64xf32> to vector<1x12x64xf32>
    tpu.vector_store %arg10[%c1_22, %c0_23, %c0_24], %31 {strides = array<i32>} : memref<12x12x64xf32, #tpu.memory_space<vmem>>, vector<1x12x64xf32>,
    %c96 = arith.constant 96 : index
    %c0_25 = arith.constant 0 : index
    %32 = tpu.strided_load %arg9[%c96, %c0_25] {strides = array<i32: 2, 1>} : memref<576x64xf32, #tpu.memory_space<vmem>>, vector<12x64xf32>
    %c97 = arith.constant 97 : index
    %c0_26 = arith.constant 0 : index
    %33 = tpu.strided_load %arg9[%c97, %c0_26] {strides = array<i32: 2, 1>} : memref<576x64xf32, #tpu.memory_space<vmem>>, vector<12x64xf32>
    %34 = arith.maximumf %32, %33 : vector<12x64xf32>
    %c120 = arith.constant 120 : index
    %c0_27 = arith.constant 0 : index
    %35 = tpu.strided_load %arg9[%c120, %c0_27] {strides = array<i32: 2, 1>} : memref<576x64xf32, #tpu.memory_space<vmem>>, vector<12x64xf32>
    %c121 = arith.constant 121 : index
    %c0_28 = arith.constant 0 : index
    %36 = tpu.strided_load %arg9[%c121, %c0_28] {strides = array<i32: 2, 1>} : memref<576x64xf32, #tpu.memory_space<vmem>>, vector<12x64xf32>
    %37 = arith.maximumf %35, %36 : vector<12x64xf32>
    %38 = arith.maximumf %34, %37 : vector<12x64xf32>
    %cst_29 = arith.constant 0.000000e+00 : f32
    %39 = vector.broadcast %cst_29 : f32 to vector<12x64xf32>
    %40 = arith.maximumf %38, %39 : vector<12x64xf32>
    %c2 = arith.constant 2 : index
    %c0_30 = arith.constant 0 : index
    %c0_31 = arith.constant 0 : index
    %41 = vector.load %arg10[%c2, %c0_30, %c0_31] : memref<12x12x64xf32, #tpu.memory_space<vmem>>, vector<1x12x64xf32>
    %42 = vector.shape_cast %41 : vector<1x12x64xf32> to vector<12x64xf32>
    %43 = vector.shape_cast %40 : vector<12x64xf32> to vector<1x12x64xf32>
    tpu.vector_store %arg10[%c2, %c0_30, %c0_31], %43 {strides = array<i32>} : memref<12x12x64xf32, #tpu.memory_space<vmem>>, vector<1x12x64xf32>,
    %c144 = arith.constant 144 : index
    %c0_32 = arith.constant 0 : index
    %44 = tpu.strided_load %arg9[%c144, %c0_32] {strides = array<i32: 2, 1>} : memref<576x64xf32, #tpu.memory_space<vmem>>, vector<12x64xf32>
    %c145 = arith.constant 145 : index
    %c0_33 = arith.constant 0 : index
    %45 = tpu.strided_load %arg9[%c145, %c0_33] {strides = array<i32: 2, 1>} : memref<576x64xf32, #tpu.memory_space<vmem>>, vector<12x64xf32>
    %46 = arith.maximumf %44, %45 : vector<12x64xf32>
    %c168 = arith.constant 168 : index
    %c0_34 = arith.constant 0 : index
    %47 = tpu.strided_load %arg9[%c168, %c0_34] {strides = array<i32: 2, 1>} : memref<576x64xf32, #tpu.memory_space<vmem>>, vector<12x64xf32>
    %c169 = arith.constant 169 : index
    %c0_35 = arith.constant 0 : index
    %48 = tpu.strided_load %arg9[%c169, %c0_35] {strides = array<i32: 2, 1>} : memref<576x64xf32, #tpu.memory_space<vmem>>, vector<12x64xf32>
    %49 = arith.maximumf %47, %48 : vector<12x64xf32>
    %50 = arith.maximumf %46, %49 : vector<12x64xf32>
    %cst_36 = arith.constant 0.000000e+00 : f32
    %51 = vector.broadcast %cst_36 : f32 to vector<12x64xf32>
    %52 = arith.maximumf %50, %51 : vector<12x64xf32>
    %c3 = arith.constant 3 : index
    %c0_37 = arith.constant 0 : index
    %c0_38 = arith.constant 0 : index
    %53 = vector.load %arg10[%c3, %c0_37, %c0_38] : memref<12x12x64xf32, #tpu.memory_space<vmem>>, vector<1x12x64xf32>
    %54 = vector.shape_cast %53 : vector<1x12x64xf32> to vector<12x64xf32>
    %55 = vector.shape_cast %52 : vector<12x64xf32> to vector<1x12x64xf32>
    tpu.vector_store %arg10[%c3, %c0_37, %c0_38], %55 {strides = array<i32>} : memref<12x12x64xf32, #tpu.memory_space<vmem>>, vector<1x12x64xf32>,
    %c192 = arith.constant 192 : index
    %c0_39 = arith.constant 0 : index
    %56 = tpu.strided_load %arg9[%c192, %c0_39] {strides = array<i32: 2, 1>} : memref<576x64xf32, #tpu.memory_space<vmem>>, vector<12x64xf32>
    %c193 = arith.constant 193 : index
    %c0_40 = arith.constant 0 : index
    %57 = tpu.strided_load %arg9[%c193, %c0_40] {strides = array<i32: 2, 1>} : memref<576x64xf32, #tpu.memory_space<vmem>>, vector<12x64xf32>
    %58 = arith.maximumf %56, %57 : vector<12x64xf32>
    %c216 = arith.constant 216 : index
    %c0_41 = arith.constant 0 : index
    %59 = tpu.strided_load %arg9[%c216, %c0_41] {strides = array<i32: 2, 1>} : memref<576x64xf32, #tpu.memory_space<vmem>>, vector<12x64xf32>
    %c217 = arith.constant 217 : index
    %c0_42 = arith.constant 0 : index
    %60 = tpu.strided_load %arg9[%c217, %c0_42] {strides = array<i32: 2, 1>} : memref<576x64xf32, #tpu.memory_space<vmem>>, vector<12x64xf32>
    %61 = arith.maximumf %59, %60 : vector<12x64xf32>
    %62 = arith.maximumf %58, %61 : vector<12x64xf32>
    %cst_43 = arith.constant 0.000000e+00 : f32
    %63 = vector.broadcast %cst_43 : f32 to vector<12x64xf32>
    %64 = arith.maximumf %62, %63 : vector<12x64xf32>
    %c4 = arith.constant 4 : index
    %c0_44 = arith.constant 0 : index
    %c0_45 = arith.constant 0 : index
    %65 = vector.load %arg10[%c4, %c0_44, %c0_45] : memref<12x12x64xf32, #tpu.memory_space<vmem>>, vector<1x12x64xf32>
    %66 = vector.shape_cast %65 : vector<1x12x64xf32> to vector<12x64xf32>
    %67 = vector.shape_cast %64 : vector<12x64xf32> to vector<1x12x64xf32>
    tpu.vector_store %arg10[%c4, %c0_44, %c0_45], %67 {strides = array<i32>} : memref<12x12x64xf32, #tpu.memory_space<vmem>>, vector<1x12x64xf32>,
    %c240 = arith.constant 240 : index
    %c0_46 = arith.constant 0 : index
    %68 = tpu.strided_load %arg9[%c240, %c0_46] {strides = array<i32: 2, 1>} : memref<576x64xf32, #tpu.memory_space<vmem>>, vector<12x64xf32>
    %c241 = arith.constant 241 : index
    %c0_47 = arith.constant 0 : index
    %69 = tpu.strided_load %arg9[%c241, %c0_47] {strides = array<i32: 2, 1>} : memref<576x64xf32, #tpu.memory_space<vmem>>, vector<12x64xf32>
    %70 = arith.maximumf %68, %69 : vector<12x64xf32>
    %c264 = arith.constant 264 : index
    %c0_48 = arith.constant 0 : index
    %71 = tpu.strided_load %arg9[%c264, %c0_48] {strides = array<i32: 2, 1>} : memref<576x64xf32, #tpu.memory_space<vmem>>, vector<12x64xf32>
    %c265 = arith.constant 265 : index
    %c0_49 = arith.constant 0 : index
    %72 = tpu.strided_load %arg9[%c265, %c0_49] {strides = array<i32: 2, 1>} : memref<576x64xf32, #tpu.memory_space<vmem>>, vector<12x64xf32>
    %73 = arith.maximumf %71, %72 : vector<12x64xf32>
    %74 = arith.maximumf %70, %73 : vector<12x64xf32>
    %cst_50 = arith.constant 0.000000e+00 : f32
    %75 = vector.broadcast %cst_50 : f32 to vector<12x64xf32>
    %76 = arith.maximumf %74, %75 : vector<12x64xf32>
    %c5 = arith.constant 5 : index
    %c0_51 = arith.constant 0 : index
    %c0_52 = arith.constant 0 : index
    %77 = vector.load %arg10[%c5, %c0_51, %c0_52] : memref<12x12x64xf32, #tpu.memory_space<vmem>>, vector<1x12x64xf32>
    %78 = vector.shape_cast %77 : vector<1x12x64xf32> to vector<12x64xf32>
    %79 = vector.shape_cast %76 : vector<12x64xf32> to vector<1x12x64xf32>
    tpu.vector_store %arg10[%c5, %c0_51, %c0_52], %79 {strides = array<i32>} : memref<12x12x64xf32, #tpu.memory_space<vmem>>, vector<1x12x64xf32>,
    %c288 = arith.constant 288 : index
    %c0_53 = arith.constant 0 : index
    %80 = tpu.strided_load %arg9[%c288, %c0_53] {strides = array<i32: 2, 1>} : memref<576x64xf32, #tpu.memory_space<vmem>>, vector<12x64xf32>
    %c289 = arith.constant 289 : index
    %c0_54 = arith.constant 0 : index
    %81 = tpu.strided_load %arg9[%c289, %c0_54] {strides = array<i32: 2, 1>} : memref<576x64xf32, #tpu.memory_space<vmem>>, vector<12x64xf32>
    %82 = arith.maximumf %80, %81 : vector<12x64xf32>
    %c312 = arith.constant 312 : index
    %c0_55 = arith.constant 0 : index
    %83 = tpu.strided_load %arg9[%c312, %c0_55] {strides = array<i32: 2, 1>} : memref<576x64xf32, #tpu.memory_space<vmem>>, vector<12x64xf32>
    %c313 = arith.constant 313 : index
    %c0_56 = arith.constant 0 : index
    %84 = tpu.strided_load %arg9[%c313, %c0_56] {strides = array<i32: 2, 1>} : memref<576x64xf32, #tpu.memory_space<vmem>>, vector<12x64xf32>
    %85 = arith.maximumf %83, %84 : vector<12x64xf32>
    %86 = arith.maximumf %82, %85 : vector<12x64xf32>
    %cst_57 = arith.constant 0.000000e+00 : f32
    %87 = vector.broadcast %cst_57 : f32 to vector<12x64xf32>
    %88 = arith.maximumf %86, %87 : vector<12x64xf32>
    %c6 = arith.constant 6 : index
    %c0_58 = arith.constant 0 : index
    %c0_59 = arith.constant 0 : index
    %89 = vector.load %arg10[%c6, %c0_58, %c0_59] : memref<12x12x64xf32, #tpu.memory_space<vmem>>, vector<1x12x64xf32>
    %90 = vector.shape_cast %89 : vector<1x12x64xf32> to vector<12x64xf32>
    %91 = vector.shape_cast %88 : vector<12x64xf32> to vector<1x12x64xf32>
    tpu.vector_store %arg10[%c6, %c0_58, %c0_59], %91 {strides = array<i32>} : memref<12x12x64xf32, #tpu.memory_space<vmem>>, vector<1x12x64xf32>,
    %c336 = arith.constant 336 : index
    %c0_60 = arith.constant 0 : index
    %92 = tpu.strided_load %arg9[%c336, %c0_60] {strides = array<i32: 2, 1>} : memref<576x64xf32, #tpu.memory_space<vmem>>, vector<12x64xf32>
    %c337 = arith.constant 337 : index
    %c0_61 = arith.constant 0 : index
    %93 = tpu.strided_load %arg9[%c337, %c0_61] {strides = array<i32: 2, 1>} : memref<576x64xf32, #tpu.memory_space<vmem>>, vector<12x64xf32>
    %94 = arith.maximumf %92, %93 : vector<12x64xf32>
    %c360 = arith.constant 360 : index
    %c0_62 = arith.constant 0 : index
    %95 = tpu.strided_load %arg9[%c360, %c0_62] {strides = array<i32: 2, 1>} : memref<576x64xf32, #tpu.memory_space<vmem>>, vector<12x64xf32>
    %c361 = arith.constant 361 : index
    %c0_63 = arith.constant 0 : index
    %96 = tpu.strided_load %arg9[%c361, %c0_63] {strides = array<i32: 2, 1>} : memref<576x64xf32, #tpu.memory_space<vmem>>, vector<12x64xf32>
    %97 = arith.maximumf %95, %96 : vector<12x64xf32>
    %98 = arith.maximumf %94, %97 : vector<12x64xf32>
    %cst_64 = arith.constant 0.000000e+00 : f32
    %99 = vector.broadcast %cst_64 : f32 to vector<12x64xf32>
    %100 = arith.maximumf %98, %99 : vector<12x64xf32>
    %c7 = arith.constant 7 : index
    %c0_65 = arith.constant 0 : index
    %c0_66 = arith.constant 0 : index
    %101 = vector.load %arg10[%c7, %c0_65, %c0_66] : memref<12x12x64xf32, #tpu.memory_space<vmem>>, vector<1x12x64xf32>
    %102 = vector.shape_cast %101 : vector<1x12x64xf32> to vector<12x64xf32>
    %103 = vector.shape_cast %100 : vector<12x64xf32> to vector<1x12x64xf32>
    tpu.vector_store %arg10[%c7, %c0_65, %c0_66], %103 {strides = array<i32>} : memref<12x12x64xf32, #tpu.memory_space<vmem>>, vector<1x12x64xf32>,
    %c384 = arith.constant 384 : index
    %c0_67 = arith.constant 0 : index
    %104 = tpu.strided_load %arg9[%c384, %c0_67] {strides = array<i32: 2, 1>} : memref<576x64xf32, #tpu.memory_space<vmem>>, vector<12x64xf32>
    %c385 = arith.constant 385 : index
    %c0_68 = arith.constant 0 : index
    %105 = tpu.strided_load %arg9[%c385, %c0_68] {strides = array<i32: 2, 1>} : memref<576x64xf32, #tpu.memory_space<vmem>>, vector<12x64xf32>
    %106 = arith.maximumf %104, %105 : vector<12x64xf32>
    %c408 = arith.constant 408 : index
    %c0_69 = arith.constant 0 : index
    %107 = tpu.strided_load %arg9[%c408, %c0_69] {strides = array<i32: 2, 1>} : memref<576x64xf32, #tpu.memory_space<vmem>>, vector<12x64xf32>
    %c409 = arith.constant 409 : index
    %c0_70 = arith.constant 0 : index
    %108 = tpu.strided_load %arg9[%c409, %c0_70] {strides = array<i32: 2, 1>} : memref<576x64xf32, #tpu.memory_space<vmem>>, vector<12x64xf32>
    %109 = arith.maximumf %107, %108 : vector<12x64xf32>
    %110 = arith.maximumf %106, %109 : vector<12x64xf32>
    %cst_71 = arith.constant 0.000000e+00 : f32
    %111 = vector.broadcast %cst_71 : f32 to vector<12x64xf32>
    %112 = arith.maximumf %110, %111 : vector<12x64xf32>
    %c8 = arith.constant 8 : index
    %c0_72 = arith.constant 0 : index
    %c0_73 = arith.constant 0 : index
    %113 = vector.load %arg10[%c8, %c0_72, %c0_73] : memref<12x12x64xf32, #tpu.memory_space<vmem>>, vector<1x12x64xf32>
    %114 = vector.shape_cast %113 : vector<1x12x64xf32> to vector<12x64xf32>
    %115 = vector.shape_cast %112 : vector<12x64xf32> to vector<1x12x64xf32>
    tpu.vector_store %arg10[%c8, %c0_72, %c0_73], %115 {strides = array<i32>} : memref<12x12x64xf32, #tpu.memory_space<vmem>>, vector<1x12x64xf32>,
    %c432 = arith.constant 432 : index
    %c0_74 = arith.constant 0 : index
    %116 = tpu.strided_load %arg9[%c432, %c0_74] {strides = array<i32: 2, 1>} : memref<576x64xf32, #tpu.memory_space<vmem>>, vector<12x64xf32>
    %c433 = arith.constant 433 : index
    %c0_75 = arith.constant 0 : index
    %117 = tpu.strided_load %arg9[%c433, %c0_75] {strides = array<i32: 2, 1>} : memref<576x64xf32, #tpu.memory_space<vmem>>, vector<12x64xf32>
    %118 = arith.maximumf %116, %117 : vector<12x64xf32>
    %c456 = arith.constant 456 : index
    %c0_76 = arith.constant 0 : index
    %119 = tpu.strided_load %arg9[%c456, %c0_76] {strides = array<i32: 2, 1>} : memref<576x64xf32, #tpu.memory_space<vmem>>, vector<12x64xf32>
    %c457 = arith.constant 457 : index
    %c0_77 = arith.constant 0 : index
    %120 = tpu.strided_load %arg9[%c457, %c0_77] {strides = array<i32: 2, 1>} : memref<576x64xf32, #tpu.memory_space<vmem>>, vector<12x64xf32>
    %121 = arith.maximumf %119, %120 : vector<12x64xf32>
    %122 = arith.maximumf %118, %121 : vector<12x64xf32>
    %cst_78 = arith.constant 0.000000e+00 : f32
    %123 = vector.broadcast %cst_78 : f32 to vector<12x64xf32>
    %124 = arith.maximumf %122, %123 : vector<12x64xf32>
    %c9 = arith.constant 9 : index
    %c0_79 = arith.constant 0 : index
    %c0_80 = arith.constant 0 : index
    %125 = vector.load %arg10[%c9, %c0_79, %c0_80] : memref<12x12x64xf32, #tpu.memory_space<vmem>>, vector<1x12x64xf32>
    %126 = vector.shape_cast %125 : vector<1x12x64xf32> to vector<12x64xf32>
    %127 = vector.shape_cast %124 : vector<12x64xf32> to vector<1x12x64xf32>
    tpu.vector_store %arg10[%c9, %c0_79, %c0_80], %127 {strides = array<i32>} : memref<12x12x64xf32, #tpu.memory_space<vmem>>, vector<1x12x64xf32>,
    %c480 = arith.constant 480 : index
    %c0_81 = arith.constant 0 : index
    %128 = tpu.strided_load %arg9[%c480, %c0_81] {strides = array<i32: 2, 1>} : memref<576x64xf32, #tpu.memory_space<vmem>>, vector<12x64xf32>
    %c481 = arith.constant 481 : index
    %c0_82 = arith.constant 0 : index
    %129 = tpu.strided_load %arg9[%c481, %c0_82] {strides = array<i32: 2, 1>} : memref<576x64xf32, #tpu.memory_space<vmem>>, vector<12x64xf32>
    %130 = arith.maximumf %128, %129 : vector<12x64xf32>
    %c504 = arith.constant 504 : index
    %c0_83 = arith.constant 0 : index
    %131 = tpu.strided_load %arg9[%c504, %c0_83] {strides = array<i32: 2, 1>} : memref<576x64xf32, #tpu.memory_space<vmem>>, vector<12x64xf32>
    %c505 = arith.constant 505 : index
    %c0_84 = arith.constant 0 : index
    %132 = tpu.strided_load %arg9[%c505, %c0_84] {strides = array<i32: 2, 1>} : memref<576x64xf32, #tpu.memory_space<vmem>>, vector<12x64xf32>
    %133 = arith.maximumf %131, %132 : vector<12x64xf32>
    %134 = arith.maximumf %130, %133 : vector<12x64xf32>
    %cst_85 = arith.constant 0.000000e+00 : f32
    %135 = vector.broadcast %cst_85 : f32 to vector<12x64xf32>
    %136 = arith.maximumf %134, %135 : vector<12x64xf32>
    %c10 = arith.constant 10 : index
    %c0_86 = arith.constant 0 : index
    %c0_87 = arith.constant 0 : index
    %137 = vector.load %arg10[%c10, %c0_86, %c0_87] : memref<12x12x64xf32, #tpu.memory_space<vmem>>, vector<1x12x64xf32>
    %138 = vector.shape_cast %137 : vector<1x12x64xf32> to vector<12x64xf32>
    %139 = vector.shape_cast %136 : vector<12x64xf32> to vector<1x12x64xf32>
    tpu.vector_store %arg10[%c10, %c0_86, %c0_87], %139 {strides = array<i32>} : memref<12x12x64xf32, #tpu.memory_space<vmem>>, vector<1x12x64xf32>,
    %c528 = arith.constant 528 : index
    %c0_88 = arith.constant 0 : index
    %140 = tpu.strided_load %arg9[%c528, %c0_88] {strides = array<i32: 2, 1>} : memref<576x64xf32, #tpu.memory_space<vmem>>, vector<12x64xf32>
    %c529 = arith.constant 529 : index
    %c0_89 = arith.constant 0 : index
    %141 = tpu.strided_load %arg9[%c529, %c0_89] {strides = array<i32: 2, 1>} : memref<576x64xf32, #tpu.memory_space<vmem>>, vector<12x64xf32>
    %142 = arith.maximumf %140, %141 : vector<12x64xf32>
    %c552 = arith.constant 552 : index
    %c0_90 = arith.constant 0 : index
    %143 = tpu.strided_load %arg9[%c552, %c0_90] {strides = array<i32: 2, 1>} : memref<576x64xf32, #tpu.memory_space<vmem>>, vector<12x64xf32>
    %c553 = arith.constant 553 : index
    %c0_91 = arith.constant 0 : index
    %144 = tpu.strided_load %arg9[%c553, %c0_91] {strides = array<i32: 2, 1>} : memref<576x64xf32, #tpu.memory_space<vmem>>, vector<12x64xf32>
    %145 = arith.maximumf %143, %144 : vector<12x64xf32>
    %146 = arith.maximumf %142, %145 : vector<12x64xf32>
    %cst_92 = arith.constant 0.000000e+00 : f32
    %147 = vector.broadcast %cst_92 : f32 to vector<12x64xf32>
    %148 = arith.maximumf %146, %147 : vector<12x64xf32>
    %c11 = arith.constant 11 : index
    %c0_93 = arith.constant 0 : index
    %c0_94 = arith.constant 0 : index
    %149 = vector.load %arg10[%c11, %c0_93, %c0_94] : memref<12x12x64xf32, #tpu.memory_space<vmem>>, vector<1x12x64xf32>
    %150 = vector.shape_cast %149 : vector<1x12x64xf32> to vector<12x64xf32>
    %151 = vector.shape_cast %148 : vector<12x64xf32> to vector<1x12x64xf32>
    tpu.vector_store %arg10[%c11, %c0_93, %c0_94], %151 {strides = array<i32>} : memref<12x12x64xf32, #tpu.memory_space<vmem>>, vector<1x12x64xf32>,
    %cst_95 = arith.constant 0.000000e+00 : f32
    %152 = vector.broadcast %cst_95 : f32 to vector<64x64xf32>
    %c0_96 = arith.constant 0 : index
    %c0_97 = arith.constant 0 : index
    %c0_98 = arith.constant 0 : index
    %153 = vector.load %arg10[%c0_96, %c0_97, %c0_98] : memref<12x12x64xf32, #tpu.memory_space<vmem>>, vector<1x8x64xf32>
    %154 = vector.shape_cast %153 : vector<1x8x64xf32> to vector<8x64xf32>
    %c1_99 = arith.constant 1 : index
    %c0_100 = arith.constant 0 : index
    %c0_101 = arith.constant 0 : index
    %155 = vector.load %arg10[%c1_99, %c0_100, %c0_101] : memref<12x12x64xf32, #tpu.memory_space<vmem>>, vector<1x8x64xf32>
    %156 = vector.shape_cast %155 : vector<1x8x64xf32> to vector<8x64xf32>
    %c2_102 = arith.constant 2 : index
    %c0_103 = arith.constant 0 : index
    %c0_104 = arith.constant 0 : index
    %157 = vector.load %arg10[%c2_102, %c0_103, %c0_104] : memref<12x12x64xf32, #tpu.memory_space<vmem>>, vector<1x8x64xf32>
    %158 = vector.shape_cast %157 : vector<1x8x64xf32> to vector<8x64xf32>
    %c3_105 = arith.constant 3 : index
    %c0_106 = arith.constant 0 : index
    %c0_107 = arith.constant 0 : index
    %159 = vector.load %arg10[%c3_105, %c0_106, %c0_107] : memref<12x12x64xf32, #tpu.memory_space<vmem>>, vector<1x8x64xf32>
    %160 = vector.shape_cast %159 : vector<1x8x64xf32> to vector<8x64xf32>
    %c4_108 = arith.constant 4 : index
    %c0_109 = arith.constant 0 : index
    %c0_110 = arith.constant 0 : index
    %161 = vector.load %arg10[%c4_108, %c0_109, %c0_110] : memref<12x12x64xf32, #tpu.memory_space<vmem>>, vector<1x8x64xf32>
    %162 = vector.shape_cast %161 : vector<1x8x64xf32> to vector<8x64xf32>
    %c5_111 = arith.constant 5 : index
    %c0_112 = arith.constant 0 : index
    %c0_113 = arith.constant 0 : index
    %163 = vector.load %arg10[%c5_111, %c0_112, %c0_113] : memref<12x12x64xf32, #tpu.memory_space<vmem>>, vector<1x8x64xf32>
    %164 = vector.shape_cast %163 : vector<1x8x64xf32> to vector<8x64xf32>
    %c6_114 = arith.constant 6 : index
    %c0_115 = arith.constant 0 : index
    %c0_116 = arith.constant 0 : index
    %165 = vector.load %arg10[%c6_114, %c0_115, %c0_116] : memref<12x12x64xf32, #tpu.memory_space<vmem>>, vector<1x8x64xf32>
    %166 = vector.shape_cast %165 : vector<1x8x64xf32> to vector<8x64xf32>
    %c7_117 = arith.constant 7 : index
    %c0_118 = arith.constant 0 : index
    %c0_119 = arith.constant 0 : index
    %167 = vector.load %arg10[%c7_117, %c0_118, %c0_119] : memref<12x12x64xf32, #tpu.memory_space<vmem>>, vector<1x8x64xf32>
    %168 = vector.shape_cast %167 : vector<1x8x64xf32> to vector<8x64xf32>
    %169 = tpu.concatenate %154, %156, %158, %160, %162, %164, %166, %168 in 0 : vector<8x64xf32>, vector<8x64xf32>, vector<8x64xf32>, vector<8x64xf32>, vector<8x64xf32>, vector<8x64xf32>, vector<8x64xf32>, vector<8x64xf32> -> vector<64x64xf32>
    %170 = arith.truncf %169 : vector<64x64xf32> to vector<64x64xbf16>
    %c0_120 = arith.constant 0 : index
    %c0_121 = arith.constant 0 : index
    %c0_122 = arith.constant 0 : index
    %171 = vector.load %arg4[%c0_120, %c0_121, %c0_122] : memref<25x64x64xbf16, #tpu.memory_space<vmem>>, vector<1x64x64xbf16>
    %172 = vector.shape_cast %171 : vector<1x64x64xbf16> to vector<64x64xbf16>
    %cst_123 = arith.constant dense<0.000000e+00> : vector<64x64xf32>
    %173 = tpu.matmul %170, %172, %cst_123 {dimension_numbers = #tpu.dot_dimension_numbers<[1], [0], [0], [1], [0, 0, 1, 1], [], []>} : vector<64x64xbf16>, vector<64x64xbf16>, vector<64x64xf32> -> vector<64x64xf32>
    %174 = arith.addf %152, %173 : vector<64x64xf32>
    %c0_124 = arith.constant 0 : index
    %c1_125 = arith.constant 1 : index
    %c0_126 = arith.constant 0 : index
    %175 = vector.load %arg10[%c0_124, %c1_125, %c0_126] : memref<12x12x64xf32, #tpu.memory_space<vmem>>, vector<1x8x64xf32>
    %176 = vector.shape_cast %175 : vector<1x8x64xf32> to vector<8x64xf32>
    %c1_127 = arith.constant 1 : index
    %c1_128 = arith.constant 1 : index
    %c0_129 = arith.constant 0 : index
    %177 = vector.load %arg10[%c1_127, %c1_128, %c0_129] : memref<12x12x64xf32, #tpu.memory_space<vmem>>, vector<1x8x64xf32>
    %178 = vector.shape_cast %177 : vector<1x8x64xf32> to vector<8x64xf32>
    %c2_130 = arith.constant 2 : index
    %c1_131 = arith.constant 1 : index
    %c0_132 = arith.constant 0 : index
    %179 = vector.load %arg10[%c2_130, %c1_131, %c0_132] : memref<12x12x64xf32, #tpu.memory_space<vmem>>, vector<1x8x64xf32>
    %180 = vector.shape_cast %179 : vector<1x8x64xf32> to vector<8x64xf32>
    %c3_133 = arith.constant 3 : index
    %c1_134 = arith.constant 1 : index
    %c0_135 = arith.constant 0 : index
    %181 = vector.load %arg10[%c3_133, %c1_134, %c0_135] : memref<12x12x64xf32, #tpu.memory_space<vmem>>, vector<1x8x64xf32>
    %182 = vector.shape_cast %181 : vector<1x8x64xf32> to vector<8x64xf32>
    %c4_136 = arith.constant 4 : index
    %c1_137 = arith.constant 1 : index
    %c0_138 = arith.constant 0 : index
    %183 = vector.load %arg10[%c4_136, %c1_137, %c0_138] : memref<12x12x64xf32, #tpu.memory_space<vmem>>, vector<1x8x64xf32>
    %184 = vector.shape_cast %183 : vector<1x8x64xf32> to vector<8x64xf32>
    %c5_139 = arith.constant 5 : index
    %c1_140 = arith.constant 1 : index
    %c0_141 = arith.constant 0 : index
    %185 = vector.load %arg10[%c5_139, %c1_140, %c0_141] : memref<12x12x64xf32, #tpu.memory_space<vmem>>, vector<1x8x64xf32>
    %186 = vector.shape_cast %185 : vector<1x8x64xf32> to vector<8x64xf32>
    %c6_142 = arith.constant 6 : index
    %c1_143 = arith.constant 1 : index
    %c0_144 = arith.constant 0 : index
    %187 = vector.load %arg10[%c6_142, %c1_143, %c0_144] : memref<12x12x64xf32, #tpu.memory_space<vmem>>, vector<1x8x64xf32>
    %188 = vector.shape_cast %187 : vector<1x8x64xf32> to vector<8x64xf32>
    %c7_145 = arith.constant 7 : index
    %c1_146 = arith.constant 1 : index
    %c0_147 = arith.constant 0 : index
    %189 = vector.load %arg10[%c7_145, %c1_146, %c0_147] : memref<12x12x64xf32, #tpu.memory_space<vmem>>, vector<1x8x64xf32>
    %190 = vector.shape_cast %189 : vector<1x8x64xf32> to vector<8x64xf32>
    %191 = tpu.concatenate %176, %178, %180, %182, %184, %186, %188, %190 in 0 : vector<8x64xf32>, vector<8x64xf32>, vector<8x64xf32>, vector<8x64xf32>, vector<8x64xf32>, vector<8x64xf32>, vector<8x64xf32>, vector<8x64xf32> -> vector<64x64xf32>
    %192 = arith.truncf %191 : vector<64x64xf32> to vector<64x64xbf16>
    %c1_148 = arith.constant 1 : index
    %c0_149 = arith.constant 0 : index
    %c0_150 = arith.constant 0 : index
    %193 = vector.load %arg4[%c1_148, %c0_149, %c0_150] : memref<25x64x64xbf16, #tpu.memory_space<vmem>>, vector<1x64x64xbf16>
    %194 = vector.shape_cast %193 : vector<1x64x64xbf16> to vector<64x64xbf16>
    %cst_151 = arith.constant dense<0.000000e+00> : vector<64x64xf32>
    %195 = tpu.matmul %192, %194, %cst_151 {dimension_numbers = #tpu.dot_dimension_numbers<[1], [0], [0], [1], [0, 0, 1, 1], [], []>} : vector<64x64xbf16>, vector<64x64xbf16>, vector<64x64xf32> -> vector<64x64xf32>
    %196 = arith.addf %174, %195 : vector<64x64xf32>
    %c0_152 = arith.constant 0 : index
    %c2_153 = arith.constant 2 : index
    %c0_154 = arith.constant 0 : index
    %197 = vector.load %arg10[%c0_152, %c2_153, %c0_154] : memref<12x12x64xf32, #tpu.memory_space<vmem>>, vector<1x8x64xf32>
    %198 = vector.shape_cast %197 : vector<1x8x64xf32> to vector<8x64xf32>
    %c1_155 = arith.constant 1 : index
    %c2_156 = arith.constant 2 : index
    %c0_157 = arith.constant 0 : index
    %199 = vector.load %arg10[%c1_155, %c2_156, %c0_157] : memref<12x12x64xf32, #tpu.memory_space<vmem>>, vector<1x8x64xf32>
    %200 = vector.shape_cast %199 : vector<1x8x64xf32> to vector<8x64xf32>
    %c2_158 = arith.constant 2 : index
    %c2_159 = arith.constant 2 : index
    %c0_160 = arith.constant 0 : index
    %201 = vector.load %arg10[%c2_158, %c2_159, %c0_160] : memref<12x12x64xf32, #tpu.memory_space<vmem>>, vector<1x8x64xf32>
    %202 = vector.shape_cast %201 : vector<1x8x64xf32> to vector<8x64xf32>
    %c3_161 = arith.constant 3 : index
    %c2_162 = arith.constant 2 : index
    %c0_163 = arith.constant 0 : index
    %203 = vector.load %arg10[%c3_161, %c2_162, %c0_163] : memref<12x12x64xf32, #tpu.memory_space<vmem>>, vector<1x8x64xf32>
    %204 = vector.shape_cast %203 : vector<1x8x64xf32> to vector<8x64xf32>
    %c4_164 = arith.constant 4 : index
    %c2_165 = arith.constant 2 : index
    %c0_166 = arith.constant 0 : index
    %205 = vector.load %arg10[%c4_164, %c2_165, %c0_166] : memref<12x12x64xf32, #tpu.memory_space<vmem>>, vector<1x8x64xf32>
    %206 = vector.shape_cast %205 : vector<1x8x64xf32> to vector<8x64xf32>
    %c5_167 = arith.constant 5 : index
    %c2_168 = arith.constant 2 : index
    %c0_169 = arith.constant 0 : index
    %207 = vector.load %arg10[%c5_167, %c2_168, %c0_169] : memref<12x12x64xf32, #tpu.memory_space<vmem>>, vector<1x8x64xf32>
    %208 = vector.shape_cast %207 : vector<1x8x64xf32> to vector<8x64xf32>
    %c6_170 = arith.constant 6 : index
    %c2_171 = arith.constant 2 : index
    %c0_172 = arith.constant 0 : index
    %209 = vector.load %arg10[%c6_170, %c2_171, %c0_172] : memref<12x12x64xf32, #tpu.memory_space<vmem>>, vector<1x8x64xf32>
    %210 = vector.shape_cast %209 : vector<1x8x64xf32> to vector<8x64xf32>
    %c7_173 = arith.constant 7 : index
    %c2_174 = arith.constant 2 : index
    %c0_175 = arith.constant 0 : index
    %211 = vector.load %arg10[%c7_173, %c2_174, %c0_175] : memref<12x12x64xf32, #tpu.memory_space<vmem>>, vector<1x8x64xf32>
    %212 = vector.shape_cast %211 : vector<1x8x64xf32> to vector<8x64xf32>
    %213 = tpu.concatenate %198, %200, %202, %204, %206, %208, %210, %212 in 0 : vector<8x64xf32>, vector<8x64xf32>, vector<8x64xf32>, vector<8x64xf32>, vector<8x64xf32>, vector<8x64xf32>, vector<8x64xf32>, vector<8x64xf32> -> vector<64x64xf32>
    %214 = arith.truncf %213 : vector<64x64xf32> to vector<64x64xbf16>
    %c2_176 = arith.constant 2 : index
    %c0_177 = arith.constant 0 : index
    %c0_178 = arith.constant 0 : index
    %215 = vector.load %arg4[%c2_176, %c0_177, %c0_178] : memref<25x64x64xbf16, #tpu.memory_space<vmem>>, vector<1x64x64xbf16>
    %216 = vector.shape_cast %215 : vector<1x64x64xbf16> to vector<64x64xbf16>
    %cst_179 = arith.constant dense<0.000000e+00> : vector<64x64xf32>
    %217 = tpu.matmul %214, %216, %cst_179 {dimension_numbers = #tpu.dot_dimension_numbers<[1], [0], [0], [1], [0, 0, 1, 1], [], []>} : vector<64x64xbf16>, vector<64x64xbf16>, vector<64x64xf32> -> vector<64x64xf32>
    %218 = arith.addf %196, %217 : vector<64x64xf32>
    %c0_180 = arith.constant 0 : index
    %c3_181 = arith.constant 3 : index
    %c0_182 = arith.constant 0 : index
    %219 = vector.load %arg10[%c0_180, %c3_181, %c0_182] : memref<12x12x64xf32, #tpu.memory_space<vmem>>, vector<1x8x64xf32>
    %220 = vector.shape_cast %219 : vector<1x8x64xf32> to vector<8x64xf32>
    %c1_183 = arith.constant 1 : index
    %c3_184 = arith.constant 3 : index
    %c0_185 = arith.constant 0 : index
    %221 = vector.load %arg10[%c1_183, %c3_184, %c0_185] : memref<12x12x64xf32, #tpu.memory_space<vmem>>, vector<1x8x64xf32>
    %222 = vector.shape_cast %221 : vector<1x8x64xf32> to vector<8x64xf32>
    %c2_186 = arith.constant 2 : index
    %c3_187 = arith.constant 3 : index
    %c0_188 = arith.constant 0 : index
    %223 = vector.load %arg10[%c2_186, %c3_187, %c0_188] : memref<12x12x64xf32, #tpu.memory_space<vmem>>, vector<1x8x64xf32>
    %224 = vector.shape_cast %223 : vector<1x8x64xf32> to vector<8x64xf32>
    %c3_189 = arith.constant 3 : index
    %c3_190 = arith.constant 3 : index
    %c0_191 = arith.constant 0 : index
    %225 = vector.load %arg10[%c3_189, %c3_190, %c0_191] : memref<12x12x64xf32, #tpu.memory_space<vmem>>, vector<1x8x64xf32>
    %226 = vector.shape_cast %225 : vector<1x8x64xf32> to vector<8x64xf32>
    %c4_192 = arith.constant 4 : index
    %c3_193 = arith.constant 3 : index
    %c0_194 = arith.constant 0 : index
    %227 = vector.load %arg10[%c4_192, %c3_193, %c0_194] : memref<12x12x64xf32, #tpu.memory_space<vmem>>, vector<1x8x64xf32>
    %228 = vector.shape_cast %227 : vector<1x8x64xf32> to vector<8x64xf32>
    %c5_195 = arith.constant 5 : index
    %c3_196 = arith.constant 3 : index
    %c0_197 = arith.constant 0 : index
    %229 = vector.load %arg10[%c5_195, %c3_196, %c0_197] : memref<12x12x64xf32, #tpu.memory_space<vmem>>, vector<1x8x64xf32>
    %230 = vector.shape_cast %229 : vector<1x8x64xf32> to vector<8x64xf32>
    %c6_198 = arith.constant 6 : index
    %c3_199 = arith.constant 3 : index
    %c0_200 = arith.constant 0 : index
    %231 = vector.load %arg10[%c6_198, %c3_199, %c0_200] : memref<12x12x64xf32, #tpu.memory_space<vmem>>, vector<1x8x64xf32>
    %232 = vector.shape_cast %231 : vector<1x8x64xf32> to vector<8x64xf32>
    %c7_201 = arith.constant 7 : index
    %c3_202 = arith.constant 3 : index
    %c0_203 = arith.constant 0 : index
    %233 = vector.load %arg10[%c7_201, %c3_202, %c0_203] : memref<12x12x64xf32, #tpu.memory_space<vmem>>, vector<1x8x64xf32>
    %234 = vector.shape_cast %233 : vector<1x8x64xf32> to vector<8x64xf32>
    %235 = tpu.concatenate %220, %222, %224, %226, %228, %230, %232, %234 in 0 : vector<8x64xf32>, vector<8x64xf32>, vector<8x64xf32>, vector<8x64xf32>, vector<8x64xf32>, vector<8x64xf32>, vector<8x64xf32>, vector<8x64xf32> -> vector<64x64xf32>
    %236 = arith.truncf %235 : vector<64x64xf32> to vector<64x64xbf16>
    %c3_204 = arith.constant 3 : index
    %c0_205 = arith.constant 0 : index
    %c0_206 = arith.constant 0 : index
    %237 = vector.load %arg4[%c3_204, %c0_205, %c0_206] : memref<25x64x64xbf16, #tpu.memory_space<vmem>>, vector<1x64x64xbf16>
    %238 = vector.shape_cast %237 : vector<1x64x64xbf16> to vector<64x64xbf16>
    %cst_207 = arith.constant dense<0.000000e+00> : vector<64x64xf32>
    %239 = tpu.matmul %236, %238, %cst_207 {dimension_numbers = #tpu.dot_dimension_numbers<[1], [0], [0], [1], [0, 0, 1, 1], [], []>} : vector<64x64xbf16>, vector<64x64xbf16>, vector<64x64xf32> -> vector<64x64xf32>
    %240 = arith.addf %218, %239 : vector<64x64xf32>
    %c0_208 = arith.constant 0 : index
    %c4_209 = arith.constant 4 : index
    %c0_210 = arith.constant 0 : index
    %241 = vector.load %arg10[%c0_208, %c4_209, %c0_210] : memref<12x12x64xf32, #tpu.memory_space<vmem>>, vector<1x8x64xf32>
    %242 = vector.shape_cast %241 : vector<1x8x64xf32> to vector<8x64xf32>
    %c1_211 = arith.constant 1 : index
    %c4_212 = arith.constant 4 : index
    %c0_213 = arith.constant 0 : index
    %243 = vector.load %arg10[%c1_211, %c4_212, %c0_213] : memref<12x12x64xf32, #tpu.memory_space<vmem>>, vector<1x8x64xf32>
    %244 = vector.shape_cast %243 : vector<1x8x64xf32> to vector<8x64xf32>
    %c2_214 = arith.constant 2 : index
    %c4_215 = arith.constant 4 : index
    %c0_216 = arith.constant 0 : index
    %245 = vector.load %arg10[%c2_214, %c4_215, %c0_216] : memref<12x12x64xf32, #tpu.memory_space<vmem>>, vector<1x8x64xf32>
    %246 = vector.shape_cast %245 : vector<1x8x64xf32> to vector<8x64xf32>
    %c3_217 = arith.constant 3 : index
    %c4_218 = arith.constant 4 : index
    %c0_219 = arith.constant 0 : index
    %247 = vector.load %arg10[%c3_217, %c4_218, %c0_219] : memref<12x12x64xf32, #tpu.memory_space<vmem>>, vector<1x8x64xf32>
    %248 = vector.shape_cast %247 : vector<1x8x64xf32> to vector<8x64xf32>
    %c4_220 = arith.constant 4 : index
    %c4_221 = arith.constant 4 : index
    %c0_222 = arith.constant 0 : index
    %249 = vector.load %arg10[%c4_220, %c4_221, %c0_222] : memref<12x12x64xf32, #tpu.memory_space<vmem>>, vector<1x8x64xf32>
    %250 = vector.shape_cast %249 : vector<1x8x64xf32> to vector<8x64xf32>
    %c5_223 = arith.constant 5 : index
    %c4_224 = arith.constant 4 : index
    %c0_225 = arith.constant 0 : index
    %251 = vector.load %arg10[%c5_223, %c4_224, %c0_225] : memref<12x12x64xf32, #tpu.memory_space<vmem>>, vector<1x8x64xf32>
    %252 = vector.shape_cast %251 : vector<1x8x64xf32> to vector<8x64xf32>
    %c6_226 = arith.constant 6 : index
    %c4_227 = arith.constant 4 : index
    %c0_228 = arith.constant 0 : index
    %253 = vector.load %arg10[%c6_226, %c4_227, %c0_228] : memref<12x12x64xf32, #tpu.memory_space<vmem>>, vector<1x8x64xf32>
    %254 = vector.shape_cast %253 : vector<1x8x64xf32> to vector<8x64xf32>
    %c7_229 = arith.constant 7 : index
    %c4_230 = arith.constant 4 : index
    %c0_231 = arith.constant 0 : index
    %255 = vector.load %arg10[%c7_229, %c4_230, %c0_231] : memref<12x12x64xf32, #tpu.memory_space<vmem>>, vector<1x8x64xf32>
    %256 = vector.shape_cast %255 : vector<1x8x64xf32> to vector<8x64xf32>
    %257 = tpu.concatenate %242, %244, %246, %248, %250, %252, %254, %256 in 0 : vector<8x64xf32>, vector<8x64xf32>, vector<8x64xf32>, vector<8x64xf32>, vector<8x64xf32>, vector<8x64xf32>, vector<8x64xf32>, vector<8x64xf32> -> vector<64x64xf32>
    %258 = arith.truncf %257 : vector<64x64xf32> to vector<64x64xbf16>
    %c4_232 = arith.constant 4 : index
    %c0_233 = arith.constant 0 : index
    %c0_234 = arith.constant 0 : index
    %259 = vector.load %arg4[%c4_232, %c0_233, %c0_234] : memref<25x64x64xbf16, #tpu.memory_space<vmem>>, vector<1x64x64xbf16>
    %260 = vector.shape_cast %259 : vector<1x64x64xbf16> to vector<64x64xbf16>
    %cst_235 = arith.constant dense<0.000000e+00> : vector<64x64xf32>
    %261 = tpu.matmul %258, %260, %cst_235 {dimension_numbers = #tpu.dot_dimension_numbers<[1], [0], [0], [1], [0, 0, 1, 1], [], []>} : vector<64x64xbf16>, vector<64x64xbf16>, vector<64x64xf32> -> vector<64x64xf32>
    %262 = arith.addf %240, %261 : vector<64x64xf32>
    %c1_236 = arith.constant 1 : index
    %c0_237 = arith.constant 0 : index
    %c0_238 = arith.constant 0 : index
    %263 = vector.load %arg10[%c1_236, %c0_237, %c0_238] : memref<12x12x64xf32, #tpu.memory_space<vmem>>, vector<1x8x64xf32>
    %264 = vector.shape_cast %263 : vector<1x8x64xf32> to vector<8x64xf32>
    %c2_239 = arith.constant 2 : index
    %c0_240 = arith.constant 0 : index
    %c0_241 = arith.constant 0 : index
    %265 = vector.load %arg10[%c2_239, %c0_240, %c0_241] : memref<12x12x64xf32, #tpu.memory_space<vmem>>, vector<1x8x64xf32>
    %266 = vector.shape_cast %265 : vector<1x8x64xf32> to vector<8x64xf32>
    %c3_242 = arith.constant 3 : index
    %c0_243 = arith.constant 0 : index
    %c0_244 = arith.constant 0 : index
    %267 = vector.load %arg10[%c3_242, %c0_243, %c0_244] : memref<12x12x64xf32, #tpu.memory_space<vmem>>, vector<1x8x64xf32>
    %268 = vector.shape_cast %267 : vector<1x8x64xf32> to vector<8x64xf32>
    %c4_245 = arith.constant 4 : index
    %c0_246 = arith.constant 0 : index
    %c0_247 = arith.constant 0 : index
    %269 = vector.load %arg10[%c4_245, %c0_246, %c0_247] : memref<12x12x64xf32, #tpu.memory_space<vmem>>, vector<1x8x64xf32>
    %270 = vector.shape_cast %269 : vector<1x8x64xf32> to vector<8x64xf32>
    %c5_248 = arith.constant 5 : index
    %c0_249 = arith.constant 0 : index
    %c0_250 = arith.constant 0 : index
    %271 = vector.load %arg10[%c5_248, %c0_249, %c0_250] : memref<12x12x64xf32, #tpu.memory_space<vmem>>, vector<1x8x64xf32>
    %272 = vector.shape_cast %271 : vector<1x8x64xf32> to vector<8x64xf32>
    %c6_251 = arith.constant 6 : index
    %c0_252 = arith.constant 0 : index
    %c0_253 = arith.constant 0 : index
    %273 = vector.load %arg10[%c6_251, %c0_252, %c0_253] : memref<12x12x64xf32, #tpu.memory_space<vmem>>, vector<1x8x64xf32>
    %274 = vector.shape_cast %273 : vector<1x8x64xf32> to vector<8x64xf32>
    %c7_254 = arith.constant 7 : index
    %c0_255 = arith.constant 0 : index
    %c0_256 = arith.constant 0 : index
    %275 = vector.load %arg10[%c7_254, %c0_255, %c0_256] : memref<12x12x64xf32, #tpu.memory_space<vmem>>, vector<1x8x64xf32>
    %276 = vector.shape_cast %275 : vector<1x8x64xf32> to vector<8x64xf32>
    %c8_257 = arith.constant 8 : index
    %c0_258 = arith.constant 0 : index
    %c0_259 = arith.constant 0 : index
    %277 = vector.load %arg10[%c8_257, %c0_258, %c0_259] : memref<12x12x64xf32, #tpu.memory_space<vmem>>, vector<1x8x64xf32>
    %278 = vector.shape_cast %277 : vector<1x8x64xf32> to vector<8x64xf32>
    %279 = tpu.concatenate %264, %266, %268, %270, %272, %274, %276, %278 in 0 : vector<8x64xf32>, vector<8x64xf32>, vector<8x64xf32>, vector<8x64xf32>, vector<8x64xf32>, vector<8x64xf32>, vector<8x64xf32>, vector<8x64xf32> -> vector<64x64xf32>
    %280 = arith.truncf %279 : vector<64x64xf32> to vector<64x64xbf16>
    %c5_260 = arith.constant 5 : index
    %c0_261 = arith.constant 0 : index
    %c0_262 = arith.constant 0 : index
    %281 = vector.load %arg4[%c5_260, %c0_261, %c0_262] : memref<25x64x64xbf16, #tpu.memory_space<vmem>>, vector<1x64x64xbf16>
    %282 = vector.shape_cast %281 : vector<1x64x64xbf16> to vector<64x64xbf16>
    %cst_263 = arith.constant dense<0.000000e+00> : vector<64x64xf32>
    %283 = tpu.matmul %280, %282, %cst_263 {dimension_numbers = #tpu.dot_dimension_numbers<[1], [0], [0], [1], [0, 0, 1, 1], [], []>} : vector<64x64xbf16>, vector<64x64xbf16>, vector<64x64xf32> -> vector<64x64xf32>
    %284 = arith.addf %262, %283 : vector<64x64xf32>
    %c1_264 = arith.constant 1 : index
    %c1_265 = arith.constant 1 : index
    %c0_266 = arith.constant 0 : index
    %285 = vector.load %arg10[%c1_264, %c1_265, %c0_266] : memref<12x12x64xf32, #tpu.memory_space<vmem>>, vector<1x8x64xf32>
    %286 = vector.shape_cast %285 : vector<1x8x64xf32> to vector<8x64xf32>
    %c2_267 = arith.constant 2 : index
    %c1_268 = arith.constant 1 : index
    %c0_269 = arith.constant 0 : index
    %287 = vector.load %arg10[%c2_267, %c1_268, %c0_269] : memref<12x12x64xf32, #tpu.memory_space<vmem>>, vector<1x8x64xf32>
    %288 = vector.shape_cast %287 : vector<1x8x64xf32> to vector<8x64xf32>
    %c3_270 = arith.constant 3 : index
    %c1_271 = arith.constant 1 : index
    %c0_272 = arith.constant 0 : index
    %289 = vector.load %arg10[%c3_270, %c1_271, %c0_272] : memref<12x12x64xf32, #tpu.memory_space<vmem>>, vector<1x8x64xf32>
    %290 = vector.shape_cast %289 : vector<1x8x64xf32> to vector<8x64xf32>
    %c4_273 = arith.constant 4 : index
    %c1_274 = arith.constant 1 : index
    %c0_275 = arith.constant 0 : index
    %291 = vector.load %arg10[%c4_273, %c1_274, %c0_275] : memref<12x12x64xf32, #tpu.memory_space<vmem>>, vector<1x8x64xf32>
    %292 = vector.shape_cast %291 : vector<1x8x64xf32> to vector<8x64xf32>
    %c5_276 = arith.constant 5 : index
    %c1_277 = arith.constant 1 : index
    %c0_278 = arith.constant 0 : index
    %293 = vector.load %arg10[%c5_276, %c1_277, %c0_278] : memref<12x12x64xf32, #tpu.memory_space<vmem>>, vector<1x8x64xf32>
    %294 = vector.shape_cast %293 : vector<1x8x64xf32> to vector<8x64xf32>
    %c6_279 = arith.constant 6 : index
    %c1_280 = arith.constant 1 : index
    %c0_281 = arith.constant 0 : index
    %295 = vector.load %arg10[%c6_279, %c1_280, %c0_281] : memref<12x12x64xf32, #tpu.memory_space<vmem>>, vector<1x8x64xf32>
    %296 = vector.shape_cast %295 : vector<1x8x64xf32> to vector<8x64xf32>
    %c7_282 = arith.constant 7 : index
    %c1_283 = arith.constant 1 : index
    %c0_284 = arith.constant 0 : index
    %297 = vector.load %arg10[%c7_282, %c1_283, %c0_284] : memref<12x12x64xf32, #tpu.memory_space<vmem>>, vector<1x8x64xf32>
    %298 = vector.shape_cast %297 : vector<1x8x64xf32> to vector<8x64xf32>
    %c8_285 = arith.constant 8 : index
    %c1_286 = arith.constant 1 : index
    %c0_287 = arith.constant 0 : index
    %299 = vector.load %arg10[%c8_285, %c1_286, %c0_287] : memref<12x12x64xf32, #tpu.memory_space<vmem>>, vector<1x8x64xf32>
    %300 = vector.shape_cast %299 : vector<1x8x64xf32> to vector<8x64xf32>
    %301 = tpu.concatenate %286, %288, %290, %292, %294, %296, %298, %300 in 0 : vector<8x64xf32>, vector<8x64xf32>, vector<8x64xf32>, vector<8x64xf32>, vector<8x64xf32>, vector<8x64xf32>, vector<8x64xf32>, vector<8x64xf32> -> vector<64x64xf32>
    %302 = arith.truncf %301 : vector<64x64xf32> to vector<64x64xbf16>
    %c6_288 = arith.constant 6 : index
    %c0_289 = arith.constant 0 : index
    %c0_290 = arith.constant 0 : index
    %303 = vector.load %arg4[%c6_288, %c0_289, %c0_290] : memref<25x64x64xbf16, #tpu.memory_space<vmem>>, vector<1x64x64xbf16>
    %304 = vector.shape_cast %303 : vector<1x64x64xbf16> to vector<64x64xbf16>
    %cst_291 = arith.constant dense<0.000000e+00> : vector<64x64xf32>
    %305 = tpu.matmul %302, %304, %cst_291 {dimension_numbers = #tpu.dot_dimension_numbers<[1], [0], [0], [1], [0, 0, 1, 1], [], []>} : vector<64x64xbf16>, vector<64x64xbf16>, vector<64x64xf32> -> vector<64x64xf32>
    %306 = arith.addf %284, %305 : vector<64x64xf32>
    %c1_292 = arith.constant 1 : index
    %c2_293 = arith.constant 2 : index
    %c0_294 = arith.constant 0 : index
    %307 = vector.load %arg10[%c1_292, %c2_293, %c0_294] : memref<12x12x64xf32, #tpu.memory_space<vmem>>, vector<1x8x64xf32>
    %308 = vector.shape_cast %307 : vector<1x8x64xf32> to vector<8x64xf32>
    %c2_295 = arith.constant 2 : index
    %c2_296 = arith.constant 2 : index
    %c0_297 = arith.constant 0 : index
    %309 = vector.load %arg10[%c2_295, %c2_296, %c0_297] : memref<12x12x64xf32, #tpu.memory_space<vmem>>, vector<1x8x64xf32>
    %310 = vector.shape_cast %309 : vector<1x8x64xf32> to vector<8x64xf32>
    %c3_298 = arith.constant 3 : index
    %c2_299 = arith.constant 2 : index
    %c0_300 = arith.constant 0 : index
    %311 = vector.load %arg10[%c3_298, %c2_299, %c0_300] : memref<12x12x64xf32, #tpu.memory_space<vmem>>, vector<1x8x64xf32>
    %312 = vector.shape_cast %311 : vector<1x8x64xf32> to vector<8x64xf32>
    %c4_301 = arith.constant 4 : index
    %c2_302 = arith.constant 2 : index
    %c0_303 = arith.constant 0 : index
    %313 = vector.load %arg10[%c4_301, %c2_302, %c0_303] : memref<12x12x64xf32, #tpu.memory_space<vmem>>, vector<1x8x64xf32>
    %314 = vector.shape_cast %313 : vector<1x8x64xf32> to vector<8x64xf32>
    %c5_304 = arith.constant 5 : index
    %c2_305 = arith.constant 2 : index
    %c0_306 = arith.constant 0 : index
    %315 = vector.load %arg10[%c5_304, %c2_305, %c0_306] : memref<12x12x64xf32, #tpu.memory_space<vmem>>, vector<1x8x64xf32>
    %316 = vector.shape_cast %315 : vector<1x8x64xf32> to vector<8x64xf32>
    %c6_307 = arith.constant 6 : index
    %c2_308 = arith.constant 2 : index
    %c0_309 = arith.constant 0 : index
    %317 = vector.load %arg10[%c6_307, %c2_308, %c0_309] : memref<12x12x64xf32, #tpu.memory_space<vmem>>, vector<1x8x64xf32>
    %318 = vector.shape_cast %317 : vector<1x8x64xf32> to vector<8x64xf32>
    %c7_310 = arith.constant 7 : index
    %c2_311 = arith.constant 2 : index
    %c0_312 = arith.constant 0 : index
    %319 = vector.load %arg10[%c7_310, %c2_311, %c0_312] : memref<12x12x64xf32, #tpu.memory_space<vmem>>, vector<1x8x64xf32>
    %320 = vector.shape_cast %319 : vector<1x8x64xf32> to vector<8x64xf32>
    %c8_313 = arith.constant 8 : index
    %c2_314 = arith.constant 2 : index
    %c0_315 = arith.constant 0 : index
    %321 = vector.load %arg10[%c8_313, %c2_314, %c0_315] : memref<12x12x64xf32, #tpu.memory_space<vmem>>, vector<1x8x64xf32>
    %322 = vector.shape_cast %321 : vector<1x8x64xf32> to vector<8x64xf32>
    %323 = tpu.concatenate %308, %310, %312, %314, %316, %318, %320, %322 in 0 : vector<8x64xf32>, vector<8x64xf32>, vector<8x64xf32>, vector<8x64xf32>, vector<8x64xf32>, vector<8x64xf32>, vector<8x64xf32>, vector<8x64xf32> -> vector<64x64xf32>
    %324 = arith.truncf %323 : vector<64x64xf32> to vector<64x64xbf16>
    %c7_316 = arith.constant 7 : index
    %c0_317 = arith.constant 0 : index
    %c0_318 = arith.constant 0 : index
    %325 = vector.load %arg4[%c7_316, %c0_317, %c0_318] : memref<25x64x64xbf16, #tpu.memory_space<vmem>>, vector<1x64x64xbf16>
    %326 = vector.shape_cast %325 : vector<1x64x64xbf16> to vector<64x64xbf16>
    %cst_319 = arith.constant dense<0.000000e+00> : vector<64x64xf32>
    %327 = tpu.matmul %324, %326, %cst_319 {dimension_numbers = #tpu.dot_dimension_numbers<[1], [0], [0], [1], [0, 0, 1, 1], [], []>} : vector<64x64xbf16>, vector<64x64xbf16>, vector<64x64xf32> -> vector<64x64xf32>
    %328 = arith.addf %306, %327 : vector<64x64xf32>
    %c1_320 = arith.constant 1 : index
    %c3_321 = arith.constant 3 : index
    %c0_322 = arith.constant 0 : index
    %329 = vector.load %arg10[%c1_320, %c3_321, %c0_322] : memref<12x12x64xf32, #tpu.memory_space<vmem>>, vector<1x8x64xf32>
    %330 = vector.shape_cast %329 : vector<1x8x64xf32> to vector<8x64xf32>
    %c2_323 = arith.constant 2 : index
    %c3_324 = arith.constant 3 : index
    %c0_325 = arith.constant 0 : index
    %331 = vector.load %arg10[%c2_323, %c3_324, %c0_325] : memref<12x12x64xf32, #tpu.memory_space<vmem>>, vector<1x8x64xf32>
    %332 = vector.shape_cast %331 : vector<1x8x64xf32> to vector<8x64xf32>
    %c3_326 = arith.constant 3 : index
    %c3_327 = arith.constant 3 : index
    %c0_328 = arith.constant 0 : index
    %333 = vector.load %arg10[%c3_326, %c3_327, %c0_328] : memref<12x12x64xf32, #tpu.memory_space<vmem>>, vector<1x8x64xf32>
    %334 = vector.shape_cast %333 : vector<1x8x64xf32> to vector<8x64xf32>
    %c4_329 = arith.constant 4 : index
    %c3_330 = arith.constant 3 : index
    %c0_331 = arith.constant 0 : index
    %335 = vector.load %arg10[%c4_329, %c3_330, %c0_331] : memref<12x12x64xf32, #tpu.memory_space<vmem>>, vector<1x8x64xf32>
    %336 = vector.shape_cast %335 : vector<1x8x64xf32> to vector<8x64xf32>
    %c5_332 = arith.constant 5 : index
    %c3_333 = arith.constant 3 : index
    %c0_334 = arith.constant 0 : index
    %337 = vector.load %arg10[%c5_332, %c3_333, %c0_334] : memref<12x12x64xf32, #tpu.memory_space<vmem>>, vector<1x8x64xf32>
    %338 = vector.shape_cast %337 : vector<1x8x64xf32> to vector<8x64xf32>
    %c6_335 = arith.constant 6 : index
    %c3_336 = arith.constant 3 : index
    %c0_337 = arith.constant 0 : index
    %339 = vector.load %arg10[%c6_335, %c3_336, %c0_337] : memref<12x12x64xf32, #tpu.memory_space<vmem>>, vector<1x8x64xf32>
    %340 = vector.shape_cast %339 : vector<1x8x64xf32> to vector<8x64xf32>
    %c7_338 = arith.constant 7 : index
    %c3_339 = arith.constant 3 : index
    %c0_340 = arith.constant 0 : index
    %341 = vector.load %arg10[%c7_338, %c3_339, %c0_340] : memref<12x12x64xf32, #tpu.memory_space<vmem>>, vector<1x8x64xf32>
    %342 = vector.shape_cast %341 : vector<1x8x64xf32> to vector<8x64xf32>
    %c8_341 = arith.constant 8 : index
    %c3_342 = arith.constant 3 : index
    %c0_343 = arith.constant 0 : index
    %343 = vector.load %arg10[%c8_341, %c3_342, %c0_343] : memref<12x12x64xf32, #tpu.memory_space<vmem>>, vector<1x8x64xf32>
    %344 = vector.shape_cast %343 : vector<1x8x64xf32> to vector<8x64xf32>
    %345 = tpu.concatenate %330, %332, %334, %336, %338, %340, %342, %344 in 0 : vector<8x64xf32>, vector<8x64xf32>, vector<8x64xf32>, vector<8x64xf32>, vector<8x64xf32>, vector<8x64xf32>, vector<8x64xf32>, vector<8x64xf32> -> vector<64x64xf32>
    %346 = arith.truncf %345 : vector<64x64xf32> to vector<64x64xbf16>
    %c8_344 = arith.constant 8 : index
    %c0_345 = arith.constant 0 : index
    %c0_346 = arith.constant 0 : index
    %347 = vector.load %arg4[%c8_344, %c0_345, %c0_346] : memref<25x64x64xbf16, #tpu.memory_space<vmem>>, vector<1x64x64xbf16>
    %348 = vector.shape_cast %347 : vector<1x64x64xbf16> to vector<64x64xbf16>
    %cst_347 = arith.constant dense<0.000000e+00> : vector<64x64xf32>
    %349 = tpu.matmul %346, %348, %cst_347 {dimension_numbers = #tpu.dot_dimension_numbers<[1], [0], [0], [1], [0, 0, 1, 1], [], []>} : vector<64x64xbf16>, vector<64x64xbf16>, vector<64x64xf32> -> vector<64x64xf32>
    %350 = arith.addf %328, %349 : vector<64x64xf32>
    %c1_348 = arith.constant 1 : index
    %c4_349 = arith.constant 4 : index
    %c0_350 = arith.constant 0 : index
    %351 = vector.load %arg10[%c1_348, %c4_349, %c0_350] : memref<12x12x64xf32, #tpu.memory_space<vmem>>, vector<1x8x64xf32>
    %352 = vector.shape_cast %351 : vector<1x8x64xf32> to vector<8x64xf32>
    %c2_351 = arith.constant 2 : index
    %c4_352 = arith.constant 4 : index
    %c0_353 = arith.constant 0 : index
    %353 = vector.load %arg10[%c2_351, %c4_352, %c0_353] : memref<12x12x64xf32, #tpu.memory_space<vmem>>, vector<1x8x64xf32>
    %354 = vector.shape_cast %353 : vector<1x8x64xf32> to vector<8x64xf32>
    %c3_354 = arith.constant 3 : index
    %c4_355 = arith.constant 4 : index
    %c0_356 = arith.constant 0 : index
    %355 = vector.load %arg10[%c3_354, %c4_355, %c0_356] : memref<12x12x64xf32, #tpu.memory_space<vmem>>, vector<1x8x64xf32>
    %356 = vector.shape_cast %355 : vector<1x8x64xf32> to vector<8x64xf32>
    %c4_357 = arith.constant 4 : index
    %c4_358 = arith.constant 4 : index
    %c0_359 = arith.constant 0 : index
    %357 = vector.load %arg10[%c4_357, %c4_358, %c0_359] : memref<12x12x64xf32, #tpu.memory_space<vmem>>, vector<1x8x64xf32>
    %358 = vector.shape_cast %357 : vector<1x8x64xf32> to vector<8x64xf32>
    %c5_360 = arith.constant 5 : index
    %c4_361 = arith.constant 4 : index
    %c0_362 = arith.constant 0 : index
    %359 = vector.load %arg10[%c5_360, %c4_361, %c0_362] : memref<12x12x64xf32, #tpu.memory_space<vmem>>, vector<1x8x64xf32>
    %360 = vector.shape_cast %359 : vector<1x8x64xf32> to vector<8x64xf32>
    %c6_363 = arith.constant 6 : index
    %c4_364 = arith.constant 4 : index
    %c0_365 = arith.constant 0 : index
    %361 = vector.load %arg10[%c6_363, %c4_364, %c0_365] : memref<12x12x64xf32, #tpu.memory_space<vmem>>, vector<1x8x64xf32>
    %362 = vector.shape_cast %361 : vector<1x8x64xf32> to vector<8x64xf32>
    %c7_366 = arith.constant 7 : index
    %c4_367 = arith.constant 4 : index
    %c0_368 = arith.constant 0 : index
    %363 = vector.load %arg10[%c7_366, %c4_367, %c0_368] : memref<12x12x64xf32, #tpu.memory_space<vmem>>, vector<1x8x64xf32>
    %364 = vector.shape_cast %363 : vector<1x8x64xf32> to vector<8x64xf32>
    %c8_369 = arith.constant 8 : index
    %c4_370 = arith.constant 4 : index
    %c0_371 = arith.constant 0 : index
    %365 = vector.load %arg10[%c8_369, %c4_370, %c0_371] : memref<12x12x64xf32, #tpu.memory_space<vmem>>, vector<1x8x64xf32>
    %366 = vector.shape_cast %365 : vector<1x8x64xf32> to vector<8x64xf32>
    %367 = tpu.concatenate %352, %354, %356, %358, %360, %362, %364, %366 in 0 : vector<8x64xf32>, vector<8x64xf32>, vector<8x64xf32>, vector<8x64xf32>, vector<8x64xf32>, vector<8x64xf32>, vector<8x64xf32>, vector<8x64xf32> -> vector<64x64xf32>
    %368 = arith.truncf %367 : vector<64x64xf32> to vector<64x64xbf16>
    %c9_372 = arith.constant 9 : index
    %c0_373 = arith.constant 0 : index
    %c0_374 = arith.constant 0 : index
    %369 = vector.load %arg4[%c9_372, %c0_373, %c0_374] : memref<25x64x64xbf16, #tpu.memory_space<vmem>>, vector<1x64x64xbf16>
    %370 = vector.shape_cast %369 : vector<1x64x64xbf16> to vector<64x64xbf16>
    %cst_375 = arith.constant dense<0.000000e+00> : vector<64x64xf32>
    %371 = tpu.matmul %368, %370, %cst_375 {dimension_numbers = #tpu.dot_dimension_numbers<[1], [0], [0], [1], [0, 0, 1, 1], [], []>} : vector<64x64xbf16>, vector<64x64xbf16>, vector<64x64xf32> -> vector<64x64xf32>
    %372 = arith.addf %350, %371 : vector<64x64xf32>
    %c2_376 = arith.constant 2 : index
    %c0_377 = arith.constant 0 : index
    %c0_378 = arith.constant 0 : index
    %373 = vector.load %arg10[%c2_376, %c0_377, %c0_378] : memref<12x12x64xf32, #tpu.memory_space<vmem>>, vector<1x8x64xf32>
    %374 = vector.shape_cast %373 : vector<1x8x64xf32> to vector<8x64xf32>
    %c3_379 = arith.constant 3 : index
    %c0_380 = arith.constant 0 : index
    %c0_381 = arith.constant 0 : index
    %375 = vector.load %arg10[%c3_379, %c0_380, %c0_381] : memref<12x12x64xf32, #tpu.memory_space<vmem>>, vector<1x8x64xf32>
    %376 = vector.shape_cast %375 : vector<1x8x64xf32> to vector<8x64xf32>
    %c4_382 = arith.constant 4 : index
    %c0_383 = arith.constant 0 : index
    %c0_384 = arith.constant 0 : index
    %377 = vector.load %arg10[%c4_382, %c0_383, %c0_384] : memref<12x12x64xf32, #tpu.memory_space<vmem>>, vector<1x8x64xf32>
    %378 = vector.shape_cast %377 : vector<1x8x64xf32> to vector<8x64xf32>
    %c5_385 = arith.constant 5 : index
    %c0_386 = arith.constant 0 : index
    %c0_387 = arith.constant 0 : index
    %379 = vector.load %arg10[%c5_385, %c0_386, %c0_387] : memref<12x12x64xf32, #tpu.memory_space<vmem>>, vector<1x8x64xf32>
    %380 = vector.shape_cast %379 : vector<1x8x64xf32> to vector<8x64xf32>
    %c6_388 = arith.constant 6 : index
    %c0_389 = arith.constant 0 : index
    %c0_390 = arith.constant 0 : index
    %381 = vector.load %arg10[%c6_388, %c0_389, %c0_390] : memref<12x12x64xf32, #tpu.memory_space<vmem>>, vector<1x8x64xf32>
    %382 = vector.shape_cast %381 : vector<1x8x64xf32> to vector<8x64xf32>
    %c7_391 = arith.constant 7 : index
    %c0_392 = arith.constant 0 : index
    %c0_393 = arith.constant 0 : index
    %383 = vector.load %arg10[%c7_391, %c0_392, %c0_393] : memref<12x12x64xf32, #tpu.memory_space<vmem>>, vector<1x8x64xf32>
    %384 = vector.shape_cast %383 : vector<1x8x64xf32> to vector<8x64xf32>
    %c8_394 = arith.constant 8 : index
    %c0_395 = arith.constant 0 : index
    %c0_396 = arith.constant 0 : index
    %385 = vector.load %arg10[%c8_394, %c0_395, %c0_396] : memref<12x12x64xf32, #tpu.memory_space<vmem>>, vector<1x8x64xf32>
    %386 = vector.shape_cast %385 : vector<1x8x64xf32> to vector<8x64xf32>
    %c9_397 = arith.constant 9 : index
    %c0_398 = arith.constant 0 : index
    %c0_399 = arith.constant 0 : index
    %387 = vector.load %arg10[%c9_397, %c0_398, %c0_399] : memref<12x12x64xf32, #tpu.memory_space<vmem>>, vector<1x8x64xf32>
    %388 = vector.shape_cast %387 : vector<1x8x64xf32> to vector<8x64xf32>
    %389 = tpu.concatenate %374, %376, %378, %380, %382, %384, %386, %388 in 0 : vector<8x64xf32>, vector<8x64xf32>, vector<8x64xf32>, vector<8x64xf32>, vector<8x64xf32>, vector<8x64xf32>, vector<8x64xf32>, vector<8x64xf32> -> vector<64x64xf32>
    %390 = arith.truncf %389 : vector<64x64xf32> to vector<64x64xbf16>
    %c10_400 = arith.constant 10 : index
    %c0_401 = arith.constant 0 : index
    %c0_402 = arith.constant 0 : index
    %391 = vector.load %arg4[%c10_400, %c0_401, %c0_402] : memref<25x64x64xbf16, #tpu.memory_space<vmem>>, vector<1x64x64xbf16>
    %392 = vector.shape_cast %391 : vector<1x64x64xbf16> to vector<64x64xbf16>
    %cst_403 = arith.constant dense<0.000000e+00> : vector<64x64xf32>
    %393 = tpu.matmul %390, %392, %cst_403 {dimension_numbers = #tpu.dot_dimension_numbers<[1], [0], [0], [1], [0, 0, 1, 1], [], []>} : vector<64x64xbf16>, vector<64x64xbf16>, vector<64x64xf32> -> vector<64x64xf32>
    %394 = arith.addf %372, %393 : vector<64x64xf32>
    %c2_404 = arith.constant 2 : index
    %c1_405 = arith.constant 1 : index
    %c0_406 = arith.constant 0 : index
    %395 = vector.load %arg10[%c2_404, %c1_405, %c0_406] : memref<12x12x64xf32, #tpu.memory_space<vmem>>, vector<1x8x64xf32>
    %396 = vector.shape_cast %395 : vector<1x8x64xf32> to vector<8x64xf32>
    %c3_407 = arith.constant 3 : index
    %c1_408 = arith.constant 1 : index
    %c0_409 = arith.constant 0 : index
    %397 = vector.load %arg10[%c3_407, %c1_408, %c0_409] : memref<12x12x64xf32, #tpu.memory_space<vmem>>, vector<1x8x64xf32>
    %398 = vector.shape_cast %397 : vector<1x8x64xf32> to vector<8x64xf32>
    %c4_410 = arith.constant 4 : index
    %c1_411 = arith.constant 1 : index
    %c0_412 = arith.constant 0 : index
    %399 = vector.load %arg10[%c4_410, %c1_411, %c0_412] : memref<12x12x64xf32, #tpu.memory_space<vmem>>, vector<1x8x64xf32>
    %400 = vector.shape_cast %399 : vector<1x8x64xf32> to vector<8x64xf32>
    %c5_413 = arith.constant 5 : index
    %c1_414 = arith.constant 1 : index
    %c0_415 = arith.constant 0 : index
    %401 = vector.load %arg10[%c5_413, %c1_414, %c0_415] : memref<12x12x64xf32, #tpu.memory_space<vmem>>, vector<1x8x64xf32>
    %402 = vector.shape_cast %401 : vector<1x8x64xf32> to vector<8x64xf32>
    %c6_416 = arith.constant 6 : index
    %c1_417 = arith.constant 1 : index
    %c0_418 = arith.constant 0 : index
    %403 = vector.load %arg10[%c6_416, %c1_417, %c0_418] : memref<12x12x64xf32, #tpu.memory_space<vmem>>, vector<1x8x64xf32>
    %404 = vector.shape_cast %403 : vector<1x8x64xf32> to vector<8x64xf32>
    %c7_419 = arith.constant 7 : index
    %c1_420 = arith.constant 1 : index
    %c0_421 = arith.constant 0 : index
    %405 = vector.load %arg10[%c7_419, %c1_420, %c0_421] : memref<12x12x64xf32, #tpu.memory_space<vmem>>, vector<1x8x64xf32>
    %406 = vector.shape_cast %405 : vector<1x8x64xf32> to vector<8x64xf32>
    %c8_422 = arith.constant 8 : index
    %c1_423 = arith.constant 1 : index
    %c0_424 = arith.constant 0 : index
    %407 = vector.load %arg10[%c8_422, %c1_423, %c0_424] : memref<12x12x64xf32, #tpu.memory_space<vmem>>, vector<1x8x64xf32>
    %408 = vector.shape_cast %407 : vector<1x8x64xf32> to vector<8x64xf32>
    %c9_425 = arith.constant 9 : index
    %c1_426 = arith.constant 1 : index
    %c0_427 = arith.constant 0 : index
    %409 = vector.load %arg10[%c9_425, %c1_426, %c0_427] : memref<12x12x64xf32, #tpu.memory_space<vmem>>, vector<1x8x64xf32>
    %410 = vector.shape_cast %409 : vector<1x8x64xf32> to vector<8x64xf32>
    %411 = tpu.concatenate %396, %398, %400, %402, %404, %406, %408, %410 in 0 : vector<8x64xf32>, vector<8x64xf32>, vector<8x64xf32>, vector<8x64xf32>, vector<8x64xf32>, vector<8x64xf32>, vector<8x64xf32>, vector<8x64xf32> -> vector<64x64xf32>
    %412 = arith.truncf %411 : vector<64x64xf32> to vector<64x64xbf16>
    %c11_428 = arith.constant 11 : index
    %c0_429 = arith.constant 0 : index
    %c0_430 = arith.constant 0 : index
    %413 = vector.load %arg4[%c11_428, %c0_429, %c0_430] : memref<25x64x64xbf16, #tpu.memory_space<vmem>>, vector<1x64x64xbf16>
    %414 = vector.shape_cast %413 : vector<1x64x64xbf16> to vector<64x64xbf16>
    %cst_431 = arith.constant dense<0.000000e+00> : vector<64x64xf32>
    %415 = tpu.matmul %412, %414, %cst_431 {dimension_numbers = #tpu.dot_dimension_numbers<[1], [0], [0], [1], [0, 0, 1, 1], [], []>} : vector<64x64xbf16>, vector<64x64xbf16>, vector<64x64xf32> -> vector<64x64xf32>
    %416 = arith.addf %394, %415 : vector<64x64xf32>
    %c2_432 = arith.constant 2 : index
    %c2_433 = arith.constant 2 : index
    %c0_434 = arith.constant 0 : index
    %417 = vector.load %arg10[%c2_432, %c2_433, %c0_434] : memref<12x12x64xf32, #tpu.memory_space<vmem>>, vector<1x8x64xf32>
    %418 = vector.shape_cast %417 : vector<1x8x64xf32> to vector<8x64xf32>
    %c3_435 = arith.constant 3 : index
    %c2_436 = arith.constant 2 : index
    %c0_437 = arith.constant 0 : index
    %419 = vector.load %arg10[%c3_435, %c2_436, %c0_437] : memref<12x12x64xf32, #tpu.memory_space<vmem>>, vector<1x8x64xf32>
    %420 = vector.shape_cast %419 : vector<1x8x64xf32> to vector<8x64xf32>
    %c4_438 = arith.constant 4 : index
    %c2_439 = arith.constant 2 : index
    %c0_440 = arith.constant 0 : index
    %421 = vector.load %arg10[%c4_438, %c2_439, %c0_440] : memref<12x12x64xf32, #tpu.memory_space<vmem>>, vector<1x8x64xf32>
    %422 = vector.shape_cast %421 : vector<1x8x64xf32> to vector<8x64xf32>
    %c5_441 = arith.constant 5 : index
    %c2_442 = arith.constant 2 : index
    %c0_443 = arith.constant 0 : index
    %423 = vector.load %arg10[%c5_441, %c2_442, %c0_443] : memref<12x12x64xf32, #tpu.memory_space<vmem>>, vector<1x8x64xf32>
    %424 = vector.shape_cast %423 : vector<1x8x64xf32> to vector<8x64xf32>
    %c6_444 = arith.constant 6 : index
    %c2_445 = arith.constant 2 : index
    %c0_446 = arith.constant 0 : index
    %425 = vector.load %arg10[%c6_444, %c2_445, %c0_446] : memref<12x12x64xf32, #tpu.memory_space<vmem>>, vector<1x8x64xf32>
    %426 = vector.shape_cast %425 : vector<1x8x64xf32> to vector<8x64xf32>
    %c7_447 = arith.constant 7 : index
    %c2_448 = arith.constant 2 : index
    %c0_449 = arith.constant 0 : index
    %427 = vector.load %arg10[%c7_447, %c2_448, %c0_449] : memref<12x12x64xf32, #tpu.memory_space<vmem>>, vector<1x8x64xf32>
    %428 = vector.shape_cast %427 : vector<1x8x64xf32> to vector<8x64xf32>
    %c8_450 = arith.constant 8 : index
    %c2_451 = arith.constant 2 : index
    %c0_452 = arith.constant 0 : index
    %429 = vector.load %arg10[%c8_450, %c2_451, %c0_452] : memref<12x12x64xf32, #tpu.memory_space<vmem>>, vector<1x8x64xf32>
    %430 = vector.shape_cast %429 : vector<1x8x64xf32> to vector<8x64xf32>
    %c9_453 = arith.constant 9 : index
    %c2_454 = arith.constant 2 : index
    %c0_455 = arith.constant 0 : index
    %431 = vector.load %arg10[%c9_453, %c2_454, %c0_455] : memref<12x12x64xf32, #tpu.memory_space<vmem>>, vector<1x8x64xf32>
    %432 = vector.shape_cast %431 : vector<1x8x64xf32> to vector<8x64xf32>
    %433 = tpu.concatenate %418, %420, %422, %424, %426, %428, %430, %432 in 0 : vector<8x64xf32>, vector<8x64xf32>, vector<8x64xf32>, vector<8x64xf32>, vector<8x64xf32>, vector<8x64xf32>, vector<8x64xf32>, vector<8x64xf32> -> vector<64x64xf32>
    %434 = arith.truncf %433 : vector<64x64xf32> to vector<64x64xbf16>
    %c12 = arith.constant 12 : index
    %c0_456 = arith.constant 0 : index
    %c0_457 = arith.constant 0 : index
    %435 = vector.load %arg4[%c12, %c0_456, %c0_457] : memref<25x64x64xbf16, #tpu.memory_space<vmem>>, vector<1x64x64xbf16>
    %436 = vector.shape_cast %435 : vector<1x64x64xbf16> to vector<64x64xbf16>
    %cst_458 = arith.constant dense<0.000000e+00> : vector<64x64xf32>
    %437 = tpu.matmul %434, %436, %cst_458 {dimension_numbers = #tpu.dot_dimension_numbers<[1], [0], [0], [1], [0, 0, 1, 1], [], []>} : vector<64x64xbf16>, vector<64x64xbf16>, vector<64x64xf32> -> vector<64x64xf32>
    %438 = arith.addf %416, %437 : vector<64x64xf32>
    %c2_459 = arith.constant 2 : index
    %c3_460 = arith.constant 3 : index
    %c0_461 = arith.constant 0 : index
    %439 = vector.load %arg10[%c2_459, %c3_460, %c0_461] : memref<12x12x64xf32, #tpu.memory_space<vmem>>, vector<1x8x64xf32>
    %440 = vector.shape_cast %439 : vector<1x8x64xf32> to vector<8x64xf32>
    %c3_462 = arith.constant 3 : index
    %c3_463 = arith.constant 3 : index
    %c0_464 = arith.constant 0 : index
    %441 = vector.load %arg10[%c3_462, %c3_463, %c0_464] : memref<12x12x64xf32, #tpu.memory_space<vmem>>, vector<1x8x64xf32>
    %442 = vector.shape_cast %441 : vector<1x8x64xf32> to vector<8x64xf32>
    %c4_465 = arith.constant 4 : index
    %c3_466 = arith.constant 3 : index
    %c0_467 = arith.constant 0 : index
    %443 = vector.load %arg10[%c4_465, %c3_466, %c0_467] : memref<12x12x64xf32, #tpu.memory_space<vmem>>, vector<1x8x64xf32>
    %444 = vector.shape_cast %443 : vector<1x8x64xf32> to vector<8x64xf32>
    %c5_468 = arith.constant 5 : index
    %c3_469 = arith.constant 3 : index
    %c0_470 = arith.constant 0 : index
    %445 = vector.load %arg10[%c5_468, %c3_469, %c0_470] : memref<12x12x64xf32, #tpu.memory_space<vmem>>, vector<1x8x64xf32>
    %446 = vector.shape_cast %445 : vector<1x8x64xf32> to vector<8x64xf32>
    %c6_471 = arith.constant 6 : index
    %c3_472 = arith.constant 3 : index
    %c0_473 = arith.constant 0 : index
    %447 = vector.load %arg10[%c6_471, %c3_472, %c0_473] : memref<12x12x64xf32, #tpu.memory_space<vmem>>, vector<1x8x64xf32>
    %448 = vector.shape_cast %447 : vector<1x8x64xf32> to vector<8x64xf32>
    %c7_474 = arith.constant 7 : index
    %c3_475 = arith.constant 3 : index
    %c0_476 = arith.constant 0 : index
    %449 = vector.load %arg10[%c7_474, %c3_475, %c0_476] : memref<12x12x64xf32, #tpu.memory_space<vmem>>, vector<1x8x64xf32>
    %450 = vector.shape_cast %449 : vector<1x8x64xf32> to vector<8x64xf32>
    %c8_477 = arith.constant 8 : index
    %c3_478 = arith.constant 3 : index
    %c0_479 = arith.constant 0 : index
    %451 = vector.load %arg10[%c8_477, %c3_478, %c0_479] : memref<12x12x64xf32, #tpu.memory_space<vmem>>, vector<1x8x64xf32>
    %452 = vector.shape_cast %451 : vector<1x8x64xf32> to vector<8x64xf32>
    %c9_480 = arith.constant 9 : index
    %c3_481 = arith.constant 3 : index
    %c0_482 = arith.constant 0 : index
    %453 = vector.load %arg10[%c9_480, %c3_481, %c0_482] : memref<12x12x64xf32, #tpu.memory_space<vmem>>, vector<1x8x64xf32>
    %454 = vector.shape_cast %453 : vector<1x8x64xf32> to vector<8x64xf32>
    %455 = tpu.concatenate %440, %442, %444, %446, %448, %450, %452, %454 in 0 : vector<8x64xf32>, vector<8x64xf32>, vector<8x64xf32>, vector<8x64xf32>, vector<8x64xf32>, vector<8x64xf32>, vector<8x64xf32>, vector<8x64xf32> -> vector<64x64xf32>
    %456 = arith.truncf %455 : vector<64x64xf32> to vector<64x64xbf16>
    %c13 = arith.constant 13 : index
    %c0_483 = arith.constant 0 : index
    %c0_484 = arith.constant 0 : index
    %457 = vector.load %arg4[%c13, %c0_483, %c0_484] : memref<25x64x64xbf16, #tpu.memory_space<vmem>>, vector<1x64x64xbf16>
    %458 = vector.shape_cast %457 : vector<1x64x64xbf16> to vector<64x64xbf16>
    %cst_485 = arith.constant dense<0.000000e+00> : vector<64x64xf32>
    %459 = tpu.matmul %456, %458, %cst_485 {dimension_numbers = #tpu.dot_dimension_numbers<[1], [0], [0], [1], [0, 0, 1, 1], [], []>} : vector<64x64xbf16>, vector<64x64xbf16>, vector<64x64xf32> -> vector<64x64xf32>
    %460 = arith.addf %438, %459 : vector<64x64xf32>
    %c2_486 = arith.constant 2 : index
    %c4_487 = arith.constant 4 : index
    %c0_488 = arith.constant 0 : index
    %461 = vector.load %arg10[%c2_486, %c4_487, %c0_488] : memref<12x12x64xf32, #tpu.memory_space<vmem>>, vector<1x8x64xf32>
    %462 = vector.shape_cast %461 : vector<1x8x64xf32> to vector<8x64xf32>
    %c3_489 = arith.constant 3 : index
    %c4_490 = arith.constant 4 : index
    %c0_491 = arith.constant 0 : index
    %463 = vector.load %arg10[%c3_489, %c4_490, %c0_491] : memref<12x12x64xf32, #tpu.memory_space<vmem>>, vector<1x8x64xf32>
    %464 = vector.shape_cast %463 : vector<1x8x64xf32> to vector<8x64xf32>
    %c4_492 = arith.constant 4 : index
    %c4_493 = arith.constant 4 : index
    %c0_494 = arith.constant 0 : index
    %465 = vector.load %arg10[%c4_492, %c4_493, %c0_494] : memref<12x12x64xf32, #tpu.memory_space<vmem>>, vector<1x8x64xf32>
    %466 = vector.shape_cast %465 : vector<1x8x64xf32> to vector<8x64xf32>
    %c5_495 = arith.constant 5 : index
    %c4_496 = arith.constant 4 : index
    %c0_497 = arith.constant 0 : index
    %467 = vector.load %arg10[%c5_495, %c4_496, %c0_497] : memref<12x12x64xf32, #tpu.memory_space<vmem>>, vector<1x8x64xf32>
    %468 = vector.shape_cast %467 : vector<1x8x64xf32> to vector<8x64xf32>
    %c6_498 = arith.constant 6 : index
    %c4_499 = arith.constant 4 : index
    %c0_500 = arith.constant 0 : index
    %469 = vector.load %arg10[%c6_498, %c4_499, %c0_500] : memref<12x12x64xf32, #tpu.memory_space<vmem>>, vector<1x8x64xf32>
    %470 = vector.shape_cast %469 : vector<1x8x64xf32> to vector<8x64xf32>
    %c7_501 = arith.constant 7 : index
    %c4_502 = arith.constant 4 : index
    %c0_503 = arith.constant 0 : index
    %471 = vector.load %arg10[%c7_501, %c4_502, %c0_503] : memref<12x12x64xf32, #tpu.memory_space<vmem>>, vector<1x8x64xf32>
    %472 = vector.shape_cast %471 : vector<1x8x64xf32> to vector<8x64xf32>
    %c8_504 = arith.constant 8 : index
    %c4_505 = arith.constant 4 : index
    %c0_506 = arith.constant 0 : index
    %473 = vector.load %arg10[%c8_504, %c4_505, %c0_506] : memref<12x12x64xf32, #tpu.memory_space<vmem>>, vector<1x8x64xf32>
    %474 = vector.shape_cast %473 : vector<1x8x64xf32> to vector<8x64xf32>
    %c9_507 = arith.constant 9 : index
    %c4_508 = arith.constant 4 : index
    %c0_509 = arith.constant 0 : index
    %475 = vector.load %arg10[%c9_507, %c4_508, %c0_509] : memref<12x12x64xf32, #tpu.memory_space<vmem>>, vector<1x8x64xf32>
    %476 = vector.shape_cast %475 : vector<1x8x64xf32> to vector<8x64xf32>
    %477 = tpu.concatenate %462, %464, %466, %468, %470, %472, %474, %476 in 0 : vector<8x64xf32>, vector<8x64xf32>, vector<8x64xf32>, vector<8x64xf32>, vector<8x64xf32>, vector<8x64xf32>, vector<8x64xf32>, vector<8x64xf32> -> vector<64x64xf32>
    %478 = arith.truncf %477 : vector<64x64xf32> to vector<64x64xbf16>
    %c14 = arith.constant 14 : index
    %c0_510 = arith.constant 0 : index
    %c0_511 = arith.constant 0 : index
    %479 = vector.load %arg4[%c14, %c0_510, %c0_511] : memref<25x64x64xbf16, #tpu.memory_space<vmem>>, vector<1x64x64xbf16>
    %480 = vector.shape_cast %479 : vector<1x64x64xbf16> to vector<64x64xbf16>
    %cst_512 = arith.constant dense<0.000000e+00> : vector<64x64xf32>
    %481 = tpu.matmul %478, %480, %cst_512 {dimension_numbers = #tpu.dot_dimension_numbers<[1], [0], [0], [1], [0, 0, 1, 1], [], []>} : vector<64x64xbf16>, vector<64x64xbf16>, vector<64x64xf32> -> vector<64x64xf32>
    %482 = arith.addf %460, %481 : vector<64x64xf32>
    %c3_513 = arith.constant 3 : index
    %c0_514 = arith.constant 0 : index
    %c0_515 = arith.constant 0 : index
    %483 = vector.load %arg10[%c3_513, %c0_514, %c0_515] : memref<12x12x64xf32, #tpu.memory_space<vmem>>, vector<1x8x64xf32>
    %484 = vector.shape_cast %483 : vector<1x8x64xf32> to vector<8x64xf32>
    %c4_516 = arith.constant 4 : index
    %c0_517 = arith.constant 0 : index
    %c0_518 = arith.constant 0 : index
    %485 = vector.load %arg10[%c4_516, %c0_517, %c0_518] : memref<12x12x64xf32, #tpu.memory_space<vmem>>, vector<1x8x64xf32>
    %486 = vector.shape_cast %485 : vector<1x8x64xf32> to vector<8x64xf32>
    %c5_519 = arith.constant 5 : index
    %c0_520 = arith.constant 0 : index
    %c0_521 = arith.constant 0 : index
    %487 = vector.load %arg10[%c5_519, %c0_520, %c0_521] : memref<12x12x64xf32, #tpu.memory_space<vmem>>, vector<1x8x64xf32>
    %488 = vector.shape_cast %487 : vector<1x8x64xf32> to vector<8x64xf32>
    %c6_522 = arith.constant 6 : index
    %c0_523 = arith.constant 0 : index
    %c0_524 = arith.constant 0 : index
    %489 = vector.load %arg10[%c6_522, %c0_523, %c0_524] : memref<12x12x64xf32, #tpu.memory_space<vmem>>, vector<1x8x64xf32>
    %490 = vector.shape_cast %489 : vector<1x8x64xf32> to vector<8x64xf32>
    %c7_525 = arith.constant 7 : index
    %c0_526 = arith.constant 0 : index
    %c0_527 = arith.constant 0 : index
    %491 = vector.load %arg10[%c7_525, %c0_526, %c0_527] : memref<12x12x64xf32, #tpu.memory_space<vmem>>, vector<1x8x64xf32>
    %492 = vector.shape_cast %491 : vector<1x8x64xf32> to vector<8x64xf32>
    %c8_528 = arith.constant 8 : index
    %c0_529 = arith.constant 0 : index
    %c0_530 = arith.constant 0 : index
    %493 = vector.load %arg10[%c8_528, %c0_529, %c0_530] : memref<12x12x64xf32, #tpu.memory_space<vmem>>, vector<1x8x64xf32>
    %494 = vector.shape_cast %493 : vector<1x8x64xf32> to vector<8x64xf32>
    %c9_531 = arith.constant 9 : index
    %c0_532 = arith.constant 0 : index
    %c0_533 = arith.constant 0 : index
    %495 = vector.load %arg10[%c9_531, %c0_532, %c0_533] : memref<12x12x64xf32, #tpu.memory_space<vmem>>, vector<1x8x64xf32>
    %496 = vector.shape_cast %495 : vector<1x8x64xf32> to vector<8x64xf32>
    %c10_534 = arith.constant 10 : index
    %c0_535 = arith.constant 0 : index
    %c0_536 = arith.constant 0 : index
    %497 = vector.load %arg10[%c10_534, %c0_535, %c0_536] : memref<12x12x64xf32, #tpu.memory_space<vmem>>, vector<1x8x64xf32>
    %498 = vector.shape_cast %497 : vector<1x8x64xf32> to vector<8x64xf32>
    %499 = tpu.concatenate %484, %486, %488, %490, %492, %494, %496, %498 in 0 : vector<8x64xf32>, vector<8x64xf32>, vector<8x64xf32>, vector<8x64xf32>, vector<8x64xf32>, vector<8x64xf32>, vector<8x64xf32>, vector<8x64xf32> -> vector<64x64xf32>
    %500 = arith.truncf %499 : vector<64x64xf32> to vector<64x64xbf16>
    %c15 = arith.constant 15 : index
    %c0_537 = arith.constant 0 : index
    %c0_538 = arith.constant 0 : index
    %501 = vector.load %arg4[%c15, %c0_537, %c0_538] : memref<25x64x64xbf16, #tpu.memory_space<vmem>>, vector<1x64x64xbf16>
    %502 = vector.shape_cast %501 : vector<1x64x64xbf16> to vector<64x64xbf16>
    %cst_539 = arith.constant dense<0.000000e+00> : vector<64x64xf32>
    %503 = tpu.matmul %500, %502, %cst_539 {dimension_numbers = #tpu.dot_dimension_numbers<[1], [0], [0], [1], [0, 0, 1, 1], [], []>} : vector<64x64xbf16>, vector<64x64xbf16>, vector<64x64xf32> -> vector<64x64xf32>
    %504 = arith.addf %482, %503 : vector<64x64xf32>
    %c3_540 = arith.constant 3 : index
    %c1_541 = arith.constant 1 : index
    %c0_542 = arith.constant 0 : index
    %505 = vector.load %arg10[%c3_540, %c1_541, %c0_542] : memref<12x12x64xf32, #tpu.memory_space<vmem>>, vector<1x8x64xf32>
    %506 = vector.shape_cast %505 : vector<1x8x64xf32> to vector<8x64xf32>
    %c4_543 = arith.constant 4 : index
    %c1_544 = arith.constant 1 : index
    %c0_545 = arith.constant 0 : index
    %507 = vector.load %arg10[%c4_543, %c1_544, %c0_545] : memref<12x12x64xf32, #tpu.memory_space<vmem>>, vector<1x8x64xf32>
    %508 = vector.shape_cast %507 : vector<1x8x64xf32> to vector<8x64xf32>
    %c5_546 = arith.constant 5 : index
    %c1_547 = arith.constant 1 : index
    %c0_548 = arith.constant 0 : index
    %509 = vector.load %arg10[%c5_546, %c1_547, %c0_548] : memref<12x12x64xf32, #tpu.memory_space<vmem>>, vector<1x8x64xf32>
    %510 = vector.shape_cast %509 : vector<1x8x64xf32> to vector<8x64xf32>
    %c6_549 = arith.constant 6 : index
    %c1_550 = arith.constant 1 : index
    %c0_551 = arith.constant 0 : index
    %511 = vector.load %arg10[%c6_549, %c1_550, %c0_551] : memref<12x12x64xf32, #tpu.memory_space<vmem>>, vector<1x8x64xf32>
    %512 = vector.shape_cast %511 : vector<1x8x64xf32> to vector<8x64xf32>
    %c7_552 = arith.constant 7 : index
    %c1_553 = arith.constant 1 : index
    %c0_554 = arith.constant 0 : index
    %513 = vector.load %arg10[%c7_552, %c1_553, %c0_554] : memref<12x12x64xf32, #tpu.memory_space<vmem>>, vector<1x8x64xf32>
    %514 = vector.shape_cast %513 : vector<1x8x64xf32> to vector<8x64xf32>
    %c8_555 = arith.constant 8 : index
    %c1_556 = arith.constant 1 : index
    %c0_557 = arith.constant 0 : index
    %515 = vector.load %arg10[%c8_555, %c1_556, %c0_557] : memref<12x12x64xf32, #tpu.memory_space<vmem>>, vector<1x8x64xf32>
    %516 = vector.shape_cast %515 : vector<1x8x64xf32> to vector<8x64xf32>
    %c9_558 = arith.constant 9 : index
    %c1_559 = arith.constant 1 : index
    %c0_560 = arith.constant 0 : index
    %517 = vector.load %arg10[%c9_558, %c1_559, %c0_560] : memref<12x12x64xf32, #tpu.memory_space<vmem>>, vector<1x8x64xf32>
    %518 = vector.shape_cast %517 : vector<1x8x64xf32> to vector<8x64xf32>
    %c10_561 = arith.constant 10 : index
    %c1_562 = arith.constant 1 : index
    %c0_563 = arith.constant 0 : index
    %519 = vector.load %arg10[%c10_561, %c1_562, %c0_563] : memref<12x12x64xf32, #tpu.memory_space<vmem>>, vector<1x8x64xf32>
    %520 = vector.shape_cast %519 : vector<1x8x64xf32> to vector<8x64xf32>
    %521 = tpu.concatenate %506, %508, %510, %512, %514, %516, %518, %520 in 0 : vector<8x64xf32>, vector<8x64xf32>, vector<8x64xf32>, vector<8x64xf32>, vector<8x64xf32>, vector<8x64xf32>, vector<8x64xf32>, vector<8x64xf32> -> vector<64x64xf32>
    %522 = arith.truncf %521 : vector<64x64xf32> to vector<64x64xbf16>
    %c16 = arith.constant 16 : index
    %c0_564 = arith.constant 0 : index
    %c0_565 = arith.constant 0 : index
    %523 = vector.load %arg4[%c16, %c0_564, %c0_565] : memref<25x64x64xbf16, #tpu.memory_space<vmem>>, vector<1x64x64xbf16>
    %524 = vector.shape_cast %523 : vector<1x64x64xbf16> to vector<64x64xbf16>
    %cst_566 = arith.constant dense<0.000000e+00> : vector<64x64xf32>
    %525 = tpu.matmul %522, %524, %cst_566 {dimension_numbers = #tpu.dot_dimension_numbers<[1], [0], [0], [1], [0, 0, 1, 1], [], []>} : vector<64x64xbf16>, vector<64x64xbf16>, vector<64x64xf32> -> vector<64x64xf32>
    %526 = arith.addf %504, %525 : vector<64x64xf32>
    %c3_567 = arith.constant 3 : index
    %c2_568 = arith.constant 2 : index
    %c0_569 = arith.constant 0 : index
    %527 = vector.load %arg10[%c3_567, %c2_568, %c0_569] : memref<12x12x64xf32, #tpu.memory_space<vmem>>, vector<1x8x64xf32>
    %528 = vector.shape_cast %527 : vector<1x8x64xf32> to vector<8x64xf32>
    %c4_570 = arith.constant 4 : index
    %c2_571 = arith.constant 2 : index
    %c0_572 = arith.constant 0 : index
    %529 = vector.load %arg10[%c4_570, %c2_571, %c0_572] : memref<12x12x64xf32, #tpu.memory_space<vmem>>, vector<1x8x64xf32>
    %530 = vector.shape_cast %529 : vector<1x8x64xf32> to vector<8x64xf32>
    %c5_573 = arith.constant 5 : index
    %c2_574 = arith.constant 2 : index
    %c0_575 = arith.constant 0 : index
    %531 = vector.load %arg10[%c5_573, %c2_574, %c0_575] : memref<12x12x64xf32, #tpu.memory_space<vmem>>, vector<1x8x64xf32>
    %532 = vector.shape_cast %531 : vector<1x8x64xf32> to vector<8x64xf32>
    %c6_576 = arith.constant 6 : index
    %c2_577 = arith.constant 2 : index
    %c0_578 = arith.constant 0 : index
    %533 = vector.load %arg10[%c6_576, %c2_577, %c0_578] : memref<12x12x64xf32, #tpu.memory_space<vmem>>, vector<1x8x64xf32>
    %534 = vector.shape_cast %533 : vector<1x8x64xf32> to vector<8x64xf32>
    %c7_579 = arith.constant 7 : index
    %c2_580 = arith.constant 2 : index
    %c0_581 = arith.constant 0 : index
    %535 = vector.load %arg10[%c7_579, %c2_580, %c0_581] : memref<12x12x64xf32, #tpu.memory_space<vmem>>, vector<1x8x64xf32>
    %536 = vector.shape_cast %535 : vector<1x8x64xf32> to vector<8x64xf32>
    %c8_582 = arith.constant 8 : index
    %c2_583 = arith.constant 2 : index
    %c0_584 = arith.constant 0 : index
    %537 = vector.load %arg10[%c8_582, %c2_583, %c0_584] : memref<12x12x64xf32, #tpu.memory_space<vmem>>, vector<1x8x64xf32>
    %538 = vector.shape_cast %537 : vector<1x8x64xf32> to vector<8x64xf32>
    %c9_585 = arith.constant 9 : index
    %c2_586 = arith.constant 2 : index
    %c0_587 = arith.constant 0 : index
    %539 = vector.load %arg10[%c9_585, %c2_586, %c0_587] : memref<12x12x64xf32, #tpu.memory_space<vmem>>, vector<1x8x64xf32>
    %540 = vector.shape_cast %539 : vector<1x8x64xf32> to vector<8x64xf32>
    %c10_588 = arith.constant 10 : index
    %c2_589 = arith.constant 2 : index
    %c0_590 = arith.constant 0 : index
    %541 = vector.load %arg10[%c10_588, %c2_589, %c0_590] : memref<12x12x64xf32, #tpu.memory_space<vmem>>, vector<1x8x64xf32>
    %542 = vector.shape_cast %541 : vector<1x8x64xf32> to vector<8x64xf32>
    %543 = tpu.concatenate %528, %530, %532, %534, %536, %538, %540, %542 in 0 : vector<8x64xf32>, vector<8x64xf32>, vector<8x64xf32>, vector<8x64xf32>, vector<8x64xf32>, vector<8x64xf32>, vector<8x64xf32>, vector<8x64xf32> -> vector<64x64xf32>
    %544 = arith.truncf %543 : vector<64x64xf32> to vector<64x64xbf16>
    %c17 = arith.constant 17 : index
    %c0_591 = arith.constant 0 : index
    %c0_592 = arith.constant 0 : index
    %545 = vector.load %arg4[%c17, %c0_591, %c0_592] : memref<25x64x64xbf16, #tpu.memory_space<vmem>>, vector<1x64x64xbf16>
    %546 = vector.shape_cast %545 : vector<1x64x64xbf16> to vector<64x64xbf16>
    %cst_593 = arith.constant dense<0.000000e+00> : vector<64x64xf32>
    %547 = tpu.matmul %544, %546, %cst_593 {dimension_numbers = #tpu.dot_dimension_numbers<[1], [0], [0], [1], [0, 0, 1, 1], [], []>} : vector<64x64xbf16>, vector<64x64xbf16>, vector<64x64xf32> -> vector<64x64xf32>
    %548 = arith.addf %526, %547 : vector<64x64xf32>
    %c3_594 = arith.constant 3 : index
    %c3_595 = arith.constant 3 : index
    %c0_596 = arith.constant 0 : index
    %549 = vector.load %arg10[%c3_594, %c3_595, %c0_596] : memref<12x12x64xf32, #tpu.memory_space<vmem>>, vector<1x8x64xf32>
    %550 = vector.shape_cast %549 : vector<1x8x64xf32> to vector<8x64xf32>
    %c4_597 = arith.constant 4 : index
    %c3_598 = arith.constant 3 : index
    %c0_599 = arith.constant 0 : index
    %551 = vector.load %arg10[%c4_597, %c3_598, %c0_599] : memref<12x12x64xf32, #tpu.memory_space<vmem>>, vector<1x8x64xf32>
    %552 = vector.shape_cast %551 : vector<1x8x64xf32> to vector<8x64xf32>
    %c5_600 = arith.constant 5 : index
    %c3_601 = arith.constant 3 : index
    %c0_602 = arith.constant 0 : index
    %553 = vector.load %arg10[%c5_600, %c3_601, %c0_602] : memref<12x12x64xf32, #tpu.memory_space<vmem>>, vector<1x8x64xf32>
    %554 = vector.shape_cast %553 : vector<1x8x64xf32> to vector<8x64xf32>
    %c6_603 = arith.constant 6 : index
    %c3_604 = arith.constant 3 : index
    %c0_605 = arith.constant 0 : index
    %555 = vector.load %arg10[%c6_603, %c3_604, %c0_605] : memref<12x12x64xf32, #tpu.memory_space<vmem>>, vector<1x8x64xf32>
    %556 = vector.shape_cast %555 : vector<1x8x64xf32> to vector<8x64xf32>
    %c7_606 = arith.constant 7 : index
    %c3_607 = arith.constant 3 : index
    %c0_608 = arith.constant 0 : index
    %557 = vector.load %arg10[%c7_606, %c3_607, %c0_608] : memref<12x12x64xf32, #tpu.memory_space<vmem>>, vector<1x8x64xf32>
    %558 = vector.shape_cast %557 : vector<1x8x64xf32> to vector<8x64xf32>
    %c8_609 = arith.constant 8 : index
    %c3_610 = arith.constant 3 : index
    %c0_611 = arith.constant 0 : index
    %559 = vector.load %arg10[%c8_609, %c3_610, %c0_611] : memref<12x12x64xf32, #tpu.memory_space<vmem>>, vector<1x8x64xf32>
    %560 = vector.shape_cast %559 : vector<1x8x64xf32> to vector<8x64xf32>
    %c9_612 = arith.constant 9 : index
    %c3_613 = arith.constant 3 : index
    %c0_614 = arith.constant 0 : index
    %561 = vector.load %arg10[%c9_612, %c3_613, %c0_614] : memref<12x12x64xf32, #tpu.memory_space<vmem>>, vector<1x8x64xf32>
    %562 = vector.shape_cast %561 : vector<1x8x64xf32> to vector<8x64xf32>
    %c10_615 = arith.constant 10 : index
    %c3_616 = arith.constant 3 : index
    %c0_617 = arith.constant 0 : index
    %563 = vector.load %arg10[%c10_615, %c3_616, %c0_617] : memref<12x12x64xf32, #tpu.memory_space<vmem>>, vector<1x8x64xf32>
    %564 = vector.shape_cast %563 : vector<1x8x64xf32> to vector<8x64xf32>
    %565 = tpu.concatenate %550, %552, %554, %556, %558, %560, %562, %564 in 0 : vector<8x64xf32>, vector<8x64xf32>, vector<8x64xf32>, vector<8x64xf32>, vector<8x64xf32>, vector<8x64xf32>, vector<8x64xf32>, vector<8x64xf32> -> vector<64x64xf32>
    %566 = arith.truncf %565 : vector<64x64xf32> to vector<64x64xbf16>
    %c18 = arith.constant 18 : index
    %c0_618 = arith.constant 0 : index
    %c0_619 = arith.constant 0 : index
    %567 = vector.load %arg4[%c18, %c0_618, %c0_619] : memref<25x64x64xbf16, #tpu.memory_space<vmem>>, vector<1x64x64xbf16>
    %568 = vector.shape_cast %567 : vector<1x64x64xbf16> to vector<64x64xbf16>
    %cst_620 = arith.constant dense<0.000000e+00> : vector<64x64xf32>
    %569 = tpu.matmul %566, %568, %cst_620 {dimension_numbers = #tpu.dot_dimension_numbers<[1], [0], [0], [1], [0, 0, 1, 1], [], []>} : vector<64x64xbf16>, vector<64x64xbf16>, vector<64x64xf32> -> vector<64x64xf32>
    %570 = arith.addf %548, %569 : vector<64x64xf32>
    %c3_621 = arith.constant 3 : index
    %c4_622 = arith.constant 4 : index
    %c0_623 = arith.constant 0 : index
    %571 = vector.load %arg10[%c3_621, %c4_622, %c0_623] : memref<12x12x64xf32, #tpu.memory_space<vmem>>, vector<1x8x64xf32>
    %572 = vector.shape_cast %571 : vector<1x8x64xf32> to vector<8x64xf32>
    %c4_624 = arith.constant 4 : index
    %c4_625 = arith.constant 4 : index
    %c0_626 = arith.constant 0 : index
    %573 = vector.load %arg10[%c4_624, %c4_625, %c0_626] : memref<12x12x64xf32, #tpu.memory_space<vmem>>, vector<1x8x64xf32>
    %574 = vector.shape_cast %573 : vector<1x8x64xf32> to vector<8x64xf32>
    %c5_627 = arith.constant 5 : index
    %c4_628 = arith.constant 4 : index
    %c0_629 = arith.constant 0 : index
    %575 = vector.load %arg10[%c5_627, %c4_628, %c0_629] : memref<12x12x64xf32, #tpu.memory_space<vmem>>, vector<1x8x64xf32>
    %576 = vector.shape_cast %575 : vector<1x8x64xf32> to vector<8x64xf32>
    %c6_630 = arith.constant 6 : index
    %c4_631 = arith.constant 4 : index
    %c0_632 = arith.constant 0 : index
    %577 = vector.load %arg10[%c6_630, %c4_631, %c0_632] : memref<12x12x64xf32, #tpu.memory_space<vmem>>, vector<1x8x64xf32>
    %578 = vector.shape_cast %577 : vector<1x8x64xf32> to vector<8x64xf32>
    %c7_633 = arith.constant 7 : index
    %c4_634 = arith.constant 4 : index
    %c0_635 = arith.constant 0 : index
    %579 = vector.load %arg10[%c7_633, %c4_634, %c0_635] : memref<12x12x64xf32, #tpu.memory_space<vmem>>, vector<1x8x64xf32>
    %580 = vector.shape_cast %579 : vector<1x8x64xf32> to vector<8x64xf32>
    %c8_636 = arith.constant 8 : index
    %c4_637 = arith.constant 4 : index
    %c0_638 = arith.constant 0 : index
    %581 = vector.load %arg10[%c8_636, %c4_637, %c0_638] : memref<12x12x64xf32, #tpu.memory_space<vmem>>, vector<1x8x64xf32>
    %582 = vector.shape_cast %581 : vector<1x8x64xf32> to vector<8x64xf32>
    %c9_639 = arith.constant 9 : index
    %c4_640 = arith.constant 4 : index
    %c0_641 = arith.constant 0 : index
    %583 = vector.load %arg10[%c9_639, %c4_640, %c0_641] : memref<12x12x64xf32, #tpu.memory_space<vmem>>, vector<1x8x64xf32>
    %584 = vector.shape_cast %583 : vector<1x8x64xf32> to vector<8x64xf32>
    %c10_642 = arith.constant 10 : index
    %c4_643 = arith.constant 4 : index
    %c0_644 = arith.constant 0 : index
    %585 = vector.load %arg10[%c10_642, %c4_643, %c0_644] : memref<12x12x64xf32, #tpu.memory_space<vmem>>, vector<1x8x64xf32>
    %586 = vector.shape_cast %585 : vector<1x8x64xf32> to vector<8x64xf32>
    %587 = tpu.concatenate %572, %574, %576, %578, %580, %582, %584, %586 in 0 : vector<8x64xf32>, vector<8x64xf32>, vector<8x64xf32>, vector<8x64xf32>, vector<8x64xf32>, vector<8x64xf32>, vector<8x64xf32>, vector<8x64xf32> -> vector<64x64xf32>
    %588 = arith.truncf %587 : vector<64x64xf32> to vector<64x64xbf16>
    %c19 = arith.constant 19 : index
    %c0_645 = arith.constant 0 : index
    %c0_646 = arith.constant 0 : index
    %589 = vector.load %arg4[%c19, %c0_645, %c0_646] : memref<25x64x64xbf16, #tpu.memory_space<vmem>>, vector<1x64x64xbf16>
    %590 = vector.shape_cast %589 : vector<1x64x64xbf16> to vector<64x64xbf16>
    %cst_647 = arith.constant dense<0.000000e+00> : vector<64x64xf32>
    %591 = tpu.matmul %588, %590, %cst_647 {dimension_numbers = #tpu.dot_dimension_numbers<[1], [0], [0], [1], [0, 0, 1, 1], [], []>} : vector<64x64xbf16>, vector<64x64xbf16>, vector<64x64xf32> -> vector<64x64xf32>
    %592 = arith.addf %570, %591 : vector<64x64xf32>
    %c4_648 = arith.constant 4 : index
    %c0_649 = arith.constant 0 : index
    %c0_650 = arith.constant 0 : index
    %593 = vector.load %arg10[%c4_648, %c0_649, %c0_650] : memref<12x12x64xf32, #tpu.memory_space<vmem>>, vector<1x8x64xf32>
    %594 = vector.shape_cast %593 : vector<1x8x64xf32> to vector<8x64xf32>
    %c5_651 = arith.constant 5 : index
    %c0_652 = arith.constant 0 : index
    %c0_653 = arith.constant 0 : index
    %595 = vector.load %arg10[%c5_651, %c0_652, %c0_653] : memref<12x12x64xf32, #tpu.memory_space<vmem>>, vector<1x8x64xf32>
    %596 = vector.shape_cast %595 : vector<1x8x64xf32> to vector<8x64xf32>
    %c6_654 = arith.constant 6 : index
    %c0_655 = arith.constant 0 : index
    %c0_656 = arith.constant 0 : index
    %597 = vector.load %arg10[%c6_654, %c0_655, %c0_656] : memref<12x12x64xf32, #tpu.memory_space<vmem>>, vector<1x8x64xf32>
    %598 = vector.shape_cast %597 : vector<1x8x64xf32> to vector<8x64xf32>
    %c7_657 = arith.constant 7 : index
    %c0_658 = arith.constant 0 : index
    %c0_659 = arith.constant 0 : index
    %599 = vector.load %arg10[%c7_657, %c0_658, %c0_659] : memref<12x12x64xf32, #tpu.memory_space<vmem>>, vector<1x8x64xf32>
    %600 = vector.shape_cast %599 : vector<1x8x64xf32> to vector<8x64xf32>
    %c8_660 = arith.constant 8 : index
    %c0_661 = arith.constant 0 : index
    %c0_662 = arith.constant 0 : index
    %601 = vector.load %arg10[%c8_660, %c0_661, %c0_662] : memref<12x12x64xf32, #tpu.memory_space<vmem>>, vector<1x8x64xf32>
    %602 = vector.shape_cast %601 : vector<1x8x64xf32> to vector<8x64xf32>
    %c9_663 = arith.constant 9 : index
    %c0_664 = arith.constant 0 : index
    %c0_665 = arith.constant 0 : index
    %603 = vector.load %arg10[%c9_663, %c0_664, %c0_665] : memref<12x12x64xf32, #tpu.memory_space<vmem>>, vector<1x8x64xf32>
    %604 = vector.shape_cast %603 : vector<1x8x64xf32> to vector<8x64xf32>
    %c10_666 = arith.constant 10 : index
    %c0_667 = arith.constant 0 : index
    %c0_668 = arith.constant 0 : index
    %605 = vector.load %arg10[%c10_666, %c0_667, %c0_668] : memref<12x12x64xf32, #tpu.memory_space<vmem>>, vector<1x8x64xf32>
    %606 = vector.shape_cast %605 : vector<1x8x64xf32> to vector<8x64xf32>
    %c11_669 = arith.constant 11 : index
    %c0_670 = arith.constant 0 : index
    %c0_671 = arith.constant 0 : index
    %607 = vector.load %arg10[%c11_669, %c0_670, %c0_671] : memref<12x12x64xf32, #tpu.memory_space<vmem>>, vector<1x8x64xf32>
    %608 = vector.shape_cast %607 : vector<1x8x64xf32> to vector<8x64xf32>
    %609 = tpu.concatenate %594, %596, %598, %600, %602, %604, %606, %608 in 0 : vector<8x64xf32>, vector<8x64xf32>, vector<8x64xf32>, vector<8x64xf32>, vector<8x64xf32>, vector<8x64xf32>, vector<8x64xf32>, vector<8x64xf32> -> vector<64x64xf32>
    %610 = arith.truncf %609 : vector<64x64xf32> to vector<64x64xbf16>
    %c20 = arith.constant 20 : index
    %c0_672 = arith.constant 0 : index
    %c0_673 = arith.constant 0 : index
    %611 = vector.load %arg4[%c20, %c0_672, %c0_673] : memref<25x64x64xbf16, #tpu.memory_space<vmem>>, vector<1x64x64xbf16>
    %612 = vector.shape_cast %611 : vector<1x64x64xbf16> to vector<64x64xbf16>
    %cst_674 = arith.constant dense<0.000000e+00> : vector<64x64xf32>
    %613 = tpu.matmul %610, %612, %cst_674 {dimension_numbers = #tpu.dot_dimension_numbers<[1], [0], [0], [1], [0, 0, 1, 1], [], []>} : vector<64x64xbf16>, vector<64x64xbf16>, vector<64x64xf32> -> vector<64x64xf32>
    %614 = arith.addf %592, %613 : vector<64x64xf32>
    %c4_675 = arith.constant 4 : index
    %c1_676 = arith.constant 1 : index
    %c0_677 = arith.constant 0 : index
    %615 = vector.load %arg10[%c4_675, %c1_676, %c0_677] : memref<12x12x64xf32, #tpu.memory_space<vmem>>, vector<1x8x64xf32>
    %616 = vector.shape_cast %615 : vector<1x8x64xf32> to vector<8x64xf32>
    %c5_678 = arith.constant 5 : index
    %c1_679 = arith.constant 1 : index
    %c0_680 = arith.constant 0 : index
    %617 = vector.load %arg10[%c5_678, %c1_679, %c0_680] : memref<12x12x64xf32, #tpu.memory_space<vmem>>, vector<1x8x64xf32>
    %618 = vector.shape_cast %617 : vector<1x8x64xf32> to vector<8x64xf32>
    %c6_681 = arith.constant 6 : index
    %c1_682 = arith.constant 1 : index
    %c0_683 = arith.constant 0 : index
    %619 = vector.load %arg10[%c6_681, %c1_682, %c0_683] : memref<12x12x64xf32, #tpu.memory_space<vmem>>, vector<1x8x64xf32>
    %620 = vector.shape_cast %619 : vector<1x8x64xf32> to vector<8x64xf32>
    %c7_684 = arith.constant 7 : index
    %c1_685 = arith.constant 1 : index
    %c0_686 = arith.constant 0 : index
    %621 = vector.load %arg10[%c7_684, %c1_685, %c0_686] : memref<12x12x64xf32, #tpu.memory_space<vmem>>, vector<1x8x64xf32>
    %622 = vector.shape_cast %621 : vector<1x8x64xf32> to vector<8x64xf32>
    %c8_687 = arith.constant 8 : index
    %c1_688 = arith.constant 1 : index
    %c0_689 = arith.constant 0 : index
    %623 = vector.load %arg10[%c8_687, %c1_688, %c0_689] : memref<12x12x64xf32, #tpu.memory_space<vmem>>, vector<1x8x64xf32>
    %624 = vector.shape_cast %623 : vector<1x8x64xf32> to vector<8x64xf32>
    %c9_690 = arith.constant 9 : index
    %c1_691 = arith.constant 1 : index
    %c0_692 = arith.constant 0 : index
    %625 = vector.load %arg10[%c9_690, %c1_691, %c0_692] : memref<12x12x64xf32, #tpu.memory_space<vmem>>, vector<1x8x64xf32>
    %626 = vector.shape_cast %625 : vector<1x8x64xf32> to vector<8x64xf32>
    %c10_693 = arith.constant 10 : index
    %c1_694 = arith.constant 1 : index
    %c0_695 = arith.constant 0 : index
    %627 = vector.load %arg10[%c10_693, %c1_694, %c0_695] : memref<12x12x64xf32, #tpu.memory_space<vmem>>, vector<1x8x64xf32>
    %628 = vector.shape_cast %627 : vector<1x8x64xf32> to vector<8x64xf32>
    %c11_696 = arith.constant 11 : index
    %c1_697 = arith.constant 1 : index
    %c0_698 = arith.constant 0 : index
    %629 = vector.load %arg10[%c11_696, %c1_697, %c0_698] : memref<12x12x64xf32, #tpu.memory_space<vmem>>, vector<1x8x64xf32>
    %630 = vector.shape_cast %629 : vector<1x8x64xf32> to vector<8x64xf32>
    %631 = tpu.concatenate %616, %618, %620, %622, %624, %626, %628, %630 in 0 : vector<8x64xf32>, vector<8x64xf32>, vector<8x64xf32>, vector<8x64xf32>, vector<8x64xf32>, vector<8x64xf32>, vector<8x64xf32>, vector<8x64xf32> -> vector<64x64xf32>
    %632 = arith.truncf %631 : vector<64x64xf32> to vector<64x64xbf16>
    %c21 = arith.constant 21 : index
    %c0_699 = arith.constant 0 : index
    %c0_700 = arith.constant 0 : index
    %633 = vector.load %arg4[%c21, %c0_699, %c0_700] : memref<25x64x64xbf16, #tpu.memory_space<vmem>>, vector<1x64x64xbf16>
    %634 = vector.shape_cast %633 : vector<1x64x64xbf16> to vector<64x64xbf16>
    %cst_701 = arith.constant dense<0.000000e+00> : vector<64x64xf32>
    %635 = tpu.matmul %632, %634, %cst_701 {dimension_numbers = #tpu.dot_dimension_numbers<[1], [0], [0], [1], [0, 0, 1, 1], [], []>} : vector<64x64xbf16>, vector<64x64xbf16>, vector<64x64xf32> -> vector<64x64xf32>
    %636 = arith.addf %614, %635 : vector<64x64xf32>
    %c4_702 = arith.constant 4 : index
    %c2_703 = arith.constant 2 : index
    %c0_704 = arith.constant 0 : index
    %637 = vector.load %arg10[%c4_702, %c2_703, %c0_704] : memref<12x12x64xf32, #tpu.memory_space<vmem>>, vector<1x8x64xf32>
    %638 = vector.shape_cast %637 : vector<1x8x64xf32> to vector<8x64xf32>
    %c5_705 = arith.constant 5 : index
    %c2_706 = arith.constant 2 : index
    %c0_707 = arith.constant 0 : index
    %639 = vector.load %arg10[%c5_705, %c2_706, %c0_707] : memref<12x12x64xf32, #tpu.memory_space<vmem>>, vector<1x8x64xf32>
    %640 = vector.shape_cast %639 : vector<1x8x64xf32> to vector<8x64xf32>
    %c6_708 = arith.constant 6 : index
    %c2_709 = arith.constant 2 : index
    %c0_710 = arith.constant 0 : index
    %641 = vector.load %arg10[%c6_708, %c2_709, %c0_710] : memref<12x12x64xf32, #tpu.memory_space<vmem>>, vector<1x8x64xf32>
    %642 = vector.shape_cast %641 : vector<1x8x64xf32> to vector<8x64xf32>
    %c7_711 = arith.constant 7 : index
    %c2_712 = arith.constant 2 : index
    %c0_713 = arith.constant 0 : index
    %643 = vector.load %arg10[%c7_711, %c2_712, %c0_713] : memref<12x12x64xf32, #tpu.memory_space<vmem>>, vector<1x8x64xf32>
    %644 = vector.shape_cast %643 : vector<1x8x64xf32> to vector<8x64xf32>
    %c8_714 = arith.constant 8 : index
    %c2_715 = arith.constant 2 : index
    %c0_716 = arith.constant 0 : index
    %645 = vector.load %arg10[%c8_714, %c2_715, %c0_716] : memref<12x12x64xf32, #tpu.memory_space<vmem>>, vector<1x8x64xf32>
    %646 = vector.shape_cast %645 : vector<1x8x64xf32> to vector<8x64xf32>
    %c9_717 = arith.constant 9 : index
    %c2_718 = arith.constant 2 : index
    %c0_719 = arith.constant 0 : index
    %647 = vector.load %arg10[%c9_717, %c2_718, %c0_719] : memref<12x12x64xf32, #tpu.memory_space<vmem>>, vector<1x8x64xf32>
    %648 = vector.shape_cast %647 : vector<1x8x64xf32> to vector<8x64xf32>
    %c10_720 = arith.constant 10 : index
    %c2_721 = arith.constant 2 : index
    %c0_722 = arith.constant 0 : index
    %649 = vector.load %arg10[%c10_720, %c2_721, %c0_722] : memref<12x12x64xf32, #tpu.memory_space<vmem>>, vector<1x8x64xf32>
    %650 = vector.shape_cast %649 : vector<1x8x64xf32> to vector<8x64xf32>
    %c11_723 = arith.constant 11 : index
    %c2_724 = arith.constant 2 : index
    %c0_725 = arith.constant 0 : index
    %651 = vector.load %arg10[%c11_723, %c2_724, %c0_725] : memref<12x12x64xf32, #tpu.memory_space<vmem>>, vector<1x8x64xf32>
    %652 = vector.shape_cast %651 : vector<1x8x64xf32> to vector<8x64xf32>
    %653 = tpu.concatenate %638, %640, %642, %644, %646, %648, %650, %652 in 0 : vector<8x64xf32>, vector<8x64xf32>, vector<8x64xf32>, vector<8x64xf32>, vector<8x64xf32>, vector<8x64xf32>, vector<8x64xf32>, vector<8x64xf32> -> vector<64x64xf32>
    %654 = arith.truncf %653 : vector<64x64xf32> to vector<64x64xbf16>
    %c22 = arith.constant 22 : index
    %c0_726 = arith.constant 0 : index
    %c0_727 = arith.constant 0 : index
    %655 = vector.load %arg4[%c22, %c0_726, %c0_727] : memref<25x64x64xbf16, #tpu.memory_space<vmem>>, vector<1x64x64xbf16>
    %656 = vector.shape_cast %655 : vector<1x64x64xbf16> to vector<64x64xbf16>
    %cst_728 = arith.constant dense<0.000000e+00> : vector<64x64xf32>
    %657 = tpu.matmul %654, %656, %cst_728 {dimension_numbers = #tpu.dot_dimension_numbers<[1], [0], [0], [1], [0, 0, 1, 1], [], []>} : vector<64x64xbf16>, vector<64x64xbf16>, vector<64x64xf32> -> vector<64x64xf32>
    %658 = arith.addf %636, %657 : vector<64x64xf32>
    %c4_729 = arith.constant 4 : index
    %c3_730 = arith.constant 3 : index
    %c0_731 = arith.constant 0 : index
    %659 = vector.load %arg10[%c4_729, %c3_730, %c0_731] : memref<12x12x64xf32, #tpu.memory_space<vmem>>, vector<1x8x64xf32>
    %660 = vector.shape_cast %659 : vector<1x8x64xf32> to vector<8x64xf32>
    %c5_732 = arith.constant 5 : index
    %c3_733 = arith.constant 3 : index
    %c0_734 = arith.constant 0 : index
    %661 = vector.load %arg10[%c5_732, %c3_733, %c0_734] : memref<12x12x64xf32, #tpu.memory_space<vmem>>, vector<1x8x64xf32>
    %662 = vector.shape_cast %661 : vector<1x8x64xf32> to vector<8x64xf32>
    %c6_735 = arith.constant 6 : index
    %c3_736 = arith.constant 3 : index
    %c0_737 = arith.constant 0 : index
    %663 = vector.load %arg10[%c6_735, %c3_736, %c0_737] : memref<12x12x64xf32, #tpu.memory_space<vmem>>, vector<1x8x64xf32>
    %664 = vector.shape_cast %663 : vector<1x8x64xf32> to vector<8x64xf32>
    %c7_738 = arith.constant 7 : index
    %c3_739 = arith.constant 3 : index
    %c0_740 = arith.constant 0 : index
    %665 = vector.load %arg10[%c7_738, %c3_739, %c0_740] : memref<12x12x64xf32, #tpu.memory_space<vmem>>, vector<1x8x64xf32>
    %666 = vector.shape_cast %665 : vector<1x8x64xf32> to vector<8x64xf32>
    %c8_741 = arith.constant 8 : index
    %c3_742 = arith.constant 3 : index
    %c0_743 = arith.constant 0 : index
    %667 = vector.load %arg10[%c8_741, %c3_742, %c0_743] : memref<12x12x64xf32, #tpu.memory_space<vmem>>, vector<1x8x64xf32>
    %668 = vector.shape_cast %667 : vector<1x8x64xf32> to vector<8x64xf32>
    %c9_744 = arith.constant 9 : index
    %c3_745 = arith.constant 3 : index
    %c0_746 = arith.constant 0 : index
    %669 = vector.load %arg10[%c9_744, %c3_745, %c0_746] : memref<12x12x64xf32, #tpu.memory_space<vmem>>, vector<1x8x64xf32>
    %670 = vector.shape_cast %669 : vector<1x8x64xf32> to vector<8x64xf32>
    %c10_747 = arith.constant 10 : index
    %c3_748 = arith.constant 3 : index
    %c0_749 = arith.constant 0 : index
    %671 = vector.load %arg10[%c10_747, %c3_748, %c0_749] : memref<12x12x64xf32, #tpu.memory_space<vmem>>, vector<1x8x64xf32>
    %672 = vector.shape_cast %671 : vector<1x8x64xf32> to vector<8x64xf32>
    %c11_750 = arith.constant 11 : index
    %c3_751 = arith.constant 3 : index
    %c0_752 = arith.constant 0 : index
    %673 = vector.load %arg10[%c11_750, %c3_751, %c0_752] : memref<12x12x64xf32, #tpu.memory_space<vmem>>, vector<1x8x64xf32>
    %674 = vector.shape_cast %673 : vector<1x8x64xf32> to vector<8x64xf32>
    %675 = tpu.concatenate %660, %662, %664, %666, %668, %670, %672, %674 in 0 : vector<8x64xf32>, vector<8x64xf32>, vector<8x64xf32>, vector<8x64xf32>, vector<8x64xf32>, vector<8x64xf32>, vector<8x64xf32>, vector<8x64xf32> -> vector<64x64xf32>
    %676 = arith.truncf %675 : vector<64x64xf32> to vector<64x64xbf16>
    %c23 = arith.constant 23 : index
    %c0_753 = arith.constant 0 : index
    %c0_754 = arith.constant 0 : index
    %677 = vector.load %arg4[%c23, %c0_753, %c0_754] : memref<25x64x64xbf16, #tpu.memory_space<vmem>>, vector<1x64x64xbf16>
    %678 = vector.shape_cast %677 : vector<1x64x64xbf16> to vector<64x64xbf16>
    %cst_755 = arith.constant dense<0.000000e+00> : vector<64x64xf32>
    %679 = tpu.matmul %676, %678, %cst_755 {dimension_numbers = #tpu.dot_dimension_numbers<[1], [0], [0], [1], [0, 0, 1, 1], [], []>} : vector<64x64xbf16>, vector<64x64xbf16>, vector<64x64xf32> -> vector<64x64xf32>
    %680 = arith.addf %658, %679 : vector<64x64xf32>
    %c4_756 = arith.constant 4 : index
    %c4_757 = arith.constant 4 : index
    %c0_758 = arith.constant 0 : index
    %681 = vector.load %arg10[%c4_756, %c4_757, %c0_758] : memref<12x12x64xf32, #tpu.memory_space<vmem>>, vector<1x8x64xf32>
    %682 = vector.shape_cast %681 : vector<1x8x64xf32> to vector<8x64xf32>
    %c5_759 = arith.constant 5 : index
    %c4_760 = arith.constant 4 : index
    %c0_761 = arith.constant 0 : index
    %683 = vector.load %arg10[%c5_759, %c4_760, %c0_761] : memref<12x12x64xf32, #tpu.memory_space<vmem>>, vector<1x8x64xf32>
    %684 = vector.shape_cast %683 : vector<1x8x64xf32> to vector<8x64xf32>
    %c6_762 = arith.constant 6 : index
    %c4_763 = arith.constant 4 : index
    %c0_764 = arith.constant 0 : index
    %685 = vector.load %arg10[%c6_762, %c4_763, %c0_764] : memref<12x12x64xf32, #tpu.memory_space<vmem>>, vector<1x8x64xf32>
    %686 = vector.shape_cast %685 : vector<1x8x64xf32> to vector<8x64xf32>
    %c7_765 = arith.constant 7 : index
    %c4_766 = arith.constant 4 : index
    %c0_767 = arith.constant 0 : index
    %687 = vector.load %arg10[%c7_765, %c4_766, %c0_767] : memref<12x12x64xf32, #tpu.memory_space<vmem>>, vector<1x8x64xf32>
    %688 = vector.shape_cast %687 : vector<1x8x64xf32> to vector<8x64xf32>
    %c8_768 = arith.constant 8 : index
    %c4_769 = arith.constant 4 : index
    %c0_770 = arith.constant 0 : index
    %689 = vector.load %arg10[%c8_768, %c4_769, %c0_770] : memref<12x12x64xf32, #tpu.memory_space<vmem>>, vector<1x8x64xf32>
    %690 = vector.shape_cast %689 : vector<1x8x64xf32> to vector<8x64xf32>
    %c9_771 = arith.constant 9 : index
    %c4_772 = arith.constant 4 : index
    %c0_773 = arith.constant 0 : index
    %691 = vector.load %arg10[%c9_771, %c4_772, %c0_773] : memref<12x12x64xf32, #tpu.memory_space<vmem>>, vector<1x8x64xf32>
    %692 = vector.shape_cast %691 : vector<1x8x64xf32> to vector<8x64xf32>
    %c10_774 = arith.constant 10 : index
    %c4_775 = arith.constant 4 : index
    %c0_776 = arith.constant 0 : index
    %693 = vector.load %arg10[%c10_774, %c4_775, %c0_776] : memref<12x12x64xf32, #tpu.memory_space<vmem>>, vector<1x8x64xf32>
    %694 = vector.shape_cast %693 : vector<1x8x64xf32> to vector<8x64xf32>
    %c11_777 = arith.constant 11 : index
    %c4_778 = arith.constant 4 : index
    %c0_779 = arith.constant 0 : index
    %695 = vector.load %arg10[%c11_777, %c4_778, %c0_779] : memref<12x12x64xf32, #tpu.memory_space<vmem>>, vector<1x8x64xf32>
    %696 = vector.shape_cast %695 : vector<1x8x64xf32> to vector<8x64xf32>
    %697 = tpu.concatenate %682, %684, %686, %688, %690, %692, %694, %696 in 0 : vector<8x64xf32>, vector<8x64xf32>, vector<8x64xf32>, vector<8x64xf32>, vector<8x64xf32>, vector<8x64xf32>, vector<8x64xf32>, vector<8x64xf32> -> vector<64x64xf32>
    %698 = arith.truncf %697 : vector<64x64xf32> to vector<64x64xbf16>
    %c24_780 = arith.constant 24 : index
    %c0_781 = arith.constant 0 : index
    %c0_782 = arith.constant 0 : index
    %699 = vector.load %arg4[%c24_780, %c0_781, %c0_782] : memref<25x64x64xbf16, #tpu.memory_space<vmem>>, vector<1x64x64xbf16>
    %700 = vector.shape_cast %699 : vector<1x64x64xbf16> to vector<64x64xbf16>
    %cst_783 = arith.constant dense<0.000000e+00> : vector<64x64xf32>
    %701 = tpu.matmul %698, %700, %cst_783 {dimension_numbers = #tpu.dot_dimension_numbers<[1], [0], [0], [1], [0, 0, 1, 1], [], []>} : vector<64x64xbf16>, vector<64x64xbf16>, vector<64x64xf32> -> vector<64x64xf32>
    %702 = arith.addf %680, %701 : vector<64x64xf32>
    %c0_784 = arith.constant 0 : index
    %c0_785 = arith.constant 0 : index
    %703 = vector.load %arg5[%c0_784, %c0_785] : memref<1x64xf32, #tpu.memory_space<vmem>>, vector<1x64xf32>
    %704 = vector.broadcast %703 : vector<1x64xf32> to vector<64x64xf32>
    %705 = arith.addf %702, %704 : vector<64x64xf32>
    %c0_786 = arith.constant 0 : index
    %c0_787 = arith.constant 0 : index
    %706 = vector.load %arg11[%c0_786, %c0_787] : memref<64x64xf32, #tpu.memory_space<vmem>>, vector<64x64xf32>
    tpu.vector_store %arg11[%c0_786, %c0_787], %705 {strides = array<i32>} : memref<64x64xf32, #tpu.memory_space<vmem>>, vector<64x64xf32>,
    %c0_788 = arith.constant 0 : index
    %c0_789 = arith.constant 0 : index
    %707 = tpu.strided_load %arg11[%c0_788, %c0_789] {strides = array<i32: 2, 1>} : memref<64x64xf32, #tpu.memory_space<vmem>>, vector<4x64xf32>
    %c1_790 = arith.constant 1 : index
    %c0_791 = arith.constant 0 : index
    %708 = tpu.strided_load %arg11[%c1_790, %c0_791] {strides = array<i32: 2, 1>} : memref<64x64xf32, #tpu.memory_space<vmem>>, vector<4x64xf32>
    %709 = arith.maximumf %707, %708 : vector<4x64xf32>
    %c8_792 = arith.constant 8 : index
    %c0_793 = arith.constant 0 : index
    %710 = tpu.strided_load %arg11[%c8_792, %c0_793] {strides = array<i32: 2, 1>} : memref<64x64xf32, #tpu.memory_space<vmem>>, vector<4x64xf32>
    %c9_794 = arith.constant 9 : index
    %c0_795 = arith.constant 0 : index
    %711 = tpu.strided_load %arg11[%c9_794, %c0_795] {strides = array<i32: 2, 1>} : memref<64x64xf32, #tpu.memory_space<vmem>>, vector<4x64xf32>
    %712 = arith.maximumf %710, %711 : vector<4x64xf32>
    %713 = arith.maximumf %709, %712 : vector<4x64xf32>
    %cst_796 = arith.constant 0.000000e+00 : f32
    %714 = vector.broadcast %cst_796 : f32 to vector<4x64xf32>
    %715 = arith.maximumf %713, %714 : vector<4x64xf32>
    %716 = arith.truncf %715 : vector<4x64xf32> to vector<4x64xbf16>
    %c16_797 = arith.constant 16 : index
    %c0_798 = arith.constant 0 : index
    %717 = tpu.strided_load %arg11[%c16_797, %c0_798] {strides = array<i32: 2, 1>} : memref<64x64xf32, #tpu.memory_space<vmem>>, vector<4x64xf32>
    %c17_799 = arith.constant 17 : index
    %c0_800 = arith.constant 0 : index
    %718 = tpu.strided_load %arg11[%c17_799, %c0_800] {strides = array<i32: 2, 1>} : memref<64x64xf32, #tpu.memory_space<vmem>>, vector<4x64xf32>
    %719 = arith.maximumf %717, %718 : vector<4x64xf32>
    %c24_801 = arith.constant 24 : index
    %c0_802 = arith.constant 0 : index
    %720 = tpu.strided_load %arg11[%c24_801, %c0_802] {strides = array<i32: 2, 1>} : memref<64x64xf32, #tpu.memory_space<vmem>>, vector<4x64xf32>
    %c25_803 = arith.constant 25 : index
    %c0_804 = arith.constant 0 : index
    %721 = tpu.strided_load %arg11[%c25_803, %c0_804] {strides = array<i32: 2, 1>} : memref<64x64xf32, #tpu.memory_space<vmem>>, vector<4x64xf32>
    %722 = arith.maximumf %720, %721 : vector<4x64xf32>
    %723 = arith.maximumf %719, %722 : vector<4x64xf32>
    %cst_805 = arith.constant 0.000000e+00 : f32
    %724 = vector.broadcast %cst_805 : f32 to vector<4x64xf32>
    %725 = arith.maximumf %723, %724 : vector<4x64xf32>
    %726 = arith.truncf %725 : vector<4x64xf32> to vector<4x64xbf16>
    %c32 = arith.constant 32 : index
    %c0_806 = arith.constant 0 : index
    %727 = tpu.strided_load %arg11[%c32, %c0_806] {strides = array<i32: 2, 1>} : memref<64x64xf32, #tpu.memory_space<vmem>>, vector<4x64xf32>
    %c33 = arith.constant 33 : index
    %c0_807 = arith.constant 0 : index
    %728 = tpu.strided_load %arg11[%c33, %c0_807] {strides = array<i32: 2, 1>} : memref<64x64xf32, #tpu.memory_space<vmem>>, vector<4x64xf32>
    %729 = arith.maximumf %727, %728 : vector<4x64xf32>
    %c40 = arith.constant 40 : index
    %c0_808 = arith.constant 0 : index
    %730 = tpu.strided_load %arg11[%c40, %c0_808] {strides = array<i32: 2, 1>} : memref<64x64xf32, #tpu.memory_space<vmem>>, vector<4x64xf32>
    %c41 = arith.constant 41 : index
    %c0_809 = arith.constant 0 : index
    %731 = tpu.strided_load %arg11[%c41, %c0_809] {strides = array<i32: 2, 1>} : memref<64x64xf32, #tpu.memory_space<vmem>>, vector<4x64xf32>
    %732 = arith.maximumf %730, %731 : vector<4x64xf32>
    %733 = arith.maximumf %729, %732 : vector<4x64xf32>
    %cst_810 = arith.constant 0.000000e+00 : f32
    %734 = vector.broadcast %cst_810 : f32 to vector<4x64xf32>
    %735 = arith.maximumf %733, %734 : vector<4x64xf32>
    %736 = arith.truncf %735 : vector<4x64xf32> to vector<4x64xbf16>
    %c48_811 = arith.constant 48 : index
    %c0_812 = arith.constant 0 : index
    %737 = tpu.strided_load %arg11[%c48_811, %c0_812] {strides = array<i32: 2, 1>} : memref<64x64xf32, #tpu.memory_space<vmem>>, vector<4x64xf32>
    %c49_813 = arith.constant 49 : index
    %c0_814 = arith.constant 0 : index
    %738 = tpu.strided_load %arg11[%c49_813, %c0_814] {strides = array<i32: 2, 1>} : memref<64x64xf32, #tpu.memory_space<vmem>>, vector<4x64xf32>
    %739 = arith.maximumf %737, %738 : vector<4x64xf32>
    %c56 = arith.constant 56 : index
    %c0_815 = arith.constant 0 : index
    %740 = tpu.strided_load %arg11[%c56, %c0_815] {strides = array<i32: 2, 1>} : memref<64x64xf32, #tpu.memory_space<vmem>>, vector<4x64xf32>
    %c57 = arith.constant 57 : index
    %c0_816 = arith.constant 0 : index
    %741 = tpu.strided_load %arg11[%c57, %c0_816] {strides = array<i32: 2, 1>} : memref<64x64xf32, #tpu.memory_space<vmem>>, vector<4x64xf32>
    %742 = arith.maximumf %740, %741 : vector<4x64xf32>
    %743 = arith.maximumf %739, %742 : vector<4x64xf32>
    %cst_817 = arith.constant 0.000000e+00 : f32
    %744 = vector.broadcast %cst_817 : f32 to vector<4x64xf32>
    %745 = arith.maximumf %743, %744 : vector<4x64xf32>
    %746 = arith.truncf %745 : vector<4x64xf32> to vector<4x64xbf16>
    %cst_818 = arith.constant 0.000000e+00 : f32
    %747 = vector.broadcast %cst_818 : f32 to vector<2x128xf32>
    %748 = vector.extract_strided_slice %716 {offsets = [0, 0], sizes = [2, 64], strides = [1, 1]} : vector<4x64xbf16> to vector<2x64xbf16>
    %c0_819 = arith.constant 0 : index
    %c0_820 = arith.constant 0 : index
    %c0_821 = arith.constant 0 : index
    %749 = vector.load %arg6[%c0_819, %c0_820, %c0_821] : memref<9x64x128xbf16, #tpu.memory_space<vmem>>, vector<1x64x128xbf16>
    %750 = vector.shape_cast %749 : vector<1x64x128xbf16> to vector<64x128xbf16>
    %cst_822 = arith.constant dense<0.000000e+00> : vector<2x128xf32>
    %751 = tpu.matmul %748, %750, %cst_822 {dimension_numbers = #tpu.dot_dimension_numbers<[1], [0], [0], [1], [0, 0, 1, 1], [], []>} : vector<2x64xbf16>, vector<64x128xbf16>, vector<2x128xf32> -> vector<2x128xf32>
    %752 = arith.addf %747, %751 : vector<2x128xf32>
    %753 = vector.extract_strided_slice %716 {offsets = [1, 0], sizes = [2, 64], strides = [1, 1]} : vector<4x64xbf16> to vector<2x64xbf16>
    %c1_823 = arith.constant 1 : index
    %c0_824 = arith.constant 0 : index
    %c0_825 = arith.constant 0 : index
    %754 = vector.load %arg6[%c1_823, %c0_824, %c0_825] : memref<9x64x128xbf16, #tpu.memory_space<vmem>>, vector<1x64x128xbf16>
    %755 = vector.shape_cast %754 : vector<1x64x128xbf16> to vector<64x128xbf16>
    %cst_826 = arith.constant dense<0.000000e+00> : vector<2x128xf32>
    %756 = tpu.matmul %753, %755, %cst_826 {dimension_numbers = #tpu.dot_dimension_numbers<[1], [0], [0], [1], [0, 0, 1, 1], [], []>} : vector<2x64xbf16>, vector<64x128xbf16>, vector<2x128xf32> -> vector<2x128xf32>
    %757 = arith.addf %752, %756 : vector<2x128xf32>
    %758 = vector.extract_strided_slice %716 {offsets = [2, 0], sizes = [2, 64], strides = [1, 1]} : vector<4x64xbf16> to vector<2x64xbf16>
    %c2_827 = arith.constant 2 : index
    %c0_828 = arith.constant 0 : index
    %c0_829 = arith.constant 0 : index
    %759 = vector.load %arg6[%c2_827, %c0_828, %c0_829] : memref<9x64x128xbf16, #tpu.memory_space<vmem>>, vector<1x64x128xbf16>
    %760 = vector.shape_cast %759 : vector<1x64x128xbf16> to vector<64x128xbf16>
    %cst_830 = arith.constant dense<0.000000e+00> : vector<2x128xf32>
    %761 = tpu.matmul %758, %760, %cst_830 {dimension_numbers = #tpu.dot_dimension_numbers<[1], [0], [0], [1], [0, 0, 1, 1], [], []>} : vector<2x64xbf16>, vector<64x128xbf16>, vector<2x128xf32> -> vector<2x128xf32>
    %762 = arith.addf %757, %761 : vector<2x128xf32>
    %763 = vector.extract_strided_slice %726 {offsets = [0, 0], sizes = [2, 64], strides = [1, 1]} : vector<4x64xbf16> to vector<2x64xbf16>
    %c3_831 = arith.constant 3 : index
    %c0_832 = arith.constant 0 : index
    %c0_833 = arith.constant 0 : index
    %764 = vector.load %arg6[%c3_831, %c0_832, %c0_833] : memref<9x64x128xbf16, #tpu.memory_space<vmem>>, vector<1x64x128xbf16>
    %765 = vector.shape_cast %764 : vector<1x64x128xbf16> to vector<64x128xbf16>
    %cst_834 = arith.constant dense<0.000000e+00> : vector<2x128xf32>
    %766 = tpu.matmul %763, %765, %cst_834 {dimension_numbers = #tpu.dot_dimension_numbers<[1], [0], [0], [1], [0, 0, 1, 1], [], []>} : vector<2x64xbf16>, vector<64x128xbf16>, vector<2x128xf32> -> vector<2x128xf32>
    %767 = arith.addf %762, %766 : vector<2x128xf32>
    %768 = vector.extract_strided_slice %726 {offsets = [1, 0], sizes = [2, 64], strides = [1, 1]} : vector<4x64xbf16> to vector<2x64xbf16>
    %c4_835 = arith.constant 4 : index
    %c0_836 = arith.constant 0 : index
    %c0_837 = arith.constant 0 : index
    %769 = vector.load %arg6[%c4_835, %c0_836, %c0_837] : memref<9x64x128xbf16, #tpu.memory_space<vmem>>, vector<1x64x128xbf16>
    %770 = vector.shape_cast %769 : vector<1x64x128xbf16> to vector<64x128xbf16>
    %cst_838 = arith.constant dense<0.000000e+00> : vector<2x128xf32>
    %771 = tpu.matmul %768, %770, %cst_838 {dimension_numbers = #tpu.dot_dimension_numbers<[1], [0], [0], [1], [0, 0, 1, 1], [], []>} : vector<2x64xbf16>, vector<64x128xbf16>, vector<2x128xf32> -> vector<2x128xf32>
    %772 = arith.addf %767, %771 : vector<2x128xf32>
    %773 = vector.extract_strided_slice %726 {offsets = [2, 0], sizes = [2, 64], strides = [1, 1]} : vector<4x64xbf16> to vector<2x64xbf16>
    %c5_839 = arith.constant 5 : index
    %c0_840 = arith.constant 0 : index
    %c0_841 = arith.constant 0 : index
    %774 = vector.load %arg6[%c5_839, %c0_840, %c0_841] : memref<9x64x128xbf16, #tpu.memory_space<vmem>>, vector<1x64x128xbf16>
    %775 = vector.shape_cast %774 : vector<1x64x128xbf16> to vector<64x128xbf16>
    %cst_842 = arith.constant dense<0.000000e+00> : vector<2x128xf32>
    %776 = tpu.matmul %773, %775, %cst_842 {dimension_numbers = #tpu.dot_dimension_numbers<[1], [0], [0], [1], [0, 0, 1, 1], [], []>} : vector<2x64xbf16>, vector<64x128xbf16>, vector<2x128xf32> -> vector<2x128xf32>
    %777 = arith.addf %772, %776 : vector<2x128xf32>
    %778 = vector.extract_strided_slice %736 {offsets = [0, 0], sizes = [2, 64], strides = [1, 1]} : vector<4x64xbf16> to vector<2x64xbf16>
    %c6_843 = arith.constant 6 : index
    %c0_844 = arith.constant 0 : index
    %c0_845 = arith.constant 0 : index
    %779 = vector.load %arg6[%c6_843, %c0_844, %c0_845] : memref<9x64x128xbf16, #tpu.memory_space<vmem>>, vector<1x64x128xbf16>
    %780 = vector.shape_cast %779 : vector<1x64x128xbf16> to vector<64x128xbf16>
    %cst_846 = arith.constant dense<0.000000e+00> : vector<2x128xf32>
    %781 = tpu.matmul %778, %780, %cst_846 {dimension_numbers = #tpu.dot_dimension_numbers<[1], [0], [0], [1], [0, 0, 1, 1], [], []>} : vector<2x64xbf16>, vector<64x128xbf16>, vector<2x128xf32> -> vector<2x128xf32>
    %782 = arith.addf %777, %781 : vector<2x128xf32>
    %783 = vector.extract_strided_slice %736 {offsets = [1, 0], sizes = [2, 64], strides = [1, 1]} : vector<4x64xbf16> to vector<2x64xbf16>
    %c7_847 = arith.constant 7 : index
    %c0_848 = arith.constant 0 : index
    %c0_849 = arith.constant 0 : index
    %784 = vector.load %arg6[%c7_847, %c0_848, %c0_849] : memref<9x64x128xbf16, #tpu.memory_space<vmem>>, vector<1x64x128xbf16>
    %785 = vector.shape_cast %784 : vector<1x64x128xbf16> to vector<64x128xbf16>
    %cst_850 = arith.constant dense<0.000000e+00> : vector<2x128xf32>
    %786 = tpu.matmul %783, %785, %cst_850 {dimension_numbers = #tpu.dot_dimension_numbers<[1], [0], [0], [1], [0, 0, 1, 1], [], []>} : vector<2x64xbf16>, vector<64x128xbf16>, vector<2x128xf32> -> vector<2x128xf32>
    %787 = arith.addf %782, %786 : vector<2x128xf32>
    %788 = vector.extract_strided_slice %736 {offsets = [2, 0], sizes = [2, 64], strides = [1, 1]} : vector<4x64xbf16> to vector<2x64xbf16>
    %c8_851 = arith.constant 8 : index
    %c0_852 = arith.constant 0 : index
    %c0_853 = arith.constant 0 : index
    %789 = vector.load %arg6[%c8_851, %c0_852, %c0_853] : memref<9x64x128xbf16, #tpu.memory_space<vmem>>, vector<1x64x128xbf16>
    %790 = vector.shape_cast %789 : vector<1x64x128xbf16> to vector<64x128xbf16>
    %cst_854 = arith.constant dense<0.000000e+00> : vector<2x128xf32>
    %791 = tpu.matmul %788, %790, %cst_854 {dimension_numbers = #tpu.dot_dimension_numbers<[1], [0], [0], [1], [0, 0, 1, 1], [], []>} : vector<2x64xbf16>, vector<64x128xbf16>, vector<2x128xf32> -> vector<2x128xf32>
    %792 = arith.addf %787, %791 : vector<2x128xf32>
    %c0_855 = arith.constant 0 : index
    %c0_856 = arith.constant 0 : index
    %793 = vector.load %arg7[%c0_855, %c0_856] : memref<1x128xf32, #tpu.memory_space<vmem>>, vector<1x128xf32>
    %794 = vector.broadcast %793 : vector<1x128xf32> to vector<2x128xf32>
    %795 = arith.addf %792, %794 : vector<2x128xf32>
    %c0_857 = arith.constant 0 : index
    %c0_858 = arith.constant 0 : index
    %c0_859 = arith.constant 0 : index
    %796 = vector.load %arg8[%c0_857, %c0_858, %c0_859] : memref<1x4x128xf32, #tpu.memory_space<vmem>>, vector<1x2x128xf32>
    %797 = vector.shape_cast %796 : vector<1x2x128xf32> to vector<2x128xf32>
    %798 = vector.shape_cast %795 : vector<2x128xf32> to vector<1x2x128xf32>
    tpu.vector_store %arg8[%c0_857, %c0_858, %c0_859], %798 {strides = array<i32>} : memref<1x4x128xf32, #tpu.memory_space<vmem>>, vector<1x2x128xf32>,
    %cst_860 = arith.constant 0.000000e+00 : f32
    %799 = vector.broadcast %cst_860 : f32 to vector<2x128xf32>
    %800 = vector.extract_strided_slice %726 {offsets = [0, 0], sizes = [2, 64], strides = [1, 1]} : vector<4x64xbf16> to vector<2x64xbf16>
    %c0_861 = arith.constant 0 : index
    %c0_862 = arith.constant 0 : index
    %c0_863 = arith.constant 0 : index
    %801 = vector.load %arg6[%c0_861, %c0_862, %c0_863] : memref<9x64x128xbf16, #tpu.memory_space<vmem>>, vector<1x64x128xbf16>
    %802 = vector.shape_cast %801 : vector<1x64x128xbf16> to vector<64x128xbf16>
    %cst_864 = arith.constant dense<0.000000e+00> : vector<2x128xf32>
    %803 = tpu.matmul %800, %802, %cst_864 {dimension_numbers = #tpu.dot_dimension_numbers<[1], [0], [0], [1], [0, 0, 1, 1], [], []>} : vector<2x64xbf16>, vector<64x128xbf16>, vector<2x128xf32> -> vector<2x128xf32>
    %804 = arith.addf %799, %803 : vector<2x128xf32>
    %805 = vector.extract_strided_slice %726 {offsets = [1, 0], sizes = [2, 64], strides = [1, 1]} : vector<4x64xbf16> to vector<2x64xbf16>
    %c1_865 = arith.constant 1 : index
    %c0_866 = arith.constant 0 : index
    %c0_867 = arith.constant 0 : index
    %806 = vector.load %arg6[%c1_865, %c0_866, %c0_867] : memref<9x64x128xbf16, #tpu.memory_space<vmem>>, vector<1x64x128xbf16>
    %807 = vector.shape_cast %806 : vector<1x64x128xbf16> to vector<64x128xbf16>
    %cst_868 = arith.constant dense<0.000000e+00> : vector<2x128xf32>
    %808 = tpu.matmul %805, %807, %cst_868 {dimension_numbers = #tpu.dot_dimension_numbers<[1], [0], [0], [1], [0, 0, 1, 1], [], []>} : vector<2x64xbf16>, vector<64x128xbf16>, vector<2x128xf32> -> vector<2x128xf32>
    %809 = arith.addf %804, %808 : vector<2x128xf32>
    %810 = vector.extract_strided_slice %726 {offsets = [2, 0], sizes = [2, 64], strides = [1, 1]} : vector<4x64xbf16> to vector<2x64xbf16>
    %c2_869 = arith.constant 2 : index
    %c0_870 = arith.constant 0 : index
    %c0_871 = arith.constant 0 : index
    %811 = vector.load %arg6[%c2_869, %c0_870, %c0_871] : memref<9x64x128xbf16, #tpu.memory_space<vmem>>, vector<1x64x128xbf16>
    %812 = vector.shape_cast %811 : vector<1x64x128xbf16> to vector<64x128xbf16>
    %cst_872 = arith.constant dense<0.000000e+00> : vector<2x128xf32>
    %813 = tpu.matmul %810, %812, %cst_872 {dimension_numbers = #tpu.dot_dimension_numbers<[1], [0], [0], [1], [0, 0, 1, 1], [], []>} : vector<2x64xbf16>, vector<64x128xbf16>, vector<2x128xf32> -> vector<2x128xf32>
    %814 = arith.addf %809, %813 : vector<2x128xf32>
    %815 = vector.extract_strided_slice %736 {offsets = [0, 0], sizes = [2, 64], strides = [1, 1]} : vector<4x64xbf16> to vector<2x64xbf16>
    %c3_873 = arith.constant 3 : index
    %c0_874 = arith.constant 0 : index
    %c0_875 = arith.constant 0 : index
    %816 = vector.load %arg6[%c3_873, %c0_874, %c0_875] : memref<9x64x128xbf16, #tpu.memory_space<vmem>>, vector<1x64x128xbf16>
    %817 = vector.shape_cast %816 : vector<1x64x128xbf16> to vector<64x128xbf16>
    %cst_876 = arith.constant dense<0.000000e+00> : vector<2x128xf32>
    %818 = tpu.matmul %815, %817, %cst_876 {dimension_numbers = #tpu.dot_dimension_numbers<[1], [0], [0], [1], [0, 0, 1, 1], [], []>} : vector<2x64xbf16>, vector<64x128xbf16>, vector<2x128xf32> -> vector<2x128xf32>
    %819 = arith.addf %814, %818 : vector<2x128xf32>
    %820 = vector.extract_strided_slice %736 {offsets = [1, 0], sizes = [2, 64], strides = [1, 1]} : vector<4x64xbf16> to vector<2x64xbf16>
    %c4_877 = arith.constant 4 : index
    %c0_878 = arith.constant 0 : index
    %c0_879 = arith.constant 0 : index
    %821 = vector.load %arg6[%c4_877, %c0_878, %c0_879] : memref<9x64x128xbf16, #tpu.memory_space<vmem>>, vector<1x64x128xbf16>
    %822 = vector.shape_cast %821 : vector<1x64x128xbf16> to vector<64x128xbf16>
    %cst_880 = arith.constant dense<0.000000e+00> : vector<2x128xf32>
    %823 = tpu.matmul %820, %822, %cst_880 {dimension_numbers = #tpu.dot_dimension_numbers<[1], [0], [0], [1], [0, 0, 1, 1], [], []>} : vector<2x64xbf16>, vector<64x128xbf16>, vector<2x128xf32> -> vector<2x128xf32>
    %824 = arith.addf %819, %823 : vector<2x128xf32>
    %825 = vector.extract_strided_slice %736 {offsets = [2, 0], sizes = [2, 64], strides = [1, 1]} : vector<4x64xbf16> to vector<2x64xbf16>
    %c5_881 = arith.constant 5 : index
    %c0_882 = arith.constant 0 : index
    %c0_883 = arith.constant 0 : index
    %826 = vector.load %arg6[%c5_881, %c0_882, %c0_883] : memref<9x64x128xbf16, #tpu.memory_space<vmem>>, vector<1x64x128xbf16>
    %827 = vector.shape_cast %826 : vector<1x64x128xbf16> to vector<64x128xbf16>
    %cst_884 = arith.constant dense<0.000000e+00> : vector<2x128xf32>
    %828 = tpu.matmul %825, %827, %cst_884 {dimension_numbers = #tpu.dot_dimension_numbers<[1], [0], [0], [1], [0, 0, 1, 1], [], []>} : vector<2x64xbf16>, vector<64x128xbf16>, vector<2x128xf32> -> vector<2x128xf32>
    %829 = arith.addf %824, %828 : vector<2x128xf32>
    %830 = vector.extract_strided_slice %746 {offsets = [0, 0], sizes = [2, 64], strides = [1, 1]} : vector<4x64xbf16> to vector<2x64xbf16>
    %c6_885 = arith.constant 6 : index
    %c0_886 = arith.constant 0 : index
    %c0_887 = arith.constant 0 : index
    %831 = vector.load %arg6[%c6_885, %c0_886, %c0_887] : memref<9x64x128xbf16, #tpu.memory_space<vmem>>, vector<1x64x128xbf16>
    %832 = vector.shape_cast %831 : vector<1x64x128xbf16> to vector<64x128xbf16>
    %cst_888 = arith.constant dense<0.000000e+00> : vector<2x128xf32>
    %833 = tpu.matmul %830, %832, %cst_888 {dimension_numbers = #tpu.dot_dimension_numbers<[1], [0], [0], [1], [0, 0, 1, 1], [], []>} : vector<2x64xbf16>, vector<64x128xbf16>, vector<2x128xf32> -> vector<2x128xf32>
    %834 = arith.addf %829, %833 : vector<2x128xf32>
    %835 = vector.extract_strided_slice %746 {offsets = [1, 0], sizes = [2, 64], strides = [1, 1]} : vector<4x64xbf16> to vector<2x64xbf16>
    %c7_889 = arith.constant 7 : index
    %c0_890 = arith.constant 0 : index
    %c0_891 = arith.constant 0 : index
    %836 = vector.load %arg6[%c7_889, %c0_890, %c0_891] : memref<9x64x128xbf16, #tpu.memory_space<vmem>>, vector<1x64x128xbf16>
    %837 = vector.shape_cast %836 : vector<1x64x128xbf16> to vector<64x128xbf16>
    %cst_892 = arith.constant dense<0.000000e+00> : vector<2x128xf32>
    %838 = tpu.matmul %835, %837, %cst_892 {dimension_numbers = #tpu.dot_dimension_numbers<[1], [0], [0], [1], [0, 0, 1, 1], [], []>} : vector<2x64xbf16>, vector<64x128xbf16>, vector<2x128xf32> -> vector<2x128xf32>
    %839 = arith.addf %834, %838 : vector<2x128xf32>
    %840 = vector.extract_strided_slice %746 {offsets = [2, 0], sizes = [2, 64], strides = [1, 1]} : vector<4x64xbf16> to vector<2x64xbf16>
    %c8_893 = arith.constant 8 : index
    %c0_894 = arith.constant 0 : index
    %c0_895 = arith.constant 0 : index
    %841 = vector.load %arg6[%c8_893, %c0_894, %c0_895] : memref<9x64x128xbf16, #tpu.memory_space<vmem>>, vector<1x64x128xbf16>
    %842 = vector.shape_cast %841 : vector<1x64x128xbf16> to vector<64x128xbf16>
    %cst_896 = arith.constant dense<0.000000e+00> : vector<2x128xf32>
    %843 = tpu.matmul %840, %842, %cst_896 {dimension_numbers = #tpu.dot_dimension_numbers<[1], [0], [0], [1], [0, 0, 1, 1], [], []>} : vector<2x64xbf16>, vector<64x128xbf16>, vector<2x128xf32> -> vector<2x128xf32>
    %844 = arith.addf %839, %843 : vector<2x128xf32>
    %c0_897 = arith.constant 0 : index
    %c0_898 = arith.constant 0 : index
    %845 = vector.load %arg7[%c0_897, %c0_898] : memref<1x128xf32, #tpu.memory_space<vmem>>, vector<1x128xf32>
    %846 = vector.broadcast %845 : vector<1x128xf32> to vector<2x128xf32>
    %847 = arith.addf %844, %846 : vector<2x128xf32>
    %c0_899 = arith.constant 0 : index
    %c2_900 = arith.constant 2 : index
    %c0_901 = arith.constant 0 : index
    %848 = vector.load %arg8[%c0_899, %c2_900, %c0_901] : memref<1x4x128xf32, #tpu.memory_space<vmem>>, vector<1x2x128xf32>
    %849 = vector.shape_cast %848 : vector<1x2x128xf32> to vector<2x128xf32>
    %850 = vector.shape_cast %847 : vector<2x128xf32> to vector<1x2x128xf32>
    tpu.vector_store %arg8[%c0_899, %c2_900, %c0_901], %850 {strides = array<i32>} : memref<1x4x128xf32, #tpu.memory_space<vmem>>, vector<1x2x128xf32>,
    return
  }
  func.func @transform_0(%arg0: i32) -> (i32, i32, i32) {
    %c0_i32 = arith.constant 0 : i32
    %c0_i32_0 = arith.constant 0 : i32
    %c0_i32_1 = arith.constant 0 : i32
    return %arg0, %c0_i32, %c0_i32_0 : i32, i32, i32
  }
  func.func @transform_1(%arg0: i32) -> (i32, i32) {
    %c0_i32 = arith.constant 0 : i32
    %c0_i32_0 = arith.constant 0 : i32
    %c0_i32_1 = arith.constant 0 : i32
    return %c0_i32, %c0_i32_0 : i32, i32
  }
  func.func @transform_2(%arg0: i32) -> (i32, i32) {
    %c0_i32 = arith.constant 0 : i32
    %c0_i32_0 = arith.constant 0 : i32
    %c0_i32_1 = arith.constant 0 : i32
    return %c0_i32, %c0_i32_0 : i32, i32
  }
  func.func @transform_3(%arg0: i32) -> (i32, i32, i32) {
    %c0_i32 = arith.constant 0 : i32
    %c0_i32_0 = arith.constant 0 : i32
    %c0_i32_1 = arith.constant 0 : i32
    %c0_i32_2 = arith.constant 0 : i32
    return %c0_i32, %c0_i32_0, %c0_i32_1 : i32, i32, i32
  }
  func.func @transform_4(%arg0: i32) -> (i32, i32) {
    %c0_i32 = arith.constant 0 : i32
    %c0_i32_0 = arith.constant 0 : i32
    %c0_i32_1 = arith.constant 0 : i32
    return %c0_i32, %c0_i32_0 : i32, i32
  }
  func.func @transform_5(%arg0: i32) -> (i32, i32, i32) {
    %c0_i32 = arith.constant 0 : i32
    %c0_i32_0 = arith.constant 0 : i32
    %c0_i32_1 = arith.constant 0 : i32
    %c0_i32_2 = arith.constant 0 : i32
    return %c0_i32, %c0_i32_0, %c0_i32_1 : i32, i32, i32
  }
  func.func @transform_6(%arg0: i32) -> (i32, i32) {
    %c0_i32 = arith.constant 0 : i32
    %c0_i32_0 = arith.constant 0 : i32
    %c0_i32_1 = arith.constant 0 : i32
    return %c0_i32, %c0_i32_0 : i32, i32
  }
  func.func @transform_7(%arg0: i32) -> (i32, i32, i32) {
    %c0_i32 = arith.constant 0 : i32
    %c0_i32_0 = arith.constant 0 : i32
    %c0_i32_1 = arith.constant 0 : i32
    return %arg0, %c0_i32, %c0_i32_0 : i32, i32, i32
  }
}

module attributes {stable_mosaic.version = 11 : i64} {
  func.func @_fc_stack_kernel(%arg0: i32, %arg1: memref<2x512xf32, #tpu.memory_space<vmem>>, %arg2: memref<512x128xbf16, #tpu.memory_space<vmem>>, %arg3: memref<1x128xf32, #tpu.memory_space<vmem>>, %arg4: memref<128x128xbf16, #tpu.memory_space<vmem>>, %arg5: memref<1x128xf32, #tpu.memory_space<vmem>>, %arg6: memref<128x128xbf16, #tpu.memory_space<vmem>>, %arg7: memref<1x128xf32, #tpu.memory_space<vmem>>, %arg8: memref<2x128xf32, #tpu.memory_space<vmem>>) attributes {dimension_semantics = [#tpu.dimension_semantics<parallel>], iteration_bounds = array<i64: 1>, scalar_prefetch = 0 : i64, scratch_operands = 0 : i64, tpu.core_type = #tpu.core_type<tc>, window_params = [{transform_indices = @transform_0, window_bounds = array<i64: 2, 512>}, {pipeline_mode = #tpu.pipeline_mode<synchronous>, transform_indices = @transform_1, window_bounds = array<i64: 512, 128>}, {pipeline_mode = #tpu.pipeline_mode<synchronous>, transform_indices = @transform_2, window_bounds = array<i64: 1, 128>}, {pipeline_mode = #tpu.pipeline_mode<synchronous>, transform_indices = @transform_3, window_bounds = array<i64: 128, 128>}, {pipeline_mode = #tpu.pipeline_mode<synchronous>, transform_indices = @transform_4, window_bounds = array<i64: 1, 128>}, {pipeline_mode = #tpu.pipeline_mode<synchronous>, transform_indices = @transform_5, window_bounds = array<i64: 128, 128>}, {pipeline_mode = #tpu.pipeline_mode<synchronous>, transform_indices = @transform_6, window_bounds = array<i64: 1, 128>}, {transform_indices = @transform_7, window_bounds = array<i64: 2, 128>}]} {
    %c0 = arith.constant 0 : index
    %c0_0 = arith.constant 0 : index
    %0 = vector.load %arg1[%c0, %c0_0] : memref<2x512xf32, #tpu.memory_space<vmem>>, vector<2x512xf32>
    %1 = arith.truncf %0 : vector<2x512xf32> to vector<2x512xbf16>
    %c0_1 = arith.constant 0 : index
    %c0_2 = arith.constant 0 : index
    %2 = vector.load %arg2[%c0_1, %c0_2] : memref<512x128xbf16, #tpu.memory_space<vmem>>, vector<512x128xbf16>
    %cst = arith.constant dense<0.000000e+00> : vector<2x128xf32>
    %3 = tpu.matmul %1, %2, %cst {dimension_numbers = #tpu.dot_dimension_numbers<[1], [0], [0], [1], [0, 0, 1, 1], [], []>} : vector<2x512xbf16>, vector<512x128xbf16>, vector<2x128xf32> -> vector<2x128xf32>
    %c0_3 = arith.constant 0 : index
    %c0_4 = arith.constant 0 : index
    %4 = vector.load %arg3[%c0_3, %c0_4] : memref<1x128xf32, #tpu.memory_space<vmem>>, vector<1x128xf32>
    %5 = vector.broadcast %4 : vector<1x128xf32> to vector<2x128xf32>
    %6 = arith.addf %3, %5 : vector<2x128xf32>
    %cst_5 = arith.constant 0.000000e+00 : f32
    %7 = vector.broadcast %cst_5 : f32 to vector<2x128xf32>
    %8 = arith.maximumf %6, %7 : vector<2x128xf32>
    %9 = arith.truncf %8 : vector<2x128xf32> to vector<2x128xbf16>
    %c0_6 = arith.constant 0 : index
    %c0_7 = arith.constant 0 : index
    %10 = vector.load %arg4[%c0_6, %c0_7] : memref<128x128xbf16, #tpu.memory_space<vmem>>, vector<128x128xbf16>
    %cst_8 = arith.constant dense<0.000000e+00> : vector<2x128xf32>
    %11 = tpu.matmul %9, %10, %cst_8 {dimension_numbers = #tpu.dot_dimension_numbers<[1], [0], [0], [1], [0, 0, 1, 1], [], []>} : vector<2x128xbf16>, vector<128x128xbf16>, vector<2x128xf32> -> vector<2x128xf32>
    %c0_9 = arith.constant 0 : index
    %c0_10 = arith.constant 0 : index
    %12 = vector.load %arg5[%c0_9, %c0_10] : memref<1x128xf32, #tpu.memory_space<vmem>>, vector<1x128xf32>
    %13 = vector.broadcast %12 : vector<1x128xf32> to vector<2x128xf32>
    %14 = arith.addf %11, %13 : vector<2x128xf32>
    %cst_11 = arith.constant 0.000000e+00 : f32
    %15 = vector.broadcast %cst_11 : f32 to vector<2x128xf32>
    %16 = arith.maximumf %14, %15 : vector<2x128xf32>
    %17 = arith.truncf %16 : vector<2x128xf32> to vector<2x128xbf16>
    %c0_12 = arith.constant 0 : index
    %c0_13 = arith.constant 0 : index
    %18 = vector.load %arg6[%c0_12, %c0_13] : memref<128x128xbf16, #tpu.memory_space<vmem>>, vector<128x128xbf16>
    %cst_14 = arith.constant dense<0.000000e+00> : vector<2x128xf32>
    %19 = tpu.matmul %17, %18, %cst_14 {dimension_numbers = #tpu.dot_dimension_numbers<[1], [0], [0], [1], [0, 0, 1, 1], [], []>} : vector<2x128xbf16>, vector<128x128xbf16>, vector<2x128xf32> -> vector<2x128xf32>
    %c0_15 = arith.constant 0 : index
    %c0_16 = arith.constant 0 : index
    %20 = vector.load %arg7[%c0_15, %c0_16] : memref<1x128xf32, #tpu.memory_space<vmem>>, vector<1x128xf32>
    %21 = vector.broadcast %20 : vector<1x128xf32> to vector<2x128xf32>
    %22 = arith.addf %19, %21 : vector<2x128xf32>
    %cst_17 = arith.constant dense<0xFF800000> : vector<2xf32>
    %23 = vector.multi_reduction <maximumf>, %22, %cst_17 [1] : vector<2x128xf32> to vector<2xf32>
    %24 = vector.shape_cast %23 : vector<2xf32> to vector<2x1xf32>
    %25 = vector.broadcast %24 : vector<2x1xf32> to vector<2x128xf32>
    %26 = arith.subf %22, %25 : vector<2x128xf32>
    %27 = math.exp %26 : vector<2x128xf32>
    %cst_18 = arith.constant dense<0.000000e+00> : vector<2xf32>
    %28 = vector.multi_reduction <add>, %27, %cst_18 [1] : vector<2x128xf32> to vector<2xf32>
    %29 = vector.shape_cast %28 : vector<2xf32> to vector<2x1xf32>
    %30 = math.log %29 : vector<2x1xf32>
    %31 = arith.addf %30, %24 : vector<2x1xf32>
    %32 = vector.broadcast %31 : vector<2x1xf32> to vector<2x128xf32>
    %33 = arith.subf %22, %32 : vector<2x128xf32>
    %c0_19 = arith.constant 0 : index
    %c0_20 = arith.constant 0 : index
    %34 = vector.load %arg8[%c0_19, %c0_20] : memref<2x128xf32, #tpu.memory_space<vmem>>, vector<2x128xf32>
    tpu.vector_store %arg8[%c0_19, %c0_20], %33 {strides = array<i32>} : memref<2x128xf32, #tpu.memory_space<vmem>>, vector<2x128xf32>,
    return
  }
  func.func @transform_0(%arg0: i32) -> (i32, i32) {
    %c0_i32 = arith.constant 0 : i32
    %c0_i32_0 = arith.constant 0 : i32
    return %arg0, %c0_i32 : i32, i32
  }
  func.func @transform_1(%arg0: i32) -> (i32, i32) {
    %c0_i32 = arith.constant 0 : i32
    %c0_i32_0 = arith.constant 0 : i32
    %c0_i32_1 = arith.constant 0 : i32
    return %c0_i32, %c0_i32_0 : i32, i32
  }
  func.func @transform_2(%arg0: i32) -> (i32, i32) {
    %c0_i32 = arith.constant 0 : i32
    %c0_i32_0 = arith.constant 0 : i32
    %c0_i32_1 = arith.constant 0 : i32
    return %c0_i32, %c0_i32_0 : i32, i32
  }
  func.func @transform_3(%arg0: i32) -> (i32, i32) {
    %c0_i32 = arith.constant 0 : i32
    %c0_i32_0 = arith.constant 0 : i32
    %c0_i32_1 = arith.constant 0 : i32
    return %c0_i32, %c0_i32_0 : i32, i32
  }
  func.func @transform_4(%arg0: i32) -> (i32, i32) {
    %c0_i32 = arith.constant 0 : i32
    %c0_i32_0 = arith.constant 0 : i32
    %c0_i32_1 = arith.constant 0 : i32
    return %c0_i32, %c0_i32_0 : i32, i32
  }
  func.func @transform_5(%arg0: i32) -> (i32, i32) {
    %c0_i32 = arith.constant 0 : i32
    %c0_i32_0 = arith.constant 0 : i32
    %c0_i32_1 = arith.constant 0 : i32
    return %c0_i32, %c0_i32_0 : i32, i32
  }
  func.func @transform_6(%arg0: i32) -> (i32, i32) {
    %c0_i32 = arith.constant 0 : i32
    %c0_i32_0 = arith.constant 0 : i32
    %c0_i32_1 = arith.constant 0 : i32
    return %c0_i32, %c0_i32_0 : i32, i32
  }
  func.func @transform_7(%arg0: i32) -> (i32, i32) {
    %c0_i32 = arith.constant 0 : i32
    %c0_i32_0 = arith.constant 0 : i32
    return %arg0, %c0_i32 : i32, i32
  }
}

</mosaic_0001>

<bundles_post_ra>
// kernel: cnn_forward.3
= control target key start
LH: loop header
LB: loop body
LE: loop exit
PB: predicated region body
PF: predicated region fallthrough
CT: control target
= control target key end

     0   :  { %v34_v29 = vlaneseq  ;;  %v887_v35 = vmov 1983009808   ;;  %v888_v37 = vmov 0.0   ;;  %s1117_s0 = inlined_call_operand.vmem [shape: f32[2,512], index: 0, kind: input, shape index: {}]   ;;  %s1118_s1 = inlined_call_operand.vmem [shape: bf16[512,128], index: 1, kind: input, shape index: {}]   ;;  %s1119_s2 = inlined_call_operand.vmem [shape: f32[1,128], index: 2, kind: input, shape index: {}]   ;;  %s1120_s3 = inlined_call_operand.vmem [shape: bf16[128,128], index: 3, kind: input, shape index: {}]   ;;  %s1121_s4 = inlined_call_operand.vmem [shape: f32[1,128], index: 4, kind: input, shape index: {}]   ;;  %s1122_s5 = inlined_call_operand.vmem [shape: bf16[128,128], index: 5, kind: input, shape index: {}]   ;;  %s1123_s6 = inlined_call_operand.vmem [shape: f32[1,128], index: 6, kind: input, shape index: {}]   ;;  %s1124_s7 = inlined_call_operand.hbm [shape: f32[2,128], index: 7, kind: output, shape index: {}]  }
   0x1   :  { %v810_v0 = vld [vmem:[%s1118_s1 + $0x40] sm:$0xff]   ;;  %v814_v4 = vld [vmem:[%s1118_s1 + $0x48] sm:$0xff]   ;;  %v818_v8 = vld [vmem:[%s1118_s1 + $0x50] sm:$0xff]   ;;  %v32_v36 = vunpack.c.l.s4 %v887_v35 }
   0x2   :  { %v811_v1 = vld [vmem:[%s1118_s1 + $0xc0] sm:$0xff]   ;;  %704 = vmatprep.subr.bf16.mxu0 %v810_v0  ;;  %v815_v5 = vld [vmem:[%s1118_s1 + $0xc8] sm:$0xff]   ;;  %v819_v9 = vld [vmem:[%s1118_s1 + $0xd0] sm:$0xff]   ;;  %v35_v34 = vshrl.u32 %v34_v29, 7 }
   0x3   :  { %v812_v2 = vld [vmem:[%s1118_s1] sm:$0xff]   ;;  %726 = vmatprep.subr.bf16.mxu1 %v811_v1  ;;  %v816_v6 = vld [vmem:[%s1118_s1 + $0x8] sm:$0xff]   ;;  %v820_v10 = vld [vmem:[%s1118_s1 + $0x10] sm:$0xff]   ;;  %v33_v38 = vunpack.c.0.s8 %v32_v36 }
   0x4   :  { %v813_v3 = vld [vmem:[%s1118_s1 + $0x80] sm:$0xff]   ;;  %705 = vmatpush3.bf16.msra.mxu0 %v812_v2  ;;  %v817_v7 = vld [vmem:[%s1118_s1 + $0x88] sm:$0xff]   ;;  %v821_v11 = vld [vmem:[%s1118_s1 + $0x90] sm:$0xff]  }
   0x5   :  { %727 = vmatpush3.bf16.msra.mxu1 %v813_v3  ;;  %706 = vmatprep.subr.bf16.mxu0 %v814_v4  ;;  %v822_v12 = vld [vmem:[%s1118_s1 + $0x58] sm:$0xff]   ;;  %v826_v16 = vld [vmem:[%s1118_s1 + $0x60] sm:$0xff]   ;;  %v830_v20 = vld [vmem:[%s1118_s1 + $0x68] sm:$0xff]   ;;  %v36_v40 = vsub.s32 %v33_v38, %v35_v34 }
   0x6   :  { %728 = vmatprep.subr.bf16.mxu1 %v815_v5  ;;  %v823_v13 = vld [vmem:[%s1118_s1 + $0xd8] sm:$0xff]   ;;  %v827_v17 = vld [vmem:[%s1118_s1 + $0xe0] sm:$0xff]   ;;  %v831_v21 = vld [vmem:[%s1118_s1 + $0xe8] sm:$0xff]  }
   0x7   :  { %v824_v14 = vld [vmem:[%s1118_s1 + $0x18] sm:$0xff]   ;;  %v828_v18 = vld [vmem:[%s1118_s1 + $0x20] sm:$0xff]   ;;  %v832_v22 = vld [vmem:[%s1118_s1 + $0x28] sm:$0xff]  }
   0x8   :  { %707 = vmatpush3.bf16.msra.mxu0 %v816_v6  ;;  %v825_v15 = vld [vmem:[%s1118_s1 + $0x98] sm:$0xff]   ;;  %v829_v19 = vld [vmem:[%s1118_s1 + $0xa0] sm:$0xff]   ;;  %v833_v23 = vld [vmem:[%s1118_s1 + $0xa8] sm:$0xff]  }
   0x9   :  { %729 = vmatpush3.bf16.msra.mxu1 %v817_v7  ;;  %708 = vmatprep.subr.bf16.mxu0 %v818_v8  ;;  %v834_v24 = vld [vmem:[%s1118_s1 + $0x70] sm:$0xff]   ;;  %v838_v28 = vld [vmem:[%s1118_s1 + $0x78] sm:$0xff]   ;;  %v28_v33 = vld [vmem:[%s1117_s0] sm:$0xff] }
   0xa   :  { %730 = vmatprep.subr.bf16.mxu1 %v819_v9  ;;  %v835_v25 = vld [vmem:[%s1118_s1 + $0xf0] sm:$0xff]   ;;  %v839_v30 = vld [vmem:[%s1118_s1 + $0xf8] sm:$0xff]   ;;  %v30_v39 = vcombine.high %v28_v33, %v28_v33  ;;  %v37_v41 = vrot.slane %v28_v33, %v36_v40  ;;  %v843_v45 = vld [vmem:[%s1120_s3] sm:$0xff]  }
   0xb   :  { %v836_v26 = vld [vmem:[%s1118_s1 + $0x30] sm:$0xff]   ;;  %v840_v31 = vld [vmem:[%s1118_s1 + $0x38] sm:$0xff]  }
   0xc   :  { %709 = vmatpush3.bf16.msra.mxu0 %v820_v10  ;;  %v837_v27 = vld [vmem:[%s1118_s1 + $0xb0] sm:$0xff]   ;;  %v841_v32 = vld [vmem:[%s1118_s1 + $0xb8] sm:$0xff]   ;;  %v44_v42 = vrot.slane %v30_v39, %v36_v40  ;;  %v45_v43 = vcombine.high %v37_v41, %v37_v41  ;;  %v51_v46 = vpack.c.bf16 %v37_v41, %v37_v41 }
   0xd   :  { %731 = vmatpush3.bf16.msra.mxu1 %v821_v11  ;;  %710 = vmatprep.subr.bf16.mxu0 %v822_v12 }
   0xe   :  { %732 = vmatprep.subr.bf16.mxu1 %v823_v13  ;;  %v46_v44 = vcombine.high %v44_v42, %v44_v42  ;;  %v53_v47 = vpack.c.bf16 %v44_v42, %v44_v42  ;;  %v52_v48 = vpack.c.bf16 %v45_v43, %v45_v43 }
  0x10   :  { %711 = vmatpush3.bf16.msra.mxu0 %v824_v14  ;;  %v54_v49 = vpack.c.bf16 %v46_v44, %v46_v44 }
  0x11   :  { %733 = vmatpush3.bf16.msra.mxu1 %v825_v15  ;;  %712 = vmatprep.subr.bf16.mxu0 %v826_v16 }
  0x12   :  { %734 = vmatprep.subr.bf16.mxu1 %v827_v17 }
  0x14   :  { %713 = vmatpush3.bf16.msra.mxu0 %v828_v18 }
  0x15   :  { %735 = vmatpush3.bf16.msra.mxu1 %v829_v19  ;;  %714 = vmatprep.subr.bf16.mxu0 %v830_v20 }
  0x16   :  { %736 = vmatprep.subr.bf16.mxu1 %v831_v21 }
  0x18   :  { %715 = vmatpush3.bf16.msra.mxu0 %v832_v22 }
  0x19   :  { %737 = vmatpush3.bf16.msra.mxu1 %v833_v23  ;;  %716 = vmatprep.subr.bf16.mxu0 %v834_v24 }
  0x1a   :  { %738 = vmatprep.subr.bf16.mxu1 %v835_v25 }
  0x1c   :  { %717 = vmatpush3.bf16.msra.mxu0 %v836_v26 }
  0x1d   :  { %739 = vmatpush3.bf16.msra.mxu1 %v837_v27  ;;  %718 = vmatprep.subr.bf16.mxu0 %v838_v28 }
  0x1e   :  { %740 = vmatprep.subr.bf16.mxu1 %v839_v30 }
  0x20   :  { %719 = vmatpush3.bf16.msra.mxu0 %v840_v31 }
  0x21   :  { %741 = vmatpush3.bf16.msra.mxu1 %v841_v32  ;;  %766 = vmatprep.subr.bf16.mxu0 %v888_v37 }
  0x22   :  { %786 = vmatprep.subr.bf16.mxu1 %v888_v37 }
  0x23   :  { %12 = vsyncpa [#allocation3], 0  ;;  %350 = vmatprep.mubr.bf16.mxu0 %v52_v48  ;;  %390 = vmatprep.mubr.bf16.mxu1 %v54_v49  ;;  %v844_v50 = vld [vmem:[%s1120_s3 + $0x8] sm:$0xff]   ;;  %v845_v51 = vld [vmem:[%s1120_s3 + $0x10] sm:$0xff]   ;;  %vm889_vm0 = vmmov 0   ;;  %vm624_vm1 = vcmask 1041408  }
  0x24   :  { %351 = vmatmul.mubr.bf16.vlgmr.msra.gmra.mrb[0].mxu0 %v51_v46  ;;  %391 = vmatmul.mubr.bf16.vlgmr.msra.gmra.mrb[0].mxu1 %v53_v47  ;;  %v846_v52 = vld [vmem:[%s1120_s3 + $0x18] sm:$0xff]   ;;  %v847_v53 = vld [vmem:[%s1120_s3 + $0x20] sm:$0xff]   ;;  %v848_v54 = vld [vmem:[%s1120_s3 + $0x28] sm:$0xff]  }
  0x25   :  { %767 = vmatpush3.bf16.msra.mxu0 %v843_v45  ;;  %v849_v55 = vld [vmem:[%s1120_s3 + $0x30] sm:$0xff]   ;;  %v850_v56 = vld [vmem:[%s1120_s3 + $0x38] sm:$0xff]   ;;  %782 = vmatprep.mubr.msk.bf16.mxu0 %vm889_vm0, %v888_v37  ;;  %v851_v57 = vld [vmem:[%s1122_s5] sm:$0xff]  }
  0x26   :  { %768 = vmatprep.subr.bf16.mxu0 %v888_v37  ;;  %802 = vmatprep.mubr.msk.bf16.mxu1 %vm889_vm0, %v888_v37  ;;  %v852_v58 = vld [vmem:[%s1122_s5 + $0x8] sm:$0xff]   ;;  %v853_v59 = vld [vmem:[%s1122_s5 + $0x10] sm:$0xff]   ;;  %v854_v60 = vld [vmem:[%s1122_s5 + $0x18] sm:$0xff]  }
  0x27   :  { %787 = vmatpush3.bf16.msra.mxu1 %v851_v57  ;;  %v855_v61 = vld [vmem:[%s1122_s5 + $0x20] sm:$0xff]   ;;  %v856_v62 = vld [vmem:[%s1122_s5 + $0x28] sm:$0xff]   ;;  %v857_v14 = vld [vmem:[%s1122_s5 + $0x30] sm:$0xff]  }
  0x28   :  { %788 = vmatprep.subr.bf16.mxu1 %v888_v37  ;;  %v653_v1 = vld [vmem:[%s1119_s2] ss:$0 sm:$0xff]  ;;  %v858_v15 = vld [vmem:[%s1122_s5 + $0x38] sm:$0xff]  }
  0x29   :  { %769 = vmatpush3.bf16.msra.mxu0 %v844_v50  ;;  %v686_v16 = vld [vmem:[%s1121_s4] ss:$0 sm:$0xff]  ;;  %s890_s4 = smov [#allocation2]  }
  0x2a   :  { %770 = vmatprep.subr.bf16.mxu0 %v888_v37  ;;  %v695_v24 = vld [vmem:[%s1123_s6] ss:$0 sm:$0xff]  ;;  %s645_s5 = sshll.u32 %s890_s4, 4  ;;  %s646_s5 = int_to_ptr.vmem [resolvable:$true] %s645_s5 }
  0x2b   :  { %789 = vmatpush3.bf16.msra.mxu1 %v852_v58  ;;  %s863_s6 = scalar_lea.vmem %s646_s5, 32  ;;  %p868_p1 = scmp.lt.s32.totalorder %s646_s5, %s646_s5 }
  0x2c   :  { %790 = vmatprep.subr.bf16.mxu1 %v888_v37  ;;  %p864_p0 = scmp.ne.s32.totalorder %s646_s5, %s863_s6  ;;  %p869_p2 = scmp.lt.s32.totalorder %s863_s6, %s863_s6 }
  0x2d   :  { %771 = vmatpush3.bf16.msra.mxu0 %v845_v51 }
  0x2e   :  { %772 = vmatprep.subr.bf16.mxu0 %v888_v37  ;;  %p870_p3 = por %p869_p2, %p868_p1 }
  0x2f   :  { %791 = vmatpush3.bf16.msra.mxu1 %v853_v59 }
  0x30   :  { %792 = vmatprep.subr.bf16.mxu1 %v888_v37  ;;  %p871_p4 = pnand %p870_p3, %p864_p0 }
  0x31   :  { %773 = vmatpush3.bf16.msra.mxu0 %v846_v52 }
  0x32   :  { %774 = vmatprep.subr.bf16.mxu0 %v888_v37 }
  0x33   :  { %793 = vmatpush3.bf16.msra.mxu1 %v854_v60 }
  0x34   :  { %794 = vmatprep.subr.bf16.mxu1 %v888_v37 }
  0x35   :  { %775 = vmatpush3.bf16.msra.mxu0 %v847_v53 }
  0x36   :  { %776 = vmatprep.subr.bf16.mxu0 %v888_v37 }
  0x37   :  { %795 = vmatpush3.bf16.msra.mxu1 %v855_v61 }
  0x38   :  { %796 = vmatprep.subr.bf16.mxu1 %v888_v37 }
  0x39   :  { %777 = vmatpush3.bf16.msra.mxu0 %v848_v54 }
  0x3a   :  { %778 = vmatprep.subr.bf16.mxu0 %v888_v37 }
  0x3b   :  { %797 = vmatpush3.bf16.msra.mxu1 %v856_v62 }
  0x3c   :  { %798 = vmatprep.subr.bf16.mxu1 %v888_v37 }
  0x3d   :  { %779 = vmatpush3.bf16.msra.mxu0 %v849_v55 }
  0x3e   :  { %780 = vmatprep.subr.bf16.mxu0 %v888_v37 }
  0x3f   :  { %799 = vmatpush3.bf16.msra.mxu1 %v857_v14 }
  0x40   :  { %800 = vmatprep.subr.bf16.mxu1 %v888_v37 }
  0x41   :  { %781 = vmatpush3.bf16.msra.mxu0 %v850_v56 }
  0x43   :  { %801 = vmatpush3.bf16.msra.mxu1 %v858_v15 }
  0xf7   :  { %v720_v63 = vpop.f32.mrb[0].mxu0  ;;  %v742_v0 = vpop.f32.mrb[0].mxu1 }
  0xf8   :  { %v721_v2 = vpop.f32.mrb[1].mxu0  ;;  %v743_v3 = vpop.f32.mrb[1].mxu1 }
  0xf9   :  { %v722_v4 = vadd.f32 %v721_v2, %v720_v63  ;;  %v744_v5 = vadd.f32 %v743_v3, %v742_v0  ;;  %v723_v6 = vpop.f32.mrb[2].mxu0  ;;  %v745_v7 = vpop.f32.mrb[2].mxu1 }
  0xfa   :  { %v724_v8 = vpop.f32.mrb[3].mxu0  ;;  %v746_v9 = vpop.f32.mrb[3].mxu1 }
  0xfb   :  { %v353_v10 = vadd.f32 %v722_v4, %v653_v1 }
  0xfd   :  { %v393_v11 = vadd.f32 %v744_v5, %v353_v10 }
  0xff   :  { %v398_v12 = vmax.f32 %v393_v11, 0.0 }
 0x101   :  { %v399_v13 = vpack.c.bf16 %v398_v12, %v398_v12 }
 0x103   :  { %783 = vmatmul.mubr.bf16.vlgmr.msra.gmra.mrb[4].mxu0 %v399_v13 }
 0x1d6   :  { %v505_v17 = vpop.f32.mrb[4].mxu0 }
 0x1d7   :  { %v506_v18 = vadd.f32 %v686_v16, %v505_v17  ;;  %v784_v19 = vpop.f32.mrb[5].mxu0 }
 0x1d8   :  { %v508_v20 = vpop.f32.mrb[6].mxu0 }
 0x1d9   :  { %v511_v21 = vmax.f32 %v506_v18, 0.0  ;;  %v785_v22 = vpop.f32.mrb[7].mxu0 }
 0x1db   :  { %v512_v23 = vpack.c.bf16 %v511_v21, %v511_v21 }
 0x1dd   :  { %803 = vmatmul.mubr.bf16.vlgmr.msra.gmra.mrb[4].mxu1 %v512_v23 }
 0x2b0   :  { %v618_v25 = vpop.f32.mrb[4].mxu1 }
 0x2b1   :  { %v619_v26 = vadd.f32 %v695_v24, %v618_v25  ;;  %v804_v27 = vpop.f32.mrb[5].mxu1 }
 0x2b2   :  { %v621_v28 = vpop.f32.mrb[6].mxu1 }
 0x2b3   :  { %v805_v29 = vpop.f32.mrb[7].mxu1  ;;  %v625_v30 = vsel %vm624_vm1, %v619_v26, -inf }
 0x2b4   :  { %626 = vmax.xlane.f32.xlu0 %v625_v30 }
 0x341   :  { %v627_v31 = vpop.xlane.xlu0 %626 }
 0x342   :  { %v628_v32 = vsub.f32 %v619_v26, %v627_v31 }
 0x344   :  { %v629_v33 = vmul.f32 1.442695, %v628_v32 }
 0x346   :  { %859 = vpow2.f32 %v629_v33 }
 0x350   :  { %v860_v34 = vpop.eup %859 }
 0x351   :  { %v631_v35 = vsel %vm624_vm1, %v860_v34, 0.0 }
 0x352   :  { %632 = vadd.xlane.f32.xlu0 %v631_v35 }
 0x3df   :  { %v633_v36 = vpop.xlane.xlu0 %632 }
 0x3e0   :  { %861 = vlog2.f32 %v633_v36 }
 0x3ea   :  { %v862_v37 = vpop.eup %861 }
 0x3eb   :  { %v635_v38 = vmul.f32 0.6931472, %v862_v37 }
 0x3ed   :  { %v636_v39 = vadd.f32 %v635_v38, %v627_v31 }
 0x3ef   :  { %v637_v40 = vsub.f32 %v619_v26, %v636_v39 }
 0x3f1   :  { %638 = vst [vmem:[#allocation2] sm:$0x3] %v637_v40 }
 0x3f2   :  { %874 = shalt.err (!%p871_p4)
}
 0x3f3   :  { %s875_s9 = scalar_lea.hbm %s1124_s7, 32 }
 0x3f4   :  { %p876_p5 = scmp.ne.s32.totalorder %s1124_s7, %s875_s9  ;;  %p879_p6 = scmp.lt.u32.totalorder %s875_s9, %s1124_s7 }
 0x3f6   :  { %p881_p7 = pnand %p879_p6, %p876_p5 }
 0x3f8   :  { %884 = shalt.err (!%p881_p7)
}
 0x3f9   :  { %648 = dma.vmem_to_hbm [thread:$0]  %s646_s5, 32, %s1124_s7, [#allocation3]  }
 0x3fa   :  { %885 = dma.done.wait [#allocation3], 32  }
 0x3fb   :  { %886 = vsyncadd [#allocation3], 4294967264 }
 0x3fc   :  { %652 = vsyncpa [#allocation3], 1 }

// kernel: cnn_forward.2
= control target key start
LH: loop header
LB: loop body
LE: loop exit
PB: predicated region body
PF: predicated region fallthrough
CT: control target
= control target key end

     0   :  { %s8051_s24 = smov 0   ;;  %s9494_s0 = inlined_call_operand.vmem [shape: bf16[2,576,75], index: 0, kind: input, shape index: {}]   ;;  %s9495_s1 = inlined_call_operand.vmem [shape: bf16[75,64], index: 1, kind: input, shape index: {}]   ;;  %s9496_s2 = inlined_call_operand.vmem [shape: f32[1,64], index: 2, kind: input, shape index: {}]   ;;  %s9497_s3 = inlined_call_operand.vmem [shape: bf16[25,64,64], index: 3, kind: input, shape index: {}]   ;;  %s9498_s4 = inlined_call_operand.vmem [shape: f32[1,64], index: 4, kind: input, shape index: {}]   ;;  %s9499_s5 = inlined_call_operand.vmem [shape: bf16[9,64,128], index: 5, kind: input, shape index: {}]   ;;  %s9500_s6 = inlined_call_operand.vmem [shape: f32[1,128], index: 6, kind: input, shape index: {}]   ;;  %s9501_s7 = inlined_call_operand.vmem [shape: f32[2,4,128], index: 7, kind: output, shape index: {}]  }
   0x1 LB: > { %s5853_s25 = sadd.s32 4294967295, %s8006_s24   ;;  %p5857_p0 = scmp.ge.s32.totalorder %s8006_s24, 1  ;;  %s8006_s24 = sphi %s8051_s24, %s17_s24  }
   0x2   : > { %p237_p1 = scmp.lt.s32.totalorder %s8006_s24, 3 }
   0x4   : > { %p238_p2 = pnand %p5857_p0, %p237_p1 }
   0x5   : > { %v7786_v0 = vld [vmem:[%s9495_s1] sm:$0xff] (!%p238_p2)   ;;  %v7787_v1 = vld [vmem:[%s9495_s1 + $0x8] sm:$0xff] (!%p238_p2)   ;;  %vm685_vm0 = vcmask (!%p238_p2), 1044480   ;;  %vm686_vm1 = vcmask (!%p238_p2), 1045504   ;;  %v7788_v2 = vld [vmem:[%s9495_s1 + $0x10] sm:$0xff] (!%p238_p2)   ;;  %v8008_v3 = vmov (!%p238_p2), 65535  }
   0x6   : > { %241 = sbr.rel (%p238_p2) target bundleno = 1446 (0x5a6), region = 48  ;;  %6884 = vmatprep.subr.bf16.mxu0 (!%p238_p2), %v7786_v0  ;;  %v687_v4 = vsel (!%p238_p2), %vm685_vm0, 4294967295, %v8008_v3  ;;  %p268_p3 = scmp.lt.s32.totalorder (!%p238_p2), %s5853_s25, 1  ;;  %v7789_v5 = vld [vmem:[%s9495_s1 + $0x18] sm:$0xff] (!%p238_p2)   ;;  %v7790_v6 = vld [vmem:[%s9495_s1 + $0x20] sm:$0x3f] (!%p238_p2)  }
   0x7   : > { %6885 = vmatpush3.bf16.msra.mxu0 (!%p238_p2), %v7786_v0  ;;  %v688_v7 = vsel (!%p238_p2), %vm686_vm1, %v687_v4, 0  ;;  %vm576_vm2 = vcmask (!%p238_p2), 613376   ;;  %v7825_v43 = vld [vmem:[%s9497_s3 + $0x20] sm:$0xff] (!%p238_p2)   ;;  %v7826_v44 = vld [vmem:[%s9497_s3 + $0x28] sm:$0xff] (!%p238_p2)   ;;  %v7827_v45 = vld [vmem:[%s9497_s3 + $0x30] sm:$0xff] (!%p238_p2)   ;;  %vm1013_vm3 = vcmask (!%p238_p2), 523264  }
   0x8   : > { %6886 = vmatprep.subr.bf16.mxu0 (!%p238_p2), %v7787_v1  ;;  %v690_v8 = vand.u32 (!%p238_p2), %v7790_v6, %v688_v7  ;;  %6966 = vmatprep.subr.bf16.mxu1 (!%p238_p2), %v7825_v43  ;;  %v7828_v46 = vld [vmem:[%s9497_s3 + $0x38] sm:$0xff] (!%p238_p2)   ;;  %v8169_v49 = vld [vmem:[%s9497_s3] sm:$0xff] (!%p238_p2)   ;;  %vm1110_vm4 = vcmask (!%p238_p2), 519168   ;;  %vm8010_vm5 = vmmov (!%p238_p2), 0  }
   0x9   : > { %6967 = vmatpush3.bf16.msra.mxu1 (!%p238_p2), %v7825_v43  ;;  %v8175_v50 = vld [vmem:[%s9496_s2] ss:$0 sm:$0xff] (!%p238_p2) }
   0xa   : > { %6968 = vmatprep.subr.bf16.mxu1 (!%p238_p2), %v7826_v44 }
   0xb   : > { %6887 = vmatpush3.bf16.msra.mxu0 (!%p238_p2), %v7787_v1 }
   0xc   : > { %6888 = vmatprep.subr.bf16.mxu0 (!%p238_p2), %v7788_v2 }
   0xd   : > { %s9503_s25 = smov (!%p268_p3, %s5853_s25), 1  ;;  %6969 = vmatpush3.bf16.msra.mxu1 %v7826_v44 }
   0xe   : > { %s7774_s13 = smul.u32 288, %s9503_s25  ;;  %6970 = vmatprep.subr.bf16.mxu1 %v7827_v45  ;;  %s5859_s10 = sshll.u32 %s9503_s25, 2 }
   0xf   : > { %6889 = vmatpush3.bf16.msra.mxu0 %v7788_v2  ;;  %s9486_s15 = scalar_lea.vmem %s9501_s7, %s5859_s10 }
  0x10   : > { %s8080_s16 = scalar_lea.vmem %s9494_s0, %s7774_s13  ;;  %6890 = vmatprep.subr.bf16.mxu0 %v7789_v5 }
  0x11   : > { %v7791_v9 = vld [vmem:[%s8080_s16] sm:$0xff]   ;;  %v7792_v10 = vld [vmem:[%s8080_s16 + $0x8] sm:$0xff]   ;;  %v7793_v11 = vld [vmem:[%s8080_s16 + $0x10] sm:$0xff]   ;;  %6971 = vmatpush3.bf16.msra.mxu1 %v7827_v45 }
  0x12   : > { %6894 = vmatprep.mubr.msk.bf16.mxu0 %vm576_vm2, %v7791_v9  ;;  %v7794_v12 = vld [vmem:[%s8080_s16 + $0x18] sm:$0xff]   ;;  %v7795_v13 = vld [vmem:[%s8080_s16 + $0x20] sm:$0xff]   ;;  %v7796_v14 = vld [vmem:[%s8080_s16 + $0x28] sm:$0xff]   ;;  %6972 = vmatprep.subr.bf16.mxu1 %v7828_v46 }
  0x13   : > { %6891 = vmatpush3.bf16.msra.mxu0 %v7789_v5  ;;  %v7797_v15 = vld [vmem:[%s8080_s16 + $0x30] sm:$0xff]   ;;  %v7798_v16 = vld [vmem:[%s8080_s16 + $0x38] sm:$0xff]   ;;  %v7799_v17 = vld [vmem:[%s8080_s16 + $0x40] sm:$0xff]  }
  0x14   : > { %6892 = vmatprep.subr.bf16.mxu0 %v690_v8  ;;  %v7800_v18 = vld [vmem:[%s8080_s16 + $0x48] sm:$0xff]   ;;  %v7801_v19 = vld [vmem:[%s8080_s16 + $0x50] sm:$0xff]   ;;  %v7802_v20 = vld [vmem:[%s8080_s16 + $0x58] sm:$0xff]  }
  0x15   : > { %v7803_v21 = vld [vmem:[%s8080_s16 + $0x60] sm:$0xff]   ;;  %v7804_v22 = vld [vmem:[%s8080_s16 + $0x68] sm:$0xff]   ;;  %v7805_v23 = vld [vmem:[%s8080_s16 + $0x70] sm:$0xff]   ;;  %6973 = vmatpush3.bf16.msra.mxu1 %v7828_v46 }
  0x16   : > { %v7806_v24 = vld [vmem:[%s8080_s16 + $0x78] sm:$0xff]   ;;  %v7807_v25 = vld [vmem:[%s8080_s16 + $0x80] sm:$0xff]   ;;  %v7808_v26 = vld [vmem:[%s8080_s16 + $0x88] sm:$0xff]   ;;  %6982 = vmatprep.subr.bf16.mxu1 %v8169_v49 }
  0x17   : > { %6893 = vmatpush3.bf16.msra.mxu0 %v690_v8  ;;  %v7809_v27 = vld [vmem:[%s8080_s16 + $0x90] sm:$0xff]   ;;  %v7810_v28 = vld [vmem:[%s8080_s16 + $0x98] sm:$0xff]   ;;  %v7811_v29 = vld [vmem:[%s8080_s16 + $0xa0] sm:$0xff]  }
  0x18   : > { %v7812_v30 = vld [vmem:[%s8080_s16 + $0xa8] sm:$0xff]   ;;  %v7813_v31 = vld [vmem:[%s8080_s16 + $0xb0] sm:$0xff]   ;;  %v7814_v32 = vld [vmem:[%s8080_s16 + $0xb8] sm:$0xff]  }
  0x19   : > { %v7815_v33 = vld [vmem:[%s8080_s16 + $0xc0] sm:$0xff]   ;;  %v7816_v34 = vld [vmem:[%s8080_s16 + $0xc8] sm:$0xff]   ;;  %v7817_v35 = vld [vmem:[%s8080_s16 + $0xd0] sm:$0xff]  }
  0x1a   : > { %6895 = vmatmul.mubr.msk.bf16.vlgmr.msra.gmra.mrb[0].mxu0 %vm576_vm2, %v7792_v10  ;;  %v7818_v36 = vld [vmem:[%s8080_s16 + $0xd8] sm:$0xff]   ;;  %v7819_v37 = vld [vmem:[%s8080_s16 + $0xe0] sm:$0xff]   ;;  %v7820_v38 = vld [vmem:[%s8080_s16 + $0xe8] sm:$0xff]  }
  0x1b   : > { %6898 = vmatprep.mubr.msk.bf16.mxu0 %vm576_vm2, %v7793_v11  ;;  %v7821_v39 = vld [vmem:[%s8080_s16 + $0xf0] sm:$0xff]   ;;  %v7822_v40 = vld [vmem:[%s8080_s16 + $0xf8] sm:$0xff]   ;;  %v7823_v41 = vld [vmem:[%s8080_s16 + $0x100] sm:$0xff]  }
  0x1c   : > { %v7824_v42 = vld [vmem:[%s8080_s16 + $0x108] sm:$0xff]   ;;  %v7829_v47 = vld [vmem:[%s8080_s16 + $0x110] sm:$0xff]   ;;  %v7830_v48 = vld [vmem:[%s8080_s16 + $0x118] sm:$0xff]  }
  0x22   : > { %6899 = vmatmul.mubr.msk.bf16.gmra.mrb[4].mxu0 %vm576_vm2, %v7794_v12 }
  0x23   : > { %6902 = vmatprep.mubr.msk.bf16.mxu0 %vm576_vm2, %v7795_v13 }
  0x2a   : > { %6903 = vmatmul.mubr.msk.bf16.gmra.mrb[8].mxu0 %vm576_vm2, %v7796_v14 }
  0x2b   : > { %6906 = vmatprep.mubr.msk.bf16.mxu0 %vm576_vm2, %v7797_v15 }
  0x32   : > { %6907 = vmatmul.mubr.msk.bf16.gmra.mrb[12].mxu0 %vm576_vm2, %v7798_v16 }
  0x33   : > { %6910 = vmatprep.mubr.msk.bf16.mxu0 %vm576_vm2, %v7799_v17 }
  0x3a   : > { %6911 = vmatmul.mubr.msk.bf16.gmra.mrb[16].mxu0 %vm576_vm2, %v7800_v18 }
  0x3b   : > { %6914 = vmatprep.mubr.msk.bf16.mxu0 %vm576_vm2, %v7801_v19 }
  0x42   : > { %6915 = vmatmul.mubr.msk.bf16.gmra.mrb[20].mxu0 %vm576_vm2, %v7802_v20 }
  0x43   : > { %6918 = vmatprep.mubr.msk.bf16.mxu0 %vm576_vm2, %v7803_v21 }
  0x4a   : > { %6919 = vmatmul.mubr.msk.bf16.gmra.mrb[24].mxu0 %vm576_vm2, %v7804_v22 }
  0x4b   : > { %6922 = vmatprep.mubr.msk.bf16.mxu0 %vm576_vm2, %v7805_v23 }
  0x52   : > { %6923 = vmatmul.mubr.msk.bf16.gmra.mrb[28].mxu0 %vm576_vm2, %v7806_v24 }
  0x53   : > { %6926 = vmatprep.mubr.msk.bf16.mxu0 %vm576_vm2, %v7807_v25 }
  0x5a   : > { %6927 = vmatmul.mubr.msk.bf16.gmra.mrb[32].mxu0 %vm576_vm2, %v7808_v26 }
  0x5b   : > { %6930 = vmatprep.mubr.msk.bf16.mxu0 %vm576_vm2, %v7809_v27 }
  0x62   : > { %6931 = vmatmul.mubr.msk.bf16.gmra.mrb[36].mxu0 %vm576_vm2, %v7810_v28 }
  0x63   : > { %6934 = vmatprep.mubr.msk.bf16.mxu0 %vm576_vm2, %v7811_v29 }
  0x6a   : > { %6935 = vmatmul.mubr.msk.bf16.gmra.mrb[40].mxu0 %vm576_vm2, %v7812_v30 }
  0x6b   : > { %6938 = vmatprep.mubr.msk.bf16.mxu0 %vm576_vm2, %v7813_v31 }
  0x72   : > { %6939 = vmatmul.mubr.msk.bf16.gmra.mrb[44].mxu0 %vm576_vm2, %v7814_v32 }
  0x73   : > { %6942 = vmatprep.mubr.msk.bf16.mxu0 %vm576_vm2, %v7815_v33 }
  0x7a   : > { %6943 = vmatmul.mubr.msk.bf16.gmra.mrb[48].mxu0 %vm576_vm2, %v7816_v34 }
  0x7b   : > { %6946 = vmatprep.mubr.msk.bf16.mxu0 %vm576_vm2, %v7817_v35 }
  0x82   : > { %6947 = vmatmul.mubr.msk.bf16.gmra.mrb[52].mxu0 %vm576_vm2, %v7818_v36 }
  0x83   : > { %6950 = vmatprep.mubr.msk.bf16.mxu0 %vm576_vm2, %v7819_v37 }
  0x8a   : > { %6951 = vmatmul.mubr.msk.bf16.gmra.mrb[56].mxu0 %vm576_vm2, %v7820_v38 }
  0x8b   : > { %6954 = vmatprep.mubr.msk.bf16.mxu0 %vm576_vm2, %v7821_v39 }
  0x92   : > { %6955 = vmatmul.mubr.msk.bf16.gmra.mrb[60].mxu0 %vm576_vm2, %v7822_v40 }
  0x93   : > { %6958 = vmatprep.mubr.msk.bf16.mxu0 %vm576_vm2, %v7823_v41 }
  0x9a   : > { %6959 = vmatmul.mubr.msk.bf16.gmra.mrb[64].mxu0 %vm576_vm2, %v7824_v42 }
  0x9b   : > { %6962 = vmatprep.mubr.msk.bf16.mxu0 %vm576_vm2, %v7829_v47 }
  0xa2   : > { %6963 = vmatmul.mubr.msk.bf16.gmra.mrb[68].mxu0 %vm576_vm2, %v7830_v48 }
  0xed   : > { %v6896_v51 = vpop.f32.mrb[0].mxu0 }
  0xee   : > { %v735_v52 = vadd.f32 %v6896_v51, %v8175_v50  ;;  %v726_v53 = vpop.f32.mrb[1].mxu0 }
  0xef   : > { %v727_v54 = vadd.f32 %v8175_v50, %v726_v53  ;;  %v6897_v55 = vpop.f32.mrb[2].mxu0 }
  0xf0   : > { %1016 = vst.msk [vmem:[#allocation2 + $0x10] sm:$0xff] %vm1013_vm3, %v735_v52  ;;  %v738_v56 = vadd.f32 %v6897_v55, %v8175_v50  ;;  %v729_v57 = vpop.f32.mrb[3].mxu0 }
  0xf1   : > { %1014 = vst.msk [vmem:[#allocation2] sm:$0xff] %vm1013_vm3, %v727_v54  ;;  %v730_v58 = vadd.f32 %v8175_v50, %v729_v57 }
  0xf2   : > { %1017 = vst.msk [vmem:[#allocation2 + $0x18] sm:$0xff] %vm1013_vm3, %v738_v56 }
  0xf3   : > { %1015 = vst.msk [vmem:[#allocation2 + $0x8] sm:$0xff] %vm1013_vm3, %v730_v58 }
  0xf5   : > { %v6900_v59 = vpop.f32.mrb[4].mxu0 }
  0xf6   : > { %v751_v60 = vadd.f32 %v6900_v59, %v8175_v50  ;;  %v742_v61 = vpop.f32.mrb[5].mxu0 }
  0xf7   : > { %v743_v62 = vadd.f32 %v8175_v50, %v742_v61  ;;  %v6901_v63 = vpop.f32.mrb[6].mxu0  ;;  %v1088_v14 = vld [vmem:[#allocation2 + $0x10] ss:$2 sm:$0xf] }
  0xf8   : > { %1020 = vst.msk [vmem:[#allocation2 + $0x30] sm:$0xff] %vm1013_vm3, %v751_v60  ;;  %v754_v0 = vadd.f32 %v6901_v63, %v8175_v50  ;;  %v745_v1 = vpop.f32.mrb[7].mxu0  ;;  %v1092_v15 = vld [vmem:[#allocation2 + $0x11] ss:$2 sm:$0xf] }
  0xf9   : > { %1018 = vst.msk [vmem:[#allocation2 + $0x20] sm:$0xff] %vm1013_vm3, %v743_v62  ;;  %v746_v2 = vadd.f32 %v8175_v50, %v745_v1  ;;  %v1094_v22 = vmax.f32 %v1088_v14, %v1092_v15 }
  0xfa   : > { %1021 = vst.msk [vmem:[#allocation2 + $0x38] sm:$0xff] %vm1013_vm3, %v754_v0  ;;  %v1086_v4 = vld [vmem:[#allocation2] ss:$2 sm:$0xff]  ;;  %v1090_v5 = vld [vmem:[#allocation2 + $0x1] ss:$2 sm:$0xff] }
  0xfb   : > { %1019 = vst.msk [vmem:[#allocation2 + $0x28] sm:$0xff] %vm1013_vm3, %v746_v2  ;;  %v1093_v16 = vmax.f32 %v1086_v4, %v1090_v5 }
  0xfd   : > { %v6904_v3 = vpop.f32.mrb[8].mxu0 }
  0xfe   : > { %v767_v6 = vadd.f32 %v6904_v3, %v8175_v50  ;;  %v758_v7 = vpop.f32.mrb[9].mxu0 }
  0xff   : > { %v759_v8 = vadd.f32 %v8175_v50, %v758_v7  ;;  %v6905_v9 = vpop.f32.mrb[10].mxu0 }
 0x100   : > { %v1096_v10 = vld [vmem:[#allocation2 + $0x18] ss:$2 sm:$0xff]  ;;  %v1100_v11 = vld [vmem:[#allocation2 + $0x19] ss:$2 sm:$0xff]  ;;  %1024 = vst.msk [vmem:[#allocation2 + $0x50] sm:$0xff] %vm1013_vm3, %v767_v6  ;;  %v770_v12 = vadd.f32 %v6905_v9, %v8175_v50  ;;  %v761_v13 = vpop.f32.mrb[11].mxu0 }
 0x101   : > { %v1103_v17 = vmax.f32 %v1096_v10, %v1100_v11  ;;  %1022 = vst.msk [vmem:[#allocation2 + $0x40] sm:$0xff] %vm1013_vm3, %v759_v8  ;;  %v762_v18 = vadd.f32 %v8175_v50, %v761_v13  ;;  %v1113_v29 = vld [vmem:[#allocation2 + $0x30] ss:$2 sm:$0xff]  ;;  %v1117_v30 = vld [vmem:[#allocation2 + $0x31] ss:$2 sm:$0xff] }
 0x102   : > { %1025 = vst.msk [vmem:[#allocation2 + $0x58] sm:$0xff] %vm1013_vm3, %v770_v12  ;;  %v1098_v19 = vld [vmem:[#allocation2 + $0x28] ss:$2 sm:$0xf]  ;;  %v1120_v44 = vmax.f32 %v1113_v29, %v1117_v30 }
 0x103   : > { %v1102_v20 = vld [vmem:[#allocation2 + $0x29] ss:$2 sm:$0xf]  ;;  %1023 = vst.msk [vmem:[#allocation2 + $0x48] sm:$0xff] %vm1013_vm3, %v762_v18  ;;  %v1105_v21 = vmax.f32 %v1093_v16, %v1103_v17 }
 0x104   : > { %v1104_v23 = vmax.f32 %v1098_v19, %v1102_v20 }
 0x105   : > { %v6908_v24 = vpop.f32.mrb[12].mxu0  ;;  %v1107_v25 = vmax.f32 %v1105_v21, 0.0 }
 0x106   : > { %v783_v26 = vadd.f32 %v6908_v24, %v8175_v50  ;;  %v774_v27 = vpop.f32.mrb[13].mxu0  ;;  %v1106_v28 = vmax.f32 %v1094_v22, %v1104_v23 }
 0x107   : > { %v775_v31 = vadd.f32 %v8175_v50, %v774_v27  ;;  %v6909_v32 = vpop.f32.mrb[14].mxu0  ;;  %1109 = vst.msk [vmem:[#allocation3] sm:$0xff] %vm1013_vm3, %v1107_v25 }
 0x108   : > { %v1115_v33 = vld [vmem:[#allocation2 + $0x40] ss:$2 sm:$0xf]  ;;  %v1119_v34 = vld [vmem:[#allocation2 + $0x41] ss:$2 sm:$0xf]  ;;  %v786_v35 = vadd.f32 %v6909_v32, %v8175_v50 }
 0x109   : > { %1028 = vst.msk [vmem:[#allocation2 + $0x70] sm:$0xff] %vm1013_vm3, %v783_v26  ;;  %v1121_v36 = vmax.f32 %v1115_v33, %v1119_v34  ;;  %v1125_v37 = vld [vmem:[#allocation2 + $0x58] ss:$2 sm:$0xf]  ;;  %1026 = vst.msk [vmem:[#allocation2 + $0x60] sm:$0xff] %vm1013_vm3, %v775_v31  ;;  %v777_v42 = vpop.f32.mrb[15].mxu0 }
 0x10a   : > { %v1129_v38 = vld [vmem:[#allocation2 + $0x59] ss:$2 sm:$0xf]  ;;  %v1123_v40 = vld [vmem:[#allocation2 + $0x48] ss:$2 sm:$0xff]  ;;  %1029 = vst.msk [vmem:[#allocation2 + $0x78] sm:$0xff] %vm1013_vm3, %v786_v35  ;;  %v778_v46 = vadd.f32 %v8175_v50, %v777_v42 }
 0x10b   : > { %v1131_v39 = vmax.f32 %v1125_v37, %v1129_v38  ;;  %v1127_v41 = vld [vmem:[#allocation2 + $0x49] ss:$2 sm:$0xff]  ;;  %v1108_v43 = vmax.f32 %v1106_v28, 0.0 }
 0x10c   : > { %v1130_v45 = vmax.f32 %v1123_v40, %v1127_v41  ;;  %1027 = vst.msk [vmem:[#allocation2 + $0x68] sm:$0xff] %vm1013_vm3, %v778_v46 }
 0x10d   : > { %1111 = vst.msk [vmem:[#allocation3 + $0x8] sm:$0xf] %vm1110_vm4, %v1108_v43  ;;  %v1133_v47 = vmax.f32 %v1121_v36, %v1131_v39  ;;  %v6912_v48 = vpop.f32.mrb[16].mxu0 }
 0x10e   : > { %v1132_v51 = vmax.f32 %v1120_v44, %v1130_v45  ;;  %v799_v52 = vadd.f32 %v6912_v48, %v8175_v50  ;;  %v790_v53 = vpop.f32.mrb[17].mxu0 }
 0x10f   : > { %v1135_v54 = vmax.f32 %v1133_v47, 0.0  ;;  %v791_v55 = vadd.f32 %v8175_v50, %v790_v53  ;;  %v6913_v56 = vpop.f32.mrb[18].mxu0 }
 0x110   : > { %1032 = vst.msk [vmem:[#allocation2 + $0x90] sm:$0xff] %vm1013_vm3, %v799_v52  ;;  %v1134_v57 = vmax.f32 %v1132_v51, 0.0  ;;  %v802_v58 = vadd.f32 %v6913_v56, %v8175_v50  ;;  %v793_v59 = vpop.f32.mrb[19].mxu0  ;;  %v1142_v2 = vld [vmem:[#allocation2 + $0x70] ss:$2 sm:$0xf] }
 0x111   : > { %1138 = vst.msk [vmem:[#allocation3 + $0x18] sm:$0xf] %vm1110_vm4, %v1135_v54  ;;  %v794_v60 = vadd.f32 %v8175_v50, %v793_v59  ;;  %v1146_v9 = vld [vmem:[#allocation2 + $0x71] ss:$2 sm:$0xf] }
 0x112   : > { %1030 = vst.msk [vmem:[#allocation2 + $0x80] sm:$0xff] %vm1013_vm3, %v791_v55  ;;  %1137 = vst.msk [vmem:[#allocation3 + $0x10] sm:$0xff] %vm1013_vm3, %v1134_v57  ;;  %v1148_v19 = vmax.f32 %v1142_v2, %v1146_v9 }
 0x113   : > { %1033 = vst.msk [vmem:[#allocation2 + $0x98] sm:$0xff] %vm1013_vm3, %v802_v58  ;;  %1031 = vst.msk [vmem:[#allocation2 + $0x88] sm:$0xff] %vm1013_vm3, %v794_v60  ;;  %v1140_v62 = vld [vmem:[#allocation2 + $0x60] ss:$2 sm:$0xff]  ;;  %v1144_v63 = vld [vmem:[#allocation2 + $0x61] ss:$2 sm:$0xff] }
 0x114   : > { %v1147_v10 = vmax.f32 %v1140_v62, %v1144_v63  ;;  %v1429_v13 = vld [vmem:[#allocation3 + $0x1] sm:$0xff] }
 0x115   : > { %v6916_v61 = vpop.f32.mrb[20].mxu0 }
 0x116   : > { %v815_v0 = vadd.f32 %v6916_v61, %v8175_v50  ;;  %v806_v1 = vpop.f32.mrb[21].mxu0 }
 0x117   : > { %v807_v3 = vadd.f32 %v8175_v50, %v806_v1  ;;  %v6917_v4 = vpop.f32.mrb[22].mxu0 }
 0x118   : > { %1036 = vst.msk [vmem:[#allocation2 + $0xb0] sm:$0xff] %vm1013_vm3, %v815_v0  ;;  %v818_v7 = vadd.f32 %v6917_v4, %v8175_v50  ;;  %v809_v8 = vpop.f32.mrb[23].mxu0 }
 0x119   : > { %v1150_v5 = vld [vmem:[#allocation2 + $0x78] ss:$2 sm:$0xff]  ;;  %v1154_v6 = vld [vmem:[#allocation2 + $0x79] ss:$2 sm:$0xff]  ;;  %1034 = vst.msk [vmem:[#allocation2 + $0xa0] sm:$0xff] %vm1013_vm3, %v807_v3  ;;  %v810_v12 = vadd.f32 %v8175_v50, %v809_v8 }
 0x11a   : > { %v1157_v11 = vmax.f32 %v1150_v5, %v1154_v6  ;;  %v8227_v14 = vld [vmem:[#allocation3 + $0x11] sm:$0xff]  ;;  %1037 = vst.msk [vmem:[#allocation2 + $0xb8] sm:$0xff] %vm1013_vm3, %v818_v7  ;;  %v1152_v17 = vld [vmem:[#allocation2 + $0x88] ss:$2 sm:$0xf] }
 0x11b   : > { %v1437_v15 = vpack.c.bf16 %v8227_v14, %v1429_v13  ;;  %v1156_v18 = vld [vmem:[#allocation2 + $0x89] ss:$2 sm:$0xf]  ;;  %1035 = vst.msk [vmem:[#allocation2 + $0xa8] sm:$0xff] %vm1013_vm3, %v810_v12  ;;  %v1167_v26 = vld [vmem:[#allocation2 + $0x90] ss:$2 sm:$0xff] }
 0x11c   : > { %v1159_v16 = vmax.f32 %v1147_v10, %v1157_v11  ;;  %v1158_v20 = vmax.f32 %v1152_v17, %v1156_v18  ;;  %v1171_v27 = vld [vmem:[#allocation2 + $0x91] ss:$2 sm:$0xff] }
 0x11d   : > { %6974 = vmatprep.mubr.msk.bf16.mxu1 %vm1013_vm3, %v1437_v15  ;;  %v6920_v22 = vpop.f32.mrb[24].mxu0  ;;  %v1174_v42 = vmax.f32 %v1167_v26, %v1171_v27  ;;  %v8247_v57 = vld [vmem:[#allocation3 + $0x12] sm:$0xff] }
 0x11e   : > { %v1161_v21 = vmax.f32 %v1159_v16, 0.0  ;;  %v1160_v23 = vmax.f32 %v1148_v19, %v1158_v20  ;;  %v831_v24 = vadd.f32 %v6920_v22, %v8175_v50  ;;  %v822_v25 = vpop.f32.mrb[25].mxu0  ;;  %v8249_v58 = vld [vmem:[#allocation3 + $0x13] sm:$0xff] }
 0x11f   : > { %v823_v28 = vadd.f32 %v8175_v50, %v822_v25  ;;  %v6921_v29 = vpop.f32.mrb[26].mxu0  ;;  %v8264_v0 = vld [vmem:[#allocation3 + $0x14] sm:$0xff] }
 0x120   : > { %1164 = vst.msk [vmem:[#allocation3 + $0x20] sm:$0xff] %vm1013_vm3, %v1161_v21  ;;  %v1162_v30 = vmax.f32 %v1160_v23, 0.0  ;;  %v1169_v31 = vld [vmem:[#allocation2 + $0xa0] ss:$2 sm:$0xf]  ;;  %1040 = vst.msk [vmem:[#allocation2 + $0xd0] sm:$0xff] %vm1013_vm3, %v831_v24  ;;  %v834_v32 = vadd.f32 %v6921_v29, %v8175_v50 }
 0x121   : > { %v825_v33 = vpop.f32.mrb[27].mxu0  ;;  %v1173_v34 = vld [vmem:[#allocation2 + $0xa1] ss:$2 sm:$0xf]  ;;  %1038 = vst.msk [vmem:[#allocation2 + $0xc0] sm:$0xff] %vm1013_vm3, %v823_v28  ;;  %v7832_v23 = vld [vmem:[%s9497_s3 + $0x8] sm:$0xff]  }
 0x122   : > { %v1179_v35 = vld [vmem:[#allocation2 + $0xb8] ss:$2 sm:$0xf]  ;;  %v826_v36 = vadd.f32 %v8175_v50, %v825_v33  ;;  %v1175_v37 = vmax.f32 %v1169_v31, %v1173_v34  ;;  %v1183_v38 = vld [vmem:[#allocation2 + $0xb9] ss:$2 sm:$0xf] }
 0x123   : > { %v1177_v39 = vld [vmem:[#allocation2 + $0xa8] ss:$2 sm:$0xff]  ;;  %1165 = vst.msk [vmem:[#allocation3 + $0x28] sm:$0xf] %vm1110_vm4, %v1162_v30  ;;  %v1185_v40 = vmax.f32 %v1179_v35, %v1183_v38  ;;  %v1181_v41 = vld [vmem:[#allocation2 + $0xa9] ss:$2 sm:$0xff] }
 0x124   : > { %1041 = vst.msk [vmem:[#allocation2 + $0xd8] sm:$0xff] %vm1013_vm3, %v834_v32  ;;  %1039 = vst.msk [vmem:[#allocation2 + $0xc8] sm:$0xff] %vm1013_vm3, %v826_v36  ;;  %v1184_v43 = vmax.f32 %v1177_v39, %v1181_v41  ;;  %v7833_v35 = vld [vmem:[%s9497_s3 + $0x10] sm:$0xff]  }
 0x125   : > { %v1187_v44 = vmax.f32 %v1175_v37, %v1185_v40  ;;  %v6924_v45 = vpop.f32.mrb[28].mxu0 }
 0x126   : > { %v1186_v46 = vmax.f32 %v1174_v42, %v1184_v43  ;;  %v847_v47 = vadd.f32 %v6924_v45, %v8175_v50  ;;  %v838_v48 = vpop.f32.mrb[29].mxu0 }
 0x127   : > { %v1189_v51 = vmax.f32 %v1187_v44, 0.0  ;;  %v839_v52 = vadd.f32 %v8175_v50, %v838_v48  ;;  %v6925_v53 = vpop.f32.mrb[30].mxu0  ;;  %v1196_v6 = vld [vmem:[#allocation2 + $0xd0] ss:$2 sm:$0xf] }
 0x128   : > { %v1188_v54 = vmax.f32 %v1186_v46, 0.0  ;;  %1044 = vst.msk [vmem:[#allocation2 + $0xf0] sm:$0xff] %vm1013_vm3, %v847_v47  ;;  %v850_v55 = vadd.f32 %v6925_v53, %v8175_v50  ;;  %v841_v56 = vpop.f32.mrb[31].mxu0  ;;  %v1200_v11 = vld [vmem:[#allocation2 + $0xd1] ss:$2 sm:$0xf] }
 0x129   : > { %1192 = vst.msk [vmem:[#allocation3 + $0x38] sm:$0xf] %vm1110_vm4, %v1189_v51  ;;  %v842_v60 = vadd.f32 %v8175_v50, %v841_v56  ;;  %v1202_v27 = vmax.f32 %v1196_v6, %v1200_v11 }
 0x12a   : > { %v8252_v59 = vld [vmem:[#allocation3 + $0x21] sm:$0xff]  ;;  %1042 = vst.msk [vmem:[#allocation2 + $0xe0] sm:$0xff] %vm1013_vm3, %v839_v52  ;;  %1191 = vst.msk [vmem:[#allocation3 + $0x30] sm:$0xff] %vm1013_vm3, %v1188_v54  ;;  %v7834_v52 = vld [vmem:[%s9497_s3 + $0x18] sm:$0xff]  }
 0x12b   : > { %v8256_v61 = vld [vmem:[#allocation3 + $0x22] sm:$0xff]  ;;  %v2166_v63 = vpack.c.bf16 %v8252_v59, %v8227_v14  ;;  %1045 = vst.msk [vmem:[#allocation2 + $0xf8] sm:$0xff] %vm1013_vm3, %v850_v55  ;;  %1043 = vst.msk [vmem:[#allocation2 + $0xe8] sm:$0xff] %vm1013_vm3, %v842_v60 }
 0x12c   : > { %v8258_v62 = vld [vmem:[#allocation3 + $0x23] sm:$0xff]  ;;  %v2289_v2 = vpack.c.bf16 %v8256_v61, %v8247_v57 }
 0x12d   : > { %v8266_v1 = vld [vmem:[#allocation3 + $0x24] sm:$0xff]  ;;  %v2412_v3 = vpack.c.bf16 %v8258_v62, %v8249_v58  ;;  %v6928_v5 = vpop.f32.mrb[32].mxu0 }
 0x12e   : > { %v2535_v4 = vpack.c.bf16 %v8266_v1, %v8264_v0  ;;  %v1194_v7 = vld [vmem:[#allocation2 + $0xc0] ss:$2 sm:$0xff]  ;;  %v1198_v8 = vld [vmem:[#allocation2 + $0xc1] ss:$2 sm:$0xff]  ;;  %v863_v9 = vadd.f32 %v6928_v5, %v8175_v50  ;;  %v854_v10 = vpop.f32.mrb[33].mxu0 }
 0x12f   : > { %v855_v12 = vadd.f32 %v8175_v50, %v854_v10  ;;  %v6929_v13 = vpop.f32.mrb[34].mxu0  ;;  %v1201_v20 = vmax.f32 %v1194_v7, %v1198_v8 }
 0x130   : > { %1048 = vst.msk [vmem:[#allocation2 + $0x110] sm:$0xff] %vm1013_vm3, %v863_v9  ;;  %v866_v17 = vadd.f32 %v6929_v13, %v8175_v50  ;;  %v857_v18 = vpop.f32.mrb[35].mxu0  ;;  %v8315_v9 = vld [vmem:[%s9497_s3 + $0x40] sm:$0xff]  }
 0x131   : > { %v1204_v15 = vld [vmem:[#allocation2 + $0xd8] ss:$2 sm:$0xff]  ;;  %v1208_v16 = vld [vmem:[#allocation2 + $0xd9] ss:$2 sm:$0xff]  ;;  %1046 = vst.msk [vmem:[#allocation2 + $0x100] sm:$0xff] %vm1013_vm3, %v855_v12  ;;  %v858_v22 = vadd.f32 %v8175_v50, %v857_v18 }
 0x132   : > { %v8279_v19 = vld [vmem:[#allocation3 + $0x31] sm:$0xff]  ;;  %v1211_v21 = vmax.f32 %v1204_v15, %v1208_v16  ;;  %v1206_v25 = vld [vmem:[#allocation2 + $0xe8] ss:$2 sm:$0xf]  ;;  %1049 = vst.msk [vmem:[#allocation2 + $0x118] sm:$0xff] %vm1013_vm3, %v866_v17 }
 0x133   : > { %v8288_v24 = vpack.c.bf16 %v8279_v19, %v8252_v59  ;;  %v1210_v26 = vld [vmem:[#allocation2 + $0xe9] ss:$2 sm:$0xf]  ;;  %1047 = vst.msk [vmem:[#allocation2 + $0x108] sm:$0xff] %vm1013_vm3, %v858_v22  ;;  %v1221_v36 = vld [vmem:[#allocation2 + $0xf0] ss:$2 sm:$0xff] }
 0x134   : > { %v1213_v28 = vmax.f32 %v1201_v20, %v1211_v21  ;;  %v1212_v29 = vmax.f32 %v1206_v25, %v1210_v26  ;;  %v1225_v37 = vld [vmem:[#allocation2 + $0xf1] ss:$2 sm:$0xff] }
 0x135   : > { %6975 = vmatmul.mubr.msk.bf16.vlgmr.msra.gmra.mrb[0].mxu1 %vm1013_vm3, %v8288_v24  ;;  %v6932_v32 = vpop.f32.mrb[36].mxu0  ;;  %v1228_v53 = vmax.f32 %v1221_v36, %v1225_v37  ;;  %v8318_v13 = vld [vmem:[#allocation3 + $0x32] sm:$0xff] }
 0x136   : > { %v1215_v30 = vmax.f32 %v1213_v28, 0.0  ;;  %v1214_v31 = vmax.f32 %v1202_v27, %v1212_v29  ;;  %6983 = vmatpush3.bf16.msra.mxu1 %v8169_v49  ;;  %v879_v33 = vadd.f32 %v6932_v32, %v8175_v50  ;;  %v870_v34 = vpop.f32.mrb[37].mxu0  ;;  %v8325_v20 = vld [vmem:[#allocation3 + $0x33] sm:$0xff] }
 0x137   : > { %6984 = vmatprep.subr.bf16.mxu1 %v7832_v23  ;;  %v871_v39 = vadd.f32 %v8175_v50, %v870_v34  ;;  %v6933_v40 = vpop.f32.mrb[38].mxu0  ;;  %v8339_v26 = vld [vmem:[#allocation3 + $0x34] sm:$0xff] }
 0x138   : > { %1218 = vst.msk [vmem:[#allocation3 + $0x40] sm:$0xff] %vm1013_vm3, %v1215_v30  ;;  %v1216_v38 = vmax.f32 %v1214_v31, 0.0  ;;  %v1223_v41 = vld [vmem:[#allocation2 + $0x100] ss:$2 sm:$0xf]  ;;  %1052 = vst.msk [vmem:[#allocation2 + $0x130] sm:$0xff] %vm1013_vm3, %v879_v33  ;;  %v882_v49 = vadd.f32 %v6933_v40, %v8175_v50 }
 0x139   : > { %v1227_v42 = vld [vmem:[#allocation2 + $0x101] ss:$2 sm:$0xf]  ;;  %v1233_v44 = vld [vmem:[#allocation2 + $0x118] ss:$2 sm:$0xf] }
 0x13a   : > { %1219 = vst.msk [vmem:[#allocation3 + $0x48] sm:$0xf] %vm1110_vm4, %v1216_v38  ;;  %v1229_v43 = vmax.f32 %v1223_v41, %v1227_v42  ;;  %v1237_v45 = vld [vmem:[#allocation2 + $0x119] ss:$2 sm:$0xf]  ;;  %6985 = vmatpush3.bf16.msra.mxu1 %v7832_v23  ;;  %v873_v51 = vpop.f32.mrb[39].mxu0 }
 0x13b   : > { %1050 = vst.msk [vmem:[#allocation2 + $0x120] sm:$0xff] %vm1013_vm3, %v871_v39  ;;  %v1239_v46 = vmax.f32 %v1233_v44, %v1237_v45  ;;  %v1231_v47 = vld [vmem:[#allocation2 + $0x108] ss:$2 sm:$0xff]  ;;  %v1235_v48 = vld [vmem:[#allocation2 + $0x109] ss:$2 sm:$0xff]  ;;  %1053 = vst.msk [vmem:[#allocation2 + $0x138] sm:$0xff] %vm1013_vm3, %v882_v49  ;;  %6986 = vmatprep.subr.bf16.mxu1 %v7833_v35  ;;  %v874_v55 = vadd.f32 %v8175_v50, %v873_v51 }
 0x13c   : > { %v1238_v54 = vmax.f32 %v1231_v47, %v1235_v48 }
 0x13d   : > { %v1241_v56 = vmax.f32 %v1229_v43, %v1239_v46  ;;  %1051 = vst.msk [vmem:[#allocation2 + $0x128] sm:$0xff] %vm1013_vm3, %v874_v55  ;;  %v6936_v5 = vpop.f32.mrb[40].mxu0 }
 0x13e   : > { %v1240_v60 = vmax.f32 %v1228_v53, %v1238_v54  ;;  %6987 = vmatpush3.bf16.msra.mxu1 %v7833_v35  ;;  %v895_v7 = vadd.f32 %v6936_v5, %v8175_v50  ;;  %v886_v8 = vpop.f32.mrb[41].mxu0 }
 0x13f   : > { %v1243_v6 = vmax.f32 %v1241_v56, 0.0  ;;  %6988 = vmatprep.subr.bf16.mxu1 %v7834_v52  ;;  %v887_v11 = vadd.f32 %v8175_v50, %v886_v8  ;;  %v6937_v12 = vpop.f32.mrb[42].mxu0  ;;  %v1250_v30 = vld [vmem:[#allocation2 + $0x130] ss:$2 sm:$0xf] }
 0x140   : > { %v1242_v10 = vmax.f32 %v1240_v60, 0.0  ;;  %1056 = vst.msk [vmem:[#allocation2 + $0x150] sm:$0xff] %vm1013_vm3, %v895_v7  ;;  %v898_v15 = vadd.f32 %v6937_v12, %v8175_v50  ;;  %v889_v16 = vpop.f32.mrb[43].mxu0  ;;  %v1254_v35 = vld [vmem:[#allocation2 + $0x131] ss:$2 sm:$0xf] }
 0x141   : > { %1246 = vst.msk [vmem:[#allocation3 + $0x58] sm:$0xf] %vm1110_vm4, %v1243_v6  ;;  %v1433_v17 = vld [vmem:[#allocation3 + $0x41] sm:$0xff]  ;;  %v890_v21 = vadd.f32 %v8175_v50, %v889_v16  ;;  %v1256_v48 = vmax.f32 %v1250_v30, %v1254_v35 }
 0x142   : > { %v8323_v18 = vld [vmem:[#allocation3 + $0x42] sm:$0xff]  ;;  %1245 = vst.msk [vmem:[#allocation3 + $0x50] sm:$0xff] %vm1013_vm3, %v1242_v10  ;;  %1054 = vst.msk [vmem:[#allocation2 + $0x140] sm:$0xff] %vm1013_vm3, %v887_v11  ;;  %v8331_v22 = vpack.c.bf16 %v1433_v17, %v8279_v19  ;;  %6989 = vmatpush3.bf16.msra.mxu1 %v7834_v52 }
 0x143   : > { %v8335_v23 = vpack.c.bf16 %v8323_v18, %v8318_v13  ;;  %v8337_v25 = vld [vmem:[#allocation3 + $0x43] sm:$0xff]  ;;  %1057 = vst.msk [vmem:[#allocation2 + $0x158] sm:$0xff] %vm1013_vm3, %v898_v15  ;;  %6998 = vmatprep.subr.bf16.mxu1 %v8315_v9  ;;  %1055 = vst.msk [vmem:[#allocation2 + $0x148] sm:$0xff] %vm1013_vm3, %v890_v21 }
 0x144   : > { %v8341_v27 = vld [vmem:[#allocation3 + $0x44] sm:$0xff]  ;;  %v8347_v28 = vpack.c.bf16 %v8337_v25, %v8325_v20 }
 0x145   : > { %v8351_v19 = vpack.c.bf16 %v8341_v27, %v8339_v26  ;;  %v6940_v29 = vpop.f32.mrb[44].mxu0  ;;  %v1248_v31 = vld [vmem:[#allocation2 + $0x120] ss:$2 sm:$0xff]  ;;  %v1252_v32 = vld [vmem:[#allocation2 + $0x121] ss:$2 sm:$0xff] }
 0x146   : > { %v911_v33 = vadd.f32 %v6940_v29, %v8175_v50  ;;  %v902_v34 = vpop.f32.mrb[45].mxu0  ;;  %v1255_v49 = vmax.f32 %v1248_v31, %v1252_v32 }
 0x147   : > { %v903_v36 = vadd.f32 %v8175_v50, %v902_v34  ;;  %v6941_v37 = vpop.f32.mrb[46].mxu0 }
 0x148   : > { %1060 = vst.msk [vmem:[#allocation2 + $0x170] sm:$0xff] %vm1013_vm3, %v911_v33  ;;  %v914_v40 = vadd.f32 %v6941_v37, %v8175_v50  ;;  %v905_v41 = vpop.f32.mrb[47].mxu0 }
 0x149   : > { %v1258_v38 = vld [vmem:[#allocation2 + $0x138] ss:$2 sm:$0xff]  ;;  %v1262_v39 = vld [vmem:[#allocation2 + $0x139] ss:$2 sm:$0xff]  ;;  %1058 = vst.msk [vmem:[#allocation2 + $0x160] sm:$0xff] %vm1013_vm3, %v903_v36  ;;  %v906_v44 = vadd.f32 %v8175_v50, %v905_v41 }
 0x14a   : > { %v8358_v42 = vld [vmem:[#allocation3 + $0x51] sm:$0xff]  ;;  %v1265_v43 = vmax.f32 %v1258_v38, %v1262_v39  ;;  %v1260_v46 = vld [vmem:[#allocation2 + $0x148] ss:$2 sm:$0xf]  ;;  %1061 = vst.msk [vmem:[#allocation2 + $0x178] sm:$0xff] %vm1013_vm3, %v914_v40 }
 0x14b   : > { %v8363_v45 = vpack.c.bf16 %v8358_v42, %v1433_v17  ;;  %v1264_v47 = vld [vmem:[#allocation2 + $0x149] ss:$2 sm:$0xf]  ;;  %1059 = vst.msk [vmem:[#allocation2 + $0x168] sm:$0xff] %vm1013_vm3, %v906_v44  ;;  %v1275_v5 = vld [vmem:[#allocation2 + $0x150] ss:$2 sm:$0xff] }
 0x14c   : > { %v1267_v51 = vmax.f32 %v1255_v49, %v1265_v43  ;;  %v1266_v52 = vmax.f32 %v1260_v46, %v1264_v47  ;;  %v1279_v6 = vld [vmem:[#allocation2 + $0x151] ss:$2 sm:$0xff] }
 0x14d   : > { %6978 = vmatprep.mubr.msk.bf16.mxu1 %vm1013_vm3, %v8363_v45  ;;  %v6944_v55 = vpop.f32.mrb[48].mxu0  ;;  %v1282_v33 = vmax.f32 %v1275_v5, %v1279_v6  ;;  %v8381_v46 = vld [vmem:[#allocation3 + $0x52] sm:$0xff] }
 0x14e   : > { %v1269_v53 = vmax.f32 %v1267_v51, 0.0  ;;  %v1268_v54 = vmax.f32 %v1256_v48, %v1266_v52  ;;  %v927_v56 = vadd.f32 %v6944_v55, %v8175_v50  ;;  %v918_v60 = vpop.f32.mrb[49].mxu0 }
 0x14f   : > { %v919_v8 = vadd.f32 %v8175_v50, %v918_v60  ;;  %v6945_v10 = vpop.f32.mrb[50].mxu0 }
 0x150   : > { %1272 = vst.msk [vmem:[#allocation3 + $0x60] sm:$0xff] %vm1013_vm3, %v1269_v53  ;;  %v1270_v7 = vmax.f32 %v1268_v54, 0.0  ;;  %v1277_v11 = vld [vmem:[#allocation2 + $0x160] ss:$2 sm:$0xf]  ;;  %1064 = vst.msk [vmem:[#allocation2 + $0x190] sm:$0xff] %vm1013_vm3, %v927_v56  ;;  %v930_v15 = vadd.f32 %v6945_v10, %v8175_v50 }
 0x151   : > { %v1281_v12 = vld [vmem:[#allocation2 + $0x161] ss:$2 sm:$0xf]  ;;  %v1287_v17 = vld [vmem:[#allocation2 + $0x178] ss:$2 sm:$0xf] }
 0x152   : > { %1273 = vst.msk [vmem:[#allocation3 + $0x68] sm:$0xf] %vm1110_vm4, %v1270_v7  ;;  %v1283_v16 = vmax.f32 %v1277_v11, %v1281_v12  ;;  %v1291_v21 = vld [vmem:[#allocation2 + $0x179] ss:$2 sm:$0xf]  ;;  %v921_v32 = vpop.f32.mrb[51].mxu0 }
 0x153   : > { %1062 = vst.msk [vmem:[#allocation2 + $0x180] sm:$0xff] %vm1013_vm3, %v919_v8  ;;  %v1293_v29 = vmax.f32 %v1287_v17, %v1291_v21  ;;  %v1285_v30 = vld [vmem:[#allocation2 + $0x168] ss:$2 sm:$0xff]  ;;  %v1289_v31 = vld [vmem:[#allocation2 + $0x169] ss:$2 sm:$0xff]  ;;  %1065 = vst.msk [vmem:[#allocation2 + $0x198] sm:$0xff] %vm1013_vm3, %v930_v15  ;;  %v922_v35 = vadd.f32 %v8175_v50, %v921_v32 }
 0x154   : > { %v1292_v34 = vmax.f32 %v1285_v30, %v1289_v31  ;;  %v8388_v53 = vld [vmem:[#allocation3 + $0x53] sm:$0xff] }
 0x155   : > { %v1295_v36 = vmax.f32 %v1283_v16, %v1293_v29  ;;  %1063 = vst.msk [vmem:[#allocation2 + $0x188] sm:$0xff] %vm1013_vm3, %v922_v35  ;;  %v6948_v38 = vpop.f32.mrb[52].mxu0  ;;  %v8395_v56 = vld [vmem:[#allocation3 + $0x54] sm:$0xff] }
 0x156   : > { %v1294_v37 = vmax.f32 %v1282_v33, %v1292_v34  ;;  %v943_v40 = vadd.f32 %v6948_v38, %v8175_v50  ;;  %v934_v41 = vpop.f32.mrb[53].mxu0  ;;  %v8417_v29 = vld [vmem:[#allocation3 + $0x10] sm:$0xff] }
 0x157   : > { %v1297_v39 = vmax.f32 %v1295_v36, 0.0  ;;  %v935_v43 = vadd.f32 %v8175_v50, %v934_v41  ;;  %v6949_v44 = vpop.f32.mrb[54].mxu0  ;;  %v1308_v15 = vld [vmem:[#allocation2 + $0x191] ss:$2 sm:$0xf] }
 0x158   : > { %v1296_v49 = vmax.f32 %v1294_v37, 0.0  ;;  %1068 = vst.msk [vmem:[#allocation2 + $0x1b0] sm:$0xff] %vm1013_vm3, %v943_v40  ;;  %v946_v47 = vadd.f32 %v6949_v44, %v8175_v50  ;;  %v937_v48 = vpop.f32.mrb[55].mxu0  ;;  %v1409_v40 = vld [vmem:[#allocation3] sm:$0xff] }
 0x159   : > { %1300 = vst.msk [vmem:[#allocation3 + $0x78] sm:$0xf] %vm1110_vm4, %v1297_v39  ;;  %v1435_v51 = vld [vmem:[#allocation3 + $0x61] sm:$0xff]  ;;  %v938_v54 = vadd.f32 %v8175_v50, %v937_v48  ;;  %v1417_v44 = vpack.c.bf16 %v8417_v29, %v1409_v40 }
 0x15a   : > { %v8386_v52 = vld [vmem:[#allocation3 + $0x62] sm:$0xff]  ;;  %1299 = vst.msk [vmem:[#allocation3 + $0x70] sm:$0xff] %vm1013_vm3, %v1296_v49  ;;  %1066 = vst.msk [vmem:[#allocation2 + $0x1a0] sm:$0xff] %vm1013_vm3, %v935_v43  ;;  %v8400_v5 = vpack.c.bf16 %v1435_v51, %v8358_v42  ;;  %v1304_v42 = vld [vmem:[#allocation2 + $0x190] ss:$2 sm:$0xf] }
 0x15b   : > { %v8393_v55 = vld [vmem:[#allocation3 + $0x63] sm:$0xff]  ;;  %v8404_v6 = vpack.c.bf16 %v8386_v52, %v8381_v46  ;;  %1069 = vst.msk [vmem:[#allocation2 + $0x1b8] sm:$0xff] %vm1013_vm3, %v946_v47  ;;  %1067 = vst.msk [vmem:[#allocation2 + $0x1a8] sm:$0xff] %vm1013_vm3, %v938_v54  ;;  %v1310_v37 = vmax.f32 %v1304_v42, %v1308_v15 }
 0x15c   : > { %v8397_v60 = vld [vmem:[#allocation3 + $0x64] sm:$0xff]  ;;  %v8409_v7 = vpack.c.bf16 %v8393_v55, %v8388_v53 }
 0x15d   : > { %v8413_v8 = vpack.c.bf16 %v8397_v60, %v8395_v56  ;;  %v1302_v10 = vld [vmem:[#allocation2 + $0x180] ss:$2 sm:$0xff]  ;;  %v1306_v11 = vld [vmem:[#allocation2 + $0x181] ss:$2 sm:$0xff]  ;;  %v6952_v12 = vpop.f32.mrb[56].mxu0 }
 0x15e   : > { %v959_v16 = vadd.f32 %v6952_v12, %v8175_v50  ;;  %v950_v17 = vpop.f32.mrb[57].mxu0  ;;  %v1309_v21 = vmax.f32 %v1302_v10, %v1306_v11  ;;  %v8435_v12 = vld [vmem:[#allocation3 + $0x30] sm:$0xff] }
 0x15f   : > { %v951_v30 = vadd.f32 %v8175_v50, %v950_v17  ;;  %v6953_v31 = vpop.f32.mrb[58].mxu0 }
 0x160   : > { %1072 = vst.msk [vmem:[#allocation2 + $0x1d0] sm:$0xff] %vm1013_vm3, %v959_v16  ;;  %v962_v35 = vadd.f32 %v6953_v31, %v8175_v50  ;;  %v953_v36 = vpop.f32.mrb[59].mxu0  ;;  %v8443_v31 = vld [vmem:[#allocation3 + $0x50] sm:$0xff] }
 0x161   : > { %v1312_v32 = vld [vmem:[#allocation2 + $0x198] ss:$2 sm:$0xff]  ;;  %v1316_v33 = vld [vmem:[#allocation2 + $0x199] ss:$2 sm:$0xff]  ;;  %1070 = vst.msk [vmem:[#allocation2 + $0x1c0] sm:$0xff] %vm1013_vm3, %v951_v30  ;;  %v954_v41 = vadd.f32 %v8175_v50, %v953_v36 }
 0x162   : > { %v8420_v34 = vld [vmem:[#allocation3 + $0x71] sm:$0xff]  ;;  %v1319_v38 = vmax.f32 %v1312_v32, %v1316_v33  ;;  %v1314_v49 = vld [vmem:[#allocation2 + $0x1a8] ss:$2 sm:$0xf]  ;;  %1073 = vst.msk [vmem:[#allocation2 + $0x1d8] sm:$0xff] %vm1013_vm3, %v962_v35  ;;  %v8441_v30 = vld [vmem:[#allocation3 + $0x40] sm:$0xff] }
 0x163   : > { %v8425_v39 = vpack.c.bf16 %v8420_v34, %v1435_v51  ;;  %v1318_v43 = vld [vmem:[#allocation2 + $0x1a9] ss:$2 sm:$0xf]  ;;  %1071 = vst.msk [vmem:[#allocation2 + $0x1c8] sm:$0xff] %vm1013_vm3, %v954_v41  ;;  %v1329_v11 = vld [vmem:[#allocation2 + $0x1b0] ss:$2 sm:$0xff] }
 0x164   : > { %v1321_v47 = vmax.f32 %v1309_v21, %v1319_v38  ;;  %v1320_v48 = vmax.f32 %v1314_v49, %v1318_v43  ;;  %v1333_v42 = vld [vmem:[#allocation2 + $0x1b1] ss:$2 sm:$0xff]  ;;  %v8439_v21 = vld [vmem:[#allocation3 + $0x20] sm:$0xff]  ;;  %v7836_v32 = vld [vmem:[%s9497_s3 + $0x48] sm:$0xff]  }
 0x165   : > { %6979 = vmatmul.mubr.msk.bf16.gmra.mrb[4].mxu1 %vm1013_vm3, %v8425_v39  ;;  %v6956_v10 = vpop.f32.mrb[60].mxu0  ;;  %v1336_v40 = vmax.f32 %v1329_v11, %v1333_v42  ;;  %v8454_v41 = vpack.c.bf16 %v8435_v12, %v8439_v21 }
 0x166   : > { %6990 = vmatprep.mubr.msk.bf16.mxu1 %vm1013_vm3, %v1417_v44  ;;  %v1323_v51 = vmax.f32 %v1321_v47, 0.0  ;;  %v1322_v54 = vmax.f32 %v1310_v37, %v1320_v48  ;;  %v975_v15 = vadd.f32 %v6956_v10, %v8175_v50  ;;  %v966_v16 = vpop.f32.mrb[61].mxu0  ;;  %v8459_v47 = vpack.c.bf16 %v8443_v31, %v8441_v30 }
 0x167   : > { %v967_v33 = vadd.f32 %v8175_v50, %v966_v16  ;;  %v6957_v35 = vpop.f32.mrb[62].mxu0  ;;  %v7837_v16 = vld [vmem:[%s9497_s3 + $0x50] sm:$0xff]  }
 0x168   : > { %1326 = vst.msk [vmem:[#allocation3 + $0x80] sm:$0xff] %vm1013_vm3, %v1323_v51  ;;  %v1324_v17 = vmax.f32 %v1322_v54, 0.0  ;;  %v1331_v36 = vld [vmem:[#allocation2 + $0x1c0] ss:$2 sm:$0xf]  ;;  %1076 = vst.msk [vmem:[#allocation2 + $0x1f0] sm:$0xff] %vm1013_vm3, %v975_v15  ;;  %v978_v38 = vadd.f32 %v6957_v35, %v8175_v50 }
 0x169   : > { %v1335_v37 = vld [vmem:[#allocation2 + $0x1c1] ss:$2 sm:$0xf]  ;;  %v1341_v43 = vld [vmem:[#allocation2 + $0x1d8] ss:$2 sm:$0xf] }
 0x16a   : > { %1327 = vst.msk [vmem:[#allocation3 + $0x88] sm:$0xf] %vm1110_vm4, %v1324_v17  ;;  %v1337_v49 = vmax.f32 %v1331_v36, %v1335_v37  ;;  %v1345_v44 = vld [vmem:[#allocation2 + $0x1d9] ss:$2 sm:$0xf]  ;;  %v969_v10 = vpop.f32.mrb[63].mxu0 }
 0x16b   : > { %1074 = vst.msk [vmem:[#allocation2 + $0x1e0] sm:$0xff] %vm1013_vm3, %v967_v33  ;;  %v1347_v48 = vmax.f32 %v1341_v43, %v1345_v44  ;;  %v1339_v51 = vld [vmem:[#allocation2 + $0x1c8] ss:$2 sm:$0xff]  ;;  %v1343_v54 = vld [vmem:[#allocation2 + $0x1c9] ss:$2 sm:$0xff]  ;;  %1077 = vst.msk [vmem:[#allocation2 + $0x1f8] sm:$0xff] %vm1013_vm3, %v978_v38  ;;  %v970_v42 = vadd.f32 %v8175_v50, %v969_v10 }
 0x16c   : > { %v1346_v11 = vmax.f32 %v1339_v51, %v1343_v54  ;;  %v8472_v35 = vld [vmem:[#allocation3 + $0x70] sm:$0xff]  ;;  %v1652_v54 = vld [vmem:[#allocation3 + $0x2] sm:$0xff]  ;;  %v7838_v10 = vld [vmem:[%s9497_s3 + $0x58] sm:$0xff]  }
 0x16d   : > { %6991 = vmatmul.mubr.msk.bf16.vlgmr.msra.gmra.mrb[0].mxu1 %vm1013_vm3, %v8454_v41  ;;  %v1349_v15 = vmax.f32 %v1337_v49, %v1347_v48  ;;  %1075 = vst.msk [vmem:[#allocation2 + $0x1e8] sm:$0xff] %vm1013_vm3, %v970_v42  ;;  %v6960_v33 = vpop.f32.mrb[64].mxu0  ;;  %v8476_v49 = vld [vmem:[#allocation3 + $0x60] sm:$0xff] }
 0x16e   : > { %6999 = vmatpush3.bf16.msra.mxu1 %v8315_v9  ;;  %6994 = vmatprep.mubr.msk.bf16.mxu1 %vm1013_vm3, %v8459_v47  ;;  %v1348_v17 = vmax.f32 %v1336_v40, %v1346_v11  ;;  %v991_v37 = vadd.f32 %v6960_v33, %v8175_v50  ;;  %v982_v38 = vpop.f32.mrb[65].mxu0  ;;  %v8483_v51 = vpack.c.bf16 %v8472_v35, %v8476_v49 }
 0x16f   : > { %7000 = vmatprep.subr.bf16.mxu1 %v7836_v32  ;;  %v1351_v36 = vmax.f32 %v1349_v15, 0.0  ;;  %v983_v43 = vadd.f32 %v8175_v50, %v982_v38  ;;  %v6961_v44 = vpop.f32.mrb[66].mxu0  ;;  %v1660_v11 = vpack.c.bf16 %v8247_v57, %v1652_v54  ;;  %v1362_v33 = vld [vmem:[#allocation2 + $0x1f1] ss:$2 sm:$0xf] }
 0x170   : > { %v1350_v9 = vmax.f32 %v1348_v17, 0.0  ;;  %1080 = vst.msk [vmem:[#allocation2 + $0x210] sm:$0xff] %vm1013_vm3, %v991_v37  ;;  %v994_v40 = vadd.f32 %v6961_v44, %v8175_v50  ;;  %v985_v48 = vpop.f32.mrb[67].mxu0  ;;  %v7839_v17 = vld [vmem:[%s9497_s3 + $0x60] sm:$0xff]   ;;  %v7861_v57 = vld [vmem:[%s9497_s3 + $0x110] sm:$0xff]  }
 0x171   : > { %1354 = vst.msk [vmem:[#allocation3 + $0x98] sm:$0xf] %vm1110_vm4, %v1351_v36 }
 0x172   : > { %7001 = vmatpush3.bf16.msra.mxu1 %v7836_v32  ;;  %1353 = vst.msk [vmem:[#allocation3 + $0x90] sm:$0xff] %vm1013_vm3, %v1350_v9  ;;  %1078 = vst.msk [vmem:[#allocation2 + $0x200] sm:$0xff] %vm1013_vm3, %v983_v43  ;;  %v986_v32 = vadd.f32 %v8175_v50, %v985_v48  ;;  %v1358_v50 = vld [vmem:[#allocation2 + $0x1f0] ss:$2 sm:$0xf]  ;;  %v8502_v9 = vpack.c.bf16 %v8318_v13, %v8256_v61  ;;  %v8688_v61 = vld [vmem:[#allocation3 + $0x82] sm:$0xff] }
 0x173   : > { %7002 = vmatprep.subr.bf16.mxu1 %v7837_v16  ;;  %1081 = vst.msk [vmem:[#allocation2 + $0x218] sm:$0xff] %vm1013_vm3, %v994_v40  ;;  %v1364_v43 = vmax.f32 %v1358_v50, %v1362_v33  ;;  %v8509_v40 = vpack.c.bf16 %v8381_v46, %v8323_v18  ;;  %v7841_v13 = vld [vmem:[%s9497_s3 + $0x70] sm:$0xff]   ;;  %v7842_v50 = vld [vmem:[%s9497_s3 + $0x78] sm:$0xff]  }
 0x174   : > { %1079 = vst.msk [vmem:[#allocation2 + $0x208] sm:$0xff] %vm1013_vm3, %v986_v32  ;;  %v1356_v42 = vld [vmem:[#allocation2 + $0x1e0] ss:$2 sm:$0xff]  ;;  %v1360_v15 = vld [vmem:[#allocation2 + $0x1e1] ss:$2 sm:$0xff]  ;;  %v8518_v18 = vld [vmem:[#allocation3 + $0x72] sm:$0xff] }
 0x175   : > { %6995 = vmatmul.mubr.msk.bf16.gmra.mrb[4].mxu1 %vm1013_vm3, %v8483_v51  ;;  %v1363_v36 = vmax.f32 %v1356_v42, %v1360_v15  ;;  %v8523_v15 = vpack.c.bf16 %v8518_v18, %v8386_v52  ;;  %v7843_v52 = vld [vmem:[%s9497_s3 + $0x80] sm:$0xff]  }
 0x176   : > { %7003 = vmatpush3.bf16.msra.mxu1 %v7837_v16  ;;  %7006 = vmatprep.mubr.msk.bf16.mxu1 %vm1013_vm3, %v1660_v11  ;;  %v7840_v16 = vld [vmem:[%s9497_s3 + $0x68] sm:$0xff]  }
 0x177   : > { %7004 = vmatprep.subr.bf16.mxu1 %v7838_v10 }
 0x179   : > { %v1366_v37 = vld [vmem:[#allocation2 + $0x1f8] ss:$2 sm:$0xff]  ;;  %v1370_v38 = vld [vmem:[#allocation2 + $0x1f9] ss:$2 sm:$0xff] }
 0x17a   : > { %7005 = vmatpush3.bf16.msra.mxu1 %v7838_v10  ;;  %v1373_v44 = vmax.f32 %v1366_v37, %v1370_v38  ;;  %v7844_v37 = vld [vmem:[%s9497_s3 + $0x88] sm:$0xff]   ;;  %v8545_v38 = vpack.c.bf16 %v8388_v53, %v8337_v25 }
 0x17b   : > { %7014 = vmatprep.subr.bf16.mxu1 %v7839_v17  ;;  %v1368_v48 = vld [vmem:[#allocation2 + $0x208] ss:$2 sm:$0xf]  ;;  %v1372_v54 = vld [vmem:[#allocation2 + $0x209] ss:$2 sm:$0xf] }
 0x17c   : > { %v1375_v10 = vmax.f32 %v1363_v36, %v1373_v44  ;;  %v1374_v32 = vmax.f32 %v1368_v48, %v1372_v54  ;;  %v8538_v36 = vpack.c.bf16 %v8325_v20, %v8258_v62  ;;  %v7845_v20 = vld [vmem:[%s9497_s3 + $0x90] sm:$0xff]   ;;  %v1912_v53 = vld [vmem:[#allocation3 + $0x4] sm:$0xff] }
 0x17d   : > { %7007 = vmatmul.mubr.msk.bf16.vlgmr.msra.gmra.mrb[0].mxu1 %vm1013_vm3, %v8502_v9  ;;  %v1920_v44 = vpack.c.bf16 %v8264_v0, %v1912_v53  ;;  %v7847_v48 = vld [vmem:[%s9497_s3 + $0xa0] sm:$0xff]   ;;  %v7848_v54 = vld [vmem:[%s9497_s3 + $0xa8] sm:$0xff]   ;;  %v7869_v0 = vld [vmem:[%s9497_s3 + $0x150] sm:$0xff]  }
 0x17e   : > { %7015 = vmatpush3.bf16.msra.mxu1 %v7839_v17  ;;  %7010 = vmatprep.mubr.msk.bf16.mxu1 %vm1013_vm3, %v8509_v40  ;;  %v1377_v11 = vmax.f32 %v1375_v10, 0.0  ;;  %v1376_v42 = vmax.f32 %v1364_v43, %v1374_v32  ;;  %v1782_v17 = vld [vmem:[#allocation3 + $0x3] sm:$0xff]  ;;  %v7846_v43 = vld [vmem:[%s9497_s3 + $0x98] sm:$0xff]   ;;  %v8579_v10 = vpack.c.bf16 %v8395_v56, %v8341_v27 }
 0x17f   : > { %7016 = vmatprep.subr.bf16.mxu1 %v7840_v16  ;;  %v1790_v33 = vpack.c.bf16 %v8249_v58, %v1782_v17  ;;  %v8588_v32 = vld [vmem:[#allocation3 + $0x74] sm:$0xff]  ;;  %v8716_v62 = vld [vmem:[#allocation3 + $0x83] sm:$0xff] }
 0x180   : > { %1380 = vst.msk [vmem:[#allocation3 + $0xa0] sm:$0xff] %vm1013_vm3, %v1377_v11  ;;  %v1378_v46 = vmax.f32 %v1376_v42, 0.0  ;;  %v8592_v27 = vpack.c.bf16 %v8588_v32, %v8397_v60  ;;  %v7850_v56 = vld [vmem:[%s9497_s3 + $0xb8] sm:$0xff]   ;;  %v7851_v11 = vld [vmem:[%s9497_s3 + $0xc0] sm:$0xff]   ;;  %v8607_v60 = vpack.c.bf16 %v8441_v30, %v8435_v12  ;;  %v7853_v12 = vld [vmem:[%s9497_s3 + $0xd0] sm:$0xff]   ;;  %v6964_v42 = vpop.f32.mrb[68].mxu0 }
 0x181   : > { %v8623_v30 = vld [vmem:[#allocation3 + $0x80] sm:$0xff]  ;;  %v7865_v58 = vld [vmem:[%s9497_s3 + $0x130] sm:$0xff]  }
 0x182   : > { %7017 = vmatpush3.bf16.msra.mxu1 %v7840_v16  ;;  %1381 = vst.msk [vmem:[#allocation3 + $0xa8] sm:$0xf] %vm1110_vm4, %v1378_v46  ;;  %v8554_v16 = vld [vmem:[#allocation3 + $0x73] sm:$0xff]  ;;  %v998_v46 = vpop.f32.mrb[69].mxu0  ;;  %v8630_v17 = vpack.c.bf16 %v8623_v30, %v8472_v35  ;;  %v7855_v35 = vld [vmem:[%s9497_s3 + $0xe0] sm:$0xff]  }
 0x183   : > { %7018 = vmatprep.subr.bf16.mxu1 %v7841_v13  ;;  %v8558_v25 = vpack.c.bf16 %v8554_v16, %v8393_v55  ;;  %v8572_v55 = vpack.c.bf16 %v8339_v26, %v8266_v1  ;;  %v7849_v26 = vld [vmem:[%s9497_s3 + $0xb0] sm:$0xff]   ;;  %v8744_v1 = vld [vmem:[#allocation3 + $0x84] sm:$0xff] }
 0x185   : > { %7011 = vmatmul.mubr.msk.bf16.gmra.mrb[4].mxu1 %vm1013_vm3, %v8523_v15 }
 0x186   : > { %7019 = vmatpush3.bf16.msra.mxu1 %v7841_v13  ;;  %7022 = vmatprep.mubr.msk.bf16.mxu1 %vm1013_vm3, %v1790_v33  ;;  %v2043_v13 = vpack.c.bf16 %v8439_v21, %v8417_v29  ;;  %v7852_v29 = vld [vmem:[%s9497_s3 + $0xc8] sm:$0xff]   ;;  %v8614_v21 = vpack.c.bf16 %v8476_v49, %v8443_v31  ;;  %v7999_v31 = vld [vmem:[%s9496_s2] ss:$0 sm:$0xff] }
 0x187   : > { %7020 = vmatprep.subr.bf16.mxu1 %v7842_v50  ;;  %v1007_v49 = vadd.f32 %v7999_v31, %v6964_v42  ;;  %v999_v33 = vadd.f32 %v7999_v31, %v998_v46 }
 0x189   : > { %1084 = vst.msk [vmem:[#allocation2 + $0x230] sm:$0xff] %vm1013_vm3, %v1007_v49  ;;  %1082 = vst.msk [vmem:[#allocation2 + $0x220] sm:$0xff] %vm1013_vm3, %v999_v33 }
 0x18a   : > { %7021 = vmatpush3.bf16.msra.mxu1 %v7842_v50  ;;  %v7854_v50 = vld [vmem:[%s9497_s3 + $0xd8] sm:$0xff]  }
 0x18b   : > { %7030 = vmatprep.subr.bf16.mxu1 %v7843_v52 }
 0x18d   : > { %7023 = vmatmul.mubr.msk.bf16.vlgmr.msra.gmra.mrb[0].mxu1 %vm1013_vm3, %v8538_v36 }
 0x18e   : > { %7031 = vmatpush3.bf16.msra.mxu1 %v7843_v52  ;;  %7026 = vmatprep.mubr.msk.bf16.mxu1 %vm1013_vm3, %v8545_v38  ;;  %v6965_v52 = vpop.f32.mrb[70].mxu0 }
 0x18f   : > { %7032 = vmatprep.subr.bf16.mxu1 %v7844_v37 }
 0x190   : > { %v1385_v14 = vld [vmem:[#allocation2 + $0x220] ss:$2 sm:$0xf]  ;;  %v1389_v59 = vld [vmem:[#allocation2 + $0x221] ss:$2 sm:$0xf] }
 0x192   : > { %7033 = vmatpush3.bf16.msra.mxu1 %v7844_v37  ;;  %v1010_v37 = vadd.f32 %v7999_v31, %v6965_v52  ;;  %v7858_v52 = vld [vmem:[%s9497_s3 + $0xf8] sm:$0xff]  }
 0x193   : > { %7034 = vmatprep.subr.bf16.mxu1 %v7845_v20 }
 0x194   : > { %1085 = vst.msk [vmem:[#allocation2 + $0x238] sm:$0xff] %vm1013_vm3, %v1010_v37 }
 0x195   : > { %7027 = vmatmul.mubr.msk.bf16.gmra.mrb[4].mxu1 %vm1013_vm3, %v8558_v25 }
 0x196   : > { %7035 = vmatpush3.bf16.msra.mxu1 %v7845_v20  ;;  %7038 = vmatprep.mubr.msk.bf16.mxu1 %vm1013_vm3, %v1920_v44  ;;  %v1001_v20 = vpop.f32.mrb[71].mxu0  ;;  %v1387_v44 = vld [vmem:[#allocation2 + $0x211] ss:$2 sm:$0xff] }
 0x197   : > { %7036 = vmatprep.subr.bf16.mxu1 %v7846_v43  ;;  %v1002_v53 = vadd.f32 %v7999_v31, %v1001_v20  ;;  %v8658_v31 = vld [vmem:[#allocation3 + $0x81] sm:$0xff] }
 0x198   : > { %v8662_v33 = vpack.c.bf16 %v8658_v31, %v8420_v34  ;;  %v7859_v34 = vld [vmem:[%s9497_s3 + $0x100] sm:$0xff]   ;;  %v7860_v20 = vld [vmem:[%s9497_s3 + $0x108] sm:$0xff]  }
 0x199   : > { %1083 = vst.msk [vmem:[#allocation2 + $0x228] sm:$0xff] %vm1013_vm3, %v1002_v53  ;;  %v7862_v53 = vld [vmem:[%s9497_s3 + $0x118] sm:$0xff]  }
 0x19a   : > { %7037 = vmatpush3.bf16.msra.mxu1 %v7846_v43  ;;  %v1383_v43 = vld [vmem:[#allocation2 + $0x210] ss:$2 sm:$0xff] }
 0x19b   : > { %7046 = vmatprep.subr.bf16.mxu1 %v7847_v48 }
 0x19d   : > { %7039 = vmatmul.mubr.msk.bf16.vlgmr.msra.gmra.mrb[0].mxu1 %vm1013_vm3, %v8572_v55 }
 0x19e   : > { %7047 = vmatpush3.bf16.msra.mxu1 %v7847_v48  ;;  %7042 = vmatprep.mubr.msk.bf16.mxu1 %vm1013_vm3, %v8579_v10  ;;  %v7856_v48 = vld [vmem:[%s9497_s3 + $0xe8] sm:$0xff]  }
 0x19f   : > { %7048 = vmatprep.subr.bf16.mxu1 %v7848_v54 }
 0x1a2   : > { %7049 = vmatpush3.bf16.msra.mxu1 %v7848_v54  ;;  %v1391_v54 = vmax.f32 %v1385_v14, %v1389_v59  ;;  %v7871_v14 = vld [vmem:[%s9497_s3 + $0x160] sm:$0xff]   ;;  %v8770_v59 = vld [vmem:[#allocation3 + $0x90] sm:$0xff] }
 0x1a3   : > { %7050 = vmatprep.subr.bf16.mxu1 %v7849_v26 }
 0x1a5   : > { %7043 = vmatmul.mubr.msk.bf16.gmra.mrb[4].mxu1 %vm1013_vm3, %v8592_v27 }
 0x1a6   : > { %7051 = vmatpush3.bf16.msra.mxu1 %v7849_v26  ;;  %7054 = vmatprep.mubr.msk.bf16.mxu1 %vm1013_vm3, %v2043_v13  ;;  %v1395_v26 = vld [vmem:[#allocation2 + $0x238] ss:$2 sm:$0xf] }
 0x1a7   : > { %7052 = vmatprep.subr.bf16.mxu1 %v7850_v56 }
 0x1aa   : > { %7053 = vmatpush3.bf16.msra.mxu1 %v7850_v56  ;;  %v1399_v56 = vld [vmem:[#allocation2 + $0x239] ss:$2 sm:$0xf] }
 0x1ab   : > { %7062 = vmatprep.subr.bf16.mxu1 %v7851_v11  ;;  %v1401_v13 = vmax.f32 %v1395_v26, %v1399_v56  ;;  %v7875_v26 = vld [vmem:[%s9497_s3 + $0x180] sm:$0xff]   ;;  %v8796_v56 = vld [vmem:[#allocation3 + $0x91] sm:$0xff] }
 0x1ad   : > { %7055 = vmatmul.mubr.msk.bf16.vlgmr.msra.gmra.mrb[0].mxu1 %vm1013_vm3, %v8607_v60  ;;  %v1403_v49 = vmax.f32 %v1391_v54, %v1401_v13  ;;  %v7874_v54 = vld [vmem:[%s9497_s3 + $0x178] sm:$0xff]   ;;  %v8800_v13 = vpack.c.bf16 %v8796_v56, %v8658_v31 }
 0x1ae   : > { %7063 = vmatpush3.bf16.msra.mxu1 %v7851_v11  ;;  %7058 = vmatprep.mubr.msk.bf16.mxu1 %vm1013_vm3, %v8614_v21  ;;  %v1393_v11 = vld [vmem:[#allocation2 + $0x228] ss:$2 sm:$0xff] }
 0x1af   : > { %7064 = vmatprep.subr.bf16.mxu1 %v7852_v29 }
 0x1b2   : > { %7065 = vmatpush3.bf16.msra.mxu1 %v7852_v29  ;;  %v1397_v29 = vld [vmem:[#allocation2 + $0x229] ss:$2 sm:$0xff] }
 0x1b3   : > { %7066 = vmatprep.subr.bf16.mxu1 %v7853_v12  ;;  %v1400_v42 = vmax.f32 %v1393_v11, %v1397_v29  ;;  %v7878_v11 = vld [vmem:[%s9497_s3 + $0x198] sm:$0xff]   ;;  %v7879_v29 = vld [vmem:[%s9497_s3 + $0x1a0] sm:$0xff]  }
 0x1b5   : > { %7059 = vmatmul.mubr.msk.bf16.gmra.mrb[4].mxu1 %vm1013_vm3, %v8630_v17 }
 0x1b6   : > { %7067 = vmatpush3.bf16.msra.mxu1 %v7853_v12  ;;  %7070 = vmatprep.mubr.msk.bf16.mxu1 %vm1013_vm3, %v2166_v63  ;;  %v1390_v63 = vmax.f32 %v1383_v43, %v1387_v44  ;;  %v7857_v12 = vld [vmem:[%s9497_s3 + $0xf0] sm:$0xff]   ;;  %v7866_v43 = vld [vmem:[%s9497_s3 + $0x138] sm:$0xff]   ;;  %v7867_v44 = vld [vmem:[%s9497_s3 + $0x140] sm:$0xff]  }
 0x1b7   : > { %7068 = vmatprep.subr.bf16.mxu1 %v7854_v50 }
 0x1b8   : > { %v1402_v46 = vmax.f32 %v1390_v63, %v1400_v42  ;;  %v8774_v63 = vpack.c.bf16 %v8770_v59, %v8623_v30  ;;  %v7876_v30 = vld [vmem:[%s9497_s3 + $0x188] sm:$0xff]   ;;  %v8822_v42 = vld [vmem:[#allocation3 + $0x92] sm:$0xff] }
 0x1b9   : > { %v8826_v31 = vpack.c.bf16 %v8822_v42, %v8688_v61 }
 0x1ba   : > { %7069 = vmatpush3.bf16.msra.mxu1 %v7854_v50  ;;  %v1405_v50 = vmax.f32 %v1403_v49, 0.0  ;;  %v1404_v37 = vmax.f32 %v1402_v46, 0.0  ;;  %v7882_v49 = vld [vmem:[%s9497_s3 + $0x1b8] sm:$0xff]   ;;  %v7883_v46 = vld [vmem:[%s9497_s3 + $0x1c0] sm:$0xff]  }
 0x1bb   : > { %7078 = vmatprep.subr.bf16.mxu1 %v7855_v35 }
 0x1bc   : > { %1408 = vst.msk [vmem:[#allocation3 + $0xb8] sm:$0xf] %vm1110_vm4, %v1405_v50  ;;  %v7884_v50 = vld [vmem:[%s9497_s3 + $0x1c8] sm:$0xff]  }
 0x1bd   : > { %7071 = vmatmul.mubr.msk.bf16.vlgmr.msra.gmra.mrb[0].mxu1 %vm1013_vm3, %v8331_v22  ;;  %1407 = vst.msk [vmem:[#allocation3 + $0xb0] sm:$0xff] %vm1013_vm3, %v1404_v37 }
 0x1be   : > { %7079 = vmatpush3.bf16.msra.mxu1 %v7855_v35  ;;  %7074 = vmatprep.mubr.msk.bf16.mxu1 %vm1013_vm3, %v8400_v5  ;;  %v7863_v35 = vld [vmem:[%s9497_s3 + $0x120] sm:$0xff]  }
 0x1bf   : > { %7080 = vmatprep.subr.bf16.mxu1 %v7856_v48 }
 0x1c2   : > { %7081 = vmatpush3.bf16.msra.mxu1 %v7856_v48  ;;  %v7870_v48 = vld [vmem:[%s9497_s3 + $0x158] sm:$0xff]  }
 0x1c3   : > { %7082 = vmatprep.subr.bf16.mxu1 %v7857_v12 }
 0x1c5   : > { %7075 = vmatmul.mubr.msk.bf16.gmra.mrb[4].mxu1 %vm1013_vm3, %v8662_v33 }
 0x1c6   : > { %7083 = vmatpush3.bf16.msra.mxu1 %v7857_v12  ;;  %7086 = vmatprep.mubr.msk.bf16.mxu1 %vm1013_vm3, %v2289_v2  ;;  %v8692_v2 = vpack.c.bf16 %v8688_v61, %v8518_v18  ;;  %v7864_v18 = vld [vmem:[%s9497_s3 + $0x128] sm:$0xff]   ;;  %v8874_v61 = vld [vmem:[#allocation3 + $0x94] sm:$0xff] }
 0x1c7   : > { %7084 = vmatprep.subr.bf16.mxu1 %v7858_v52  ;;  %v7880_v12 = vld [vmem:[%s9497_s3 + $0x1a8] sm:$0xff]  }
 0x1ca   : > { %7085 = vmatpush3.bf16.msra.mxu1 %v7858_v52  ;;  %v8848_v52 = vld [vmem:[#allocation3 + $0x93] sm:$0xff] }
 0x1cb   : > { %7094 = vmatprep.subr.bf16.mxu1 %v7859_v34  ;;  %v8852_v37 = vpack.c.bf16 %v8848_v52, %v8716_v62 }
 0x1cd   : > { %7087 = vmatmul.mubr.msk.bf16.vlgmr.msra.gmra.mrb[0].mxu1 %vm1013_vm3, %v8335_v23 }
 0x1ce   : > { %7095 = vmatpush3.bf16.msra.mxu1 %v7859_v34  ;;  %7090 = vmatprep.mubr.msk.bf16.mxu1 %vm1013_vm3, %v8404_v6  ;;  %v7886_v34 = vld [vmem:[%s9497_s3 + $0x1d8] sm:$0xff]  }
 0x1cf   : > { %7096 = vmatprep.subr.bf16.mxu1 %v7860_v20 }
 0x1d2   : > { %7097 = vmatpush3.bf16.msra.mxu1 %v7860_v20  ;;  %v7887_v20 = vld [vmem:[%s9497_s3 + $0x1e0] sm:$0xff]  }
 0x1d3   : > { %7098 = vmatprep.subr.bf16.mxu1 %v7861_v57 }
 0x1d5   : > { %7091 = vmatmul.mubr.msk.bf16.gmra.mrb[4].mxu1 %vm1013_vm3, %v8692_v2 }
 0x1d6   : > { %7099 = vmatpush3.bf16.msra.mxu1 %v7861_v57  ;;  %7102 = vmatprep.mubr.msk.bf16.mxu1 %vm1013_vm3, %v2412_v3  ;;  %v8720_v3 = vpack.c.bf16 %v8716_v62, %v8554_v16  ;;  %v7868_v16 = vld [vmem:[%s9497_s3 + $0x148] sm:$0xff]   ;;  %v8900_v62 = vld [vmem:[#allocation3 + $0xa0] sm:$0xff] }
 0x1d7   : > { %7100 = vmatprep.subr.bf16.mxu1 %v7862_v53  ;;  %v7888_v57 = vld [vmem:[%s9497_s3 + $0x1e8] sm:$0xff]  }
 0x1da   : > { %7101 = vmatpush3.bf16.msra.mxu1 %v7862_v53  ;;  %v8878_v53 = vpack.c.bf16 %v8874_v61, %v8744_v1 }
 0x1db   : > { %7110 = vmatprep.subr.bf16.mxu1 %v7863_v35 }
 0x1dd   : > { %7103 = vmatmul.mubr.msk.bf16.vlgmr.msra.gmra.mrb[0].mxu1 %vm1013_vm3, %v8347_v28 }
 0x1de   : > { %7111 = vmatpush3.bf16.msra.mxu1 %v7863_v35  ;;  %7106 = vmatprep.mubr.msk.bf16.mxu1 %vm1013_vm3, %v8409_v7  ;;  %v7890_v35 = vld [vmem:[%s9497_s3 + $0x1f8] sm:$0xff]  }
 0x1df   : > { %7112 = vmatprep.subr.bf16.mxu1 %v7864_v18 }
 0x1e2   : > { %7113 = vmatpush3.bf16.msra.mxu1 %v7864_v18  ;;  %v7891_v18 = vld [vmem:[%s9497_s3 + $0x200] sm:$0xff]  }
 0x1e3   : > { %7114 = vmatprep.subr.bf16.mxu1 %v7865_v58 }
 0x1e5   : > { %7107 = vmatmul.mubr.msk.bf16.gmra.mrb[4].mxu1 %vm1013_vm3, %v8720_v3 }
 0x1e6   : > { %7115 = vmatpush3.bf16.msra.mxu1 %v7865_v58  ;;  %7118 = vmatprep.mubr.msk.bf16.mxu1 %vm1013_vm3, %v2535_v4  ;;  %v8748_v4 = vpack.c.bf16 %v8744_v1, %v8588_v32  ;;  %v7872_v32 = vld [vmem:[%s9497_s3 + $0x168] sm:$0xff]   ;;  %v7899_v1 = vld [vmem:[%s9497_s3 + $0x240] sm:$0xff]  }
 0x1e7   : > { %7116 = vmatprep.subr.bf16.mxu1 %v7866_v43  ;;  %v7892_v58 = vld [vmem:[%s9497_s3 + $0x208] sm:$0xff]  }
 0x1ea   : > { %7117 = vmatpush3.bf16.msra.mxu1 %v7866_v43  ;;  %v3213_v43 = vpack.c.bf16 %v8900_v62, %v8770_v59  ;;  %v8958_v59 = vld [vmem:[#allocation3 + $0xa2] sm:$0xff] }
 0x1eb   : > { %7126 = vmatprep.subr.bf16.mxu1 %v7867_v44 }
 0x1ed   : > { %7119 = vmatmul.mubr.msk.bf16.vlgmr.msra.gmra.mrb[0].mxu1 %vm1013_vm3, %v8351_v19 }
 0x1ee   : > { %7127 = vmatpush3.bf16.msra.mxu1 %v7867_v44  ;;  %7122 = vmatprep.mubr.msk.bf16.mxu1 %vm1013_vm3, %v8413_v8  ;;  %v7896_v44 = vld [vmem:[%s9497_s3 + $0x228] sm:$0xff]  }
 0x1ef   : > { %7128 = vmatprep.subr.bf16.mxu1 %v7868_v16 }
 0x1f2   : > { %7129 = vmatpush3.bf16.msra.mxu1 %v7868_v16  ;;  %v8923_v16 = vld [vmem:[#allocation3 + $0xa1] sm:$0xff] }
 0x1f3   : > { %7130 = vmatprep.subr.bf16.mxu1 %v7869_v0 }
 0x1f5   : > { %7123 = vmatmul.mubr.msk.bf16.gmra.mrb[4].mxu1 %vm1013_vm3, %v8748_v4 }
 0x1f6   : > { %7131 = vmatpush3.bf16.msra.mxu1 %v7869_v0  ;;  %7134 = vmatprep.mubr.msk.bf16.mxu1 %vm1013_vm3, %v8454_v41  ;;  %v7873_v41 = vld [vmem:[%s9497_s3 + $0x170] sm:$0xff]   ;;  %v3324_v0 = vpack.c.bf16 %v8923_v16, %v8796_v56 }
 0x1f7   : > { %7132 = vmatprep.subr.bf16.mxu1 %v7870_v48 }
 0x1fa   : > { %7133 = vmatpush3.bf16.msra.mxu1 %v7870_v48  ;;  %v8009_v48 = vmov 0.0  }
 0x1fb   : > { %7142 = vmatprep.subr.bf16.mxu1 %v7871_v14  ;;  %7366 = vmatprep.subr.bf16.mxu0 %v8009_v48 }
 0x1fc   : > { %7374 = vmatprep.mubr.msk.bf16.mxu0 %vm8010_vm5, %v8009_v48 }
 0x1fd   : > { %7135 = vmatmul.mubr.msk.bf16.vlgmr.msra.gmra.mrb[0].mxu1 %vm1013_vm3, %v8459_v47 }
 0x1fe   : > { %7143 = vmatpush3.bf16.msra.mxu1 %v7871_v14  ;;  %7138 = vmatprep.mubr.msk.bf16.mxu1 %vm1013_vm3, %v8483_v51  ;;  %v7928_v14 = vld [vmem:[%s9499_s5 + $0x28] sm:$0xff]  }
 0x1ff   : > { %7144 = vmatprep.subr.bf16.mxu1 %v7872_v32 }
 0x202   : > { %7145 = vmatpush3.bf16.msra.mxu1 %v7872_v32  ;;  %v7929_v32 = vld [vmem:[%s9499_s5 + $0x30] sm:$0xff]  }
 0x203   : > { %7146 = vmatprep.subr.bf16.mxu1 %v7873_v41 }
 0x205   : > { %7139 = vmatmul.mubr.msk.bf16.gmra.mrb[4].mxu1 %vm1013_vm3, %v8774_v63 }
 0x206   : > { %7147 = vmatpush3.bf16.msra.mxu1 %v7873_v41  ;;  %7150 = vmatprep.mubr.msk.bf16.mxu1 %vm1013_vm3, %v8288_v24  ;;  %v7877_v24 = vld [vmem:[%s9497_s3 + $0x190] sm:$0xff]  }
 0x207   : > { %7148 = vmatprep.subr.bf16.mxu1 %v7874_v54  ;;  %v7901_v41 = vld [vmem:[%s9497_s3 + $0x250] sm:$0xff]  }
 0x20a   : > { %7149 = vmatpush3.bf16.msra.mxu1 %v7874_v54  ;;  %v7930_v54 = vld [vmem:[%s9499_s5 + $0x38] sm:$0xff]  }
 0x20b   : > { %7158 = vmatprep.subr.bf16.mxu1 %v7875_v26 }
 0x20d   : > { %7151 = vmatmul.mubr.msk.bf16.vlgmr.msra.gmra.mrb[0].mxu1 %vm1013_vm3, %v8363_v45 }
 0x20e   : > { %7159 = vmatpush3.bf16.msra.mxu1 %v7875_v26  ;;  %7154 = vmatprep.mubr.msk.bf16.mxu1 %vm1013_vm3, %v8425_v39  ;;  %v7903_v26 = vld [vmem:[%s9497_s3 + $0x260] sm:$0xff]  }
 0x20f   : > { %7160 = vmatprep.subr.bf16.mxu1 %v7876_v30 }
 0x212   : > { %7161 = vmatpush3.bf16.msra.mxu1 %v7876_v30  ;;  %v7904_v30 = vld [vmem:[%s9497_s3 + $0x268] sm:$0xff]  }
 0x213   : > { %7162 = vmatprep.subr.bf16.mxu1 %v7877_v24 }
 0x215   : > { %7155 = vmatmul.mubr.msk.bf16.gmra.mrb[4].mxu1 %vm1013_vm3, %v8800_v13 }
 0x216   : > { %7163 = vmatpush3.bf16.msra.mxu1 %v7877_v24  ;;  %7166 = vmatprep.mubr.msk.bf16.mxu1 %vm1013_vm3, %v8502_v9  ;;  %v7881_v9 = vld [vmem:[%s9497_s3 + $0x1b0] sm:$0xff]   ;;  %v8986_v24 = vld [vmem:[#allocation3 + $0xa3] sm:$0xff] }
 0x217   : > { %7164 = vmatprep.subr.bf16.mxu1 %v7878_v11  ;;  %v3546_v56 = vpack.c.bf16 %v8986_v24, %v8848_v52  ;;  %v7918_v52 = vld [vmem:[%s9497_s3 + $0x2d8] sm:$0xff]  }
 0x21a   : > { %7165 = vmatpush3.bf16.msra.mxu1 %v7878_v11  ;;  %v7908_v11 = vld [vmem:[%s9497_s3 + $0x288] sm:$0xff]  }
 0x21b   : > { %7174 = vmatprep.subr.bf16.mxu1 %v7879_v29 }
 0x21d   : > { %7167 = vmatmul.mubr.msk.bf16.vlgmr.msra.gmra.mrb[0].mxu1 %vm1013_vm3, %v8509_v40 }
 0x21e   : > { %7175 = vmatpush3.bf16.msra.mxu1 %v7879_v29  ;;  %7170 = vmatprep.mubr.msk.bf16.mxu1 %vm1013_vm3, %v8523_v15  ;;  %v9009_v29 = vld [vmem:[#allocation3 + $0xa4] sm:$0xff] }
 0x21f   : > { %7176 = vmatprep.subr.bf16.mxu1 %v7880_v12 }
 0x222   : > { %7177 = vmatpush3.bf16.msra.mxu1 %v7880_v12  ;;  %v3657_v12 = vpack.c.bf16 %v9009_v29, %v8874_v61 }
 0x223   : > { %7178 = vmatprep.subr.bf16.mxu1 %v7881_v9 }
 0x225   : > { %7171 = vmatmul.mubr.msk.bf16.gmra.mrb[4].mxu1 %vm1013_vm3, %v8826_v31 }
 0x226   : > { %7179 = vmatpush3.bf16.msra.mxu1 %v7881_v9  ;;  %7182 = vmatprep.mubr.msk.bf16.mxu1 %vm1013_vm3, %v8538_v36  ;;  %v7885_v36 = vld [vmem:[%s9497_s3 + $0x1d0] sm:$0xff]   ;;  %v7912_v9 = vld [vmem:[%s9497_s3 + $0x2a8] sm:$0xff]  }
 0x227   : > { %7180 = vmatprep.subr.bf16.mxu1 %v7882_v49 }
 0x22a   : > { %7181 = vmatpush3.bf16.msra.mxu1 %v7882_v49 }
 0x22b   : > { %7190 = vmatprep.subr.bf16.mxu1 %v7883_v46 }
 0x22d   : > { %7183 = vmatmul.mubr.msk.bf16.vlgmr.msra.gmra.mrb[0].mxu1 %vm1013_vm3, %v8545_v38 }
 0x22e   : > { %7191 = vmatpush3.bf16.msra.mxu1 %v7883_v46  ;;  %7186 = vmatprep.mubr.msk.bf16.mxu1 %vm1013_vm3, %v8558_v25  ;;  %v7914_v46 = vld [vmem:[%s9497_s3 + $0x2b8] sm:$0xff]  }
 0x22f   : > { %7192 = vmatprep.subr.bf16.mxu1 %v7884_v50 }
 0x232   : > { %7193 = vmatpush3.bf16.msra.mxu1 %v7884_v50  ;;  %v3878_v50 = vld [vmem:[#allocation3 + $0xb1] sm:$0xff] }
 0x233   : > { %7194 = vmatprep.subr.bf16.mxu1 %v7885_v36 }
 0x235   : > { %7187 = vmatmul.mubr.msk.bf16.gmra.mrb[4].mxu1 %vm1013_vm3, %v8852_v37 }
 0x236   : > { %7195 = vmatpush3.bf16.msra.mxu1 %v7885_v36  ;;  %7198 = vmatprep.mubr.msk.bf16.mxu1 %vm1013_vm3, %v8572_v55  ;;  %v7889_v55 = vld [vmem:[%s9497_s3 + $0x1f0] sm:$0xff]   ;;  %v3879_v36 = vpack.c.bf16 %v3878_v50, %v8923_v16 }
 0x237   : > { %7196 = vmatprep.subr.bf16.mxu1 %v7886_v34 }
 0x23a   : > { %7197 = vmatpush3.bf16.msra.mxu1 %v7886_v34  ;;  %v3989_v34 = vld [vmem:[#allocation3 + $0xb2] sm:$0xff] }
 0x23b   : > { %7206 = vmatprep.subr.bf16.mxu1 %v7887_v20 }
 0x23d   : > { %7199 = vmatmul.mubr.msk.bf16.vlgmr.msra.gmra.mrb[0].mxu1 %vm1013_vm3, %v8579_v10 }
 0x23e   : > { %7207 = vmatpush3.bf16.msra.mxu1 %v7887_v20  ;;  %7202 = vmatprep.mubr.msk.bf16.mxu1 %vm1013_vm3, %v8592_v27  ;;  %v3990_v20 = vpack.c.bf16 %v3989_v34, %v8958_v59  ;;  %v7940_v34 = vld [vmem:[%s9499_s5 + $0x48] sm:$0xff]  }
 0x23f   : > { %7208 = vmatprep.subr.bf16.mxu1 %v7888_v57 }
 0x242   : > { %7209 = vmatpush3.bf16.msra.mxu1 %v7888_v57  ;;  %v7922_v57 = vld [vmem:[%s9497_s3 + $0x2f8] sm:$0xff]  }
 0x243   : > { %7210 = vmatprep.subr.bf16.mxu1 %v7889_v55 }
 0x245   : > { %7203 = vmatmul.mubr.msk.bf16.gmra.mrb[4].mxu1 %vm1013_vm3, %v8878_v53 }
 0x246   : > { %7211 = vmatpush3.bf16.msra.mxu1 %v7889_v55  ;;  %7214 = vmatprep.mubr.msk.bf16.mxu1 %vm1013_vm3, %v8607_v60  ;;  %v7893_v60 = vld [vmem:[%s9497_s3 + $0x210] sm:$0xff]  }
 0x247   : > { %7212 = vmatprep.subr.bf16.mxu1 %v7890_v35  ;;  %v4100_v55 = vld [vmem:[#allocation3 + $0xb3] sm:$0xff] }
 0x248   : > { %v4101_v61 = vpack.c.bf16 %v4100_v55, %v8986_v24 }
 0x24a   : > { %7213 = vmatpush3.bf16.msra.mxu1 %v7890_v35  ;;  %v7926_v35 = vld [vmem:[%s9497_s3 + $0x318] sm:$0xff]  }
 0x24b   : > { %7222 = vmatprep.subr.bf16.mxu1 %v7891_v18 }
 0x24d   : > { %7215 = vmatmul.mubr.msk.bf16.vlgmr.msra.gmra.mrb[0].mxu1 %vm1013_vm3, %v8614_v21  ;;  %v7894_v21 = vld [vmem:[%s9497_s3 + $0x218] sm:$0xff]  }
 0x24e   : > { %7223 = vmatpush3.bf16.msra.mxu1 %v7891_v18  ;;  %7218 = vmatprep.mubr.msk.bf16.mxu1 %vm1013_vm3, %v8630_v17  ;;  %v7895_v17 = vld [vmem:[%s9497_s3 + $0x220] sm:$0xff]  }
 0x24f   : > { %7224 = vmatprep.subr.bf16.mxu1 %v7892_v58  ;;  %v7931_v18 = vld [vmem:[%s9499_s5 + $0xe0] sm:$0xff]  }
 0x252   : > { %7225 = vmatpush3.bf16.msra.mxu1 %v7892_v58  ;;  %v6330_v58 = vld [vmem:[%s9498_s4] ss:$0 sm:$0xff] }
 0x253   : > { %7226 = vmatprep.subr.bf16.mxu1 %v7893_v60 }
 0x255   : > { %7219 = vmatmul.mubr.msk.bf16.gmra.mrb[4].mxu1 %vm1013_vm3, %v3213_v43 }
 0x256   : > { %7227 = vmatpush3.bf16.msra.mxu1 %v7893_v60  ;;  %7230 = vmatprep.mubr.msk.bf16.mxu1 %vm1013_vm3, %v8331_v22  ;;  %v7897_v22 = vld [vmem:[%s9497_s3 + $0x230] sm:$0xff]  }
 0x257   : > { %7228 = vmatprep.subr.bf16.mxu1 %v7894_v21 }
 0x25a   : > { %7229 = vmatpush3.bf16.msra.mxu1 %v7894_v21 }
 0x25b   : > { %7238 = vmatprep.subr.bf16.mxu1 %v7895_v17 }
 0x25d   : > { %7231 = vmatmul.mubr.msk.bf16.vlgmr.msra.gmra.mrb[0].mxu1 %vm1013_vm3, %v8400_v5  ;;  %v7898_v5 = vld [vmem:[%s9497_s3 + $0x238] sm:$0xff]  }
 0x25e   : > { %7239 = vmatpush3.bf16.msra.mxu1 %v7895_v17  ;;  %7234 = vmatprep.mubr.msk.bf16.mxu1 %vm1013_vm3, %v8662_v33  ;;  %v7927_v33 = vld [vmem:[%s9499_s5 + $0x20] sm:$0xff]  }
 0x25f   : > { %7240 = vmatprep.subr.bf16.mxu1 %v7896_v44  ;;  %7367 = vmatpush3.bf16.msra.mxu0 %v7927_v33 }
 0x260   : > { %7368 = vmatprep.subr.bf16.mxu0 %v8009_v48 }
 0x262   : > { %7241 = vmatpush3.bf16.msra.mxu1 %v7896_v44 }
 0x263   : > { %7242 = vmatprep.subr.bf16.mxu1 %v7897_v22  ;;  %7369 = vmatpush3.bf16.msra.mxu0 %v7928_v14 }
 0x264   : > { %7370 = vmatprep.subr.bf16.mxu0 %v8009_v48 }
 0x265   : > { %7235 = vmatmul.mubr.msk.bf16.gmra.mrb[4].mxu1 %vm1013_vm3, %v3324_v0 }
 0x266   : > { %7243 = vmatpush3.bf16.msra.mxu1 %v7897_v22  ;;  %7246 = vmatprep.mubr.msk.bf16.mxu1 %vm1013_vm3, %v8335_v23  ;;  %v7900_v23 = vld [vmem:[%s9497_s3 + $0x248] sm:$0xff]  }
 0x267   : > { %7244 = vmatprep.subr.bf16.mxu1 %v7898_v5  ;;  %7371 = vmatpush3.bf16.msra.mxu0 %v7929_v32 }
 0x268   : > { %7372 = vmatprep.subr.bf16.mxu0 %v8009_v48 }
 0x26a   : > { %7245 = vmatpush3.bf16.msra.mxu1 %v7898_v5 }
 0x26b   : > { %7254 = vmatprep.subr.bf16.mxu1 %v7899_v1  ;;  %7373 = vmatpush3.bf16.msra.mxu0 %v7930_v54 }
 0x26c   : > { %7378 = vmatprep.subr.bf16.mxu0 %v8009_v48 }
 0x26d   : > { %7247 = vmatmul.mubr.msk.bf16.vlgmr.msra.gmra.mrb[0].mxu1 %vm1013_vm3, %v8404_v6  ;;  %v3435_v6 = vpack.c.bf16 %v8958_v59, %v8822_v42  ;;  %v3767_v42 = vld [vmem:[#allocation3 + $0xb0] sm:$0xff] }
 0x26e   : > { %7255 = vmatpush3.bf16.msra.mxu1 %v7899_v1  ;;  %7250 = vmatprep.mubr.msk.bf16.mxu1 %vm1013_vm3, %v8692_v2  ;;  %v7902_v2 = vld [vmem:[%s9497_s3 + $0x258] sm:$0xff]   ;;  %v3768_v49 = vpack.c.bf16 %v3767_v42, %v8900_v62  ;;  %v7933_v42 = vld [vmem:[%s9499_s5] sm:$0xff]  }
 0x26f   : > { %7256 = vmatprep.subr.bf16.mxu1 %v7900_v23 }
 0x272   : > { %7257 = vmatpush3.bf16.msra.mxu1 %v7900_v23 }
 0x273   : > { %7258 = vmatprep.subr.bf16.mxu1 %v7901_v41 }
 0x275   : > { %7251 = vmatmul.mubr.msk.bf16.gmra.mrb[4].mxu1 %vm1013_vm3, %v3435_v6 }
 0x276   : > { %7259 = vmatpush3.bf16.msra.mxu1 %v7901_v41  ;;  %7262 = vmatprep.mubr.msk.bf16.mxu1 %vm1013_vm3, %v8347_v28  ;;  %v7905_v28 = vld [vmem:[%s9497_s3 + $0x270] sm:$0xff]  }
 0x277   : > { %7260 = vmatprep.subr.bf16.mxu1 %v7902_v2 }
 0x27a   : > { %7261 = vmatpush3.bf16.msra.mxu1 %v7902_v2 }
 0x27b   : > { %7270 = vmatprep.subr.bf16.mxu1 %v7903_v26 }
 0x27d   : > { %7263 = vmatmul.mubr.msk.bf16.vlgmr.msra.gmra.mrb[0].mxu1 %vm1013_vm3, %v8409_v7  ;;  %v7906_v7 = vld [vmem:[%s9497_s3 + $0x278] sm:$0xff]  }
 0x27e   : > { %7271 = vmatpush3.bf16.msra.mxu1 %v7903_v26  ;;  %7266 = vmatprep.mubr.msk.bf16.mxu1 %vm1013_vm3, %v8720_v3  ;;  %v7907_v3 = vld [vmem:[%s9497_s3 + $0x280] sm:$0xff]  }
 0x27f   : > { %7272 = vmatprep.subr.bf16.mxu1 %v7904_v30 }
 0x282   : > { %7273 = vmatpush3.bf16.msra.mxu1 %v7904_v30 }
 0x283   : > { %7274 = vmatprep.subr.bf16.mxu1 %v7905_v28 }
 0x285   : > { %7267 = vmatmul.mubr.msk.bf16.gmra.mrb[4].mxu1 %vm1013_vm3, %v3546_v56 }
 0x286   : > { %7275 = vmatpush3.bf16.msra.mxu1 %v7905_v28  ;;  %7278 = vmatprep.mubr.msk.bf16.mxu1 %vm1013_vm3, %v8351_v19  ;;  %v7909_v19 = vld [vmem:[%s9497_s3 + $0x290] sm:$0xff]  }
 0x287   : > { %7276 = vmatprep.subr.bf16.mxu1 %v7906_v7 }
 0x28a   : > { %7277 = vmatpush3.bf16.msra.mxu1 %v7906_v7 }
 0x28b   : > { %7286 = vmatprep.subr.bf16.mxu1 %v7907_v3 }
 0x28d   : > { %7279 = vmatmul.mubr.msk.bf16.vlgmr.msra.gmra.mrb[0].mxu1 %vm1013_vm3, %v8413_v8  ;;  %v7910_v8 = vld [vmem:[%s9497_s3 + $0x298] sm:$0xff]  }
 0x28e   : > { %7287 = vmatpush3.bf16.msra.mxu1 %v7907_v3  ;;  %7282 = vmatprep.mubr.msk.bf16.mxu1 %vm1013_vm3, %v8748_v4  ;;  %v7911_v4 = vld [vmem:[%s9497_s3 + $0x2a0] sm:$0xff]  }
 0x28f   : > { %7288 = vmatprep.subr.bf16.mxu1 %v7908_v11 }
 0x292   : > { %7289 = vmatpush3.bf16.msra.mxu1 %v7908_v11 }
 0x293   : > { %7290 = vmatprep.subr.bf16.mxu1 %v7909_v19 }
 0x295   : > { %7283 = vmatmul.mubr.msk.bf16.gmra.mrb[4].mxu1 %vm1013_vm3, %v3657_v12 }
 0x296   : > { %7291 = vmatpush3.bf16.msra.mxu1 %v7909_v19  ;;  %7294 = vmatprep.mubr.msk.bf16.mxu1 %vm1013_vm3, %v8459_v47  ;;  %v7913_v47 = vld [vmem:[%s9497_s3 + $0x2b0] sm:$0xff]  }
 0x297   : > { %7292 = vmatprep.subr.bf16.mxu1 %v7910_v8 }
 0x29a   : > { %7293 = vmatpush3.bf16.msra.mxu1 %v7910_v8 }
 0x29b   : > { %7302 = vmatprep.subr.bf16.mxu1 %v7911_v4 }
 0x29d   : > { %7295 = vmatmul.mubr.msk.bf16.vlgmr.msra.gmra.mrb[0].mxu1 %vm1013_vm3, %v8483_v51  ;;  %v7915_v51 = vld [vmem:[%s9497_s3 + $0x2c0] sm:$0xff]  }
 0x29e   : > { %7303 = vmatpush3.bf16.msra.mxu1 %v7911_v4  ;;  %7298 = vmatprep.mubr.msk.bf16.mxu1 %vm1013_vm3, %v8774_v63  ;;  %v7916_v63 = vld [vmem:[%s9497_s3 + $0x2c8] sm:$0xff]  }
 0x29f   : > { %7304 = vmatprep.subr.bf16.mxu1 %v7912_v9 }
 0x2a2   : > { %7305 = vmatpush3.bf16.msra.mxu1 %v7912_v9 }
 0x2a3   : > { %7306 = vmatprep.subr.bf16.mxu1 %v7913_v47 }
 0x2a5   : > { %7299 = vmatmul.mubr.msk.bf16.gmra.mrb[4].mxu1 %vm1013_vm3, %v3768_v49 }
 0x2a6   : > { %7307 = vmatpush3.bf16.msra.mxu1 %v7913_v47  ;;  %7310 = vmatprep.mubr.msk.bf16.mxu1 %vm1013_vm3, %v8363_v45  ;;  %v7917_v45 = vld [vmem:[%s9497_s3 + $0x2d0] sm:$0xff]  }
 0x2a7   : > { %7308 = vmatprep.subr.bf16.mxu1 %v7914_v46 }
 0x2aa   : > { %7309 = vmatpush3.bf16.msra.mxu1 %v7914_v46 }
 0x2ab   : > { %7318 = vmatprep.subr.bf16.mxu1 %v7915_v51 }
 0x2ad   : > { %7311 = vmatmul.mubr.msk.bf16.vlgmr.msra.gmra.mrb[0].mxu1 %vm1013_vm3, %v8425_v39  ;;  %v7919_v39 = vld [vmem:[%s9497_s3 + $0x2e0] sm:$0xff]  }
 0x2ae   : > { %7319 = vmatpush3.bf16.msra.mxu1 %v7915_v51  ;;  %7314 = vmatprep.mubr.msk.bf16.mxu1 %vm1013_vm3, %v8800_v13  ;;  %v7920_v13 = vld [vmem:[%s9497_s3 + $0x2e8] sm:$0xff]  }
 0x2af   : > { %7320 = vmatprep.subr.bf16.mxu1 %v7916_v63 }
 0x2b2   : > { %7321 = vmatpush3.bf16.msra.mxu1 %v7916_v63  ;;  %v7935_v63 = vld [vmem:[%s9499_s5 + $0x8] sm:$0xff]  }
 0x2b3   : > { %7322 = vmatprep.subr.bf16.mxu1 %v7917_v45 }
 0x2b5   : > { %7315 = vmatmul.mubr.msk.bf16.gmra.mrb[4].mxu1 %vm1013_vm3, %v3879_v36 }
 0x2b6   : > { %7323 = vmatpush3.bf16.msra.mxu1 %v7917_v45  ;;  %7326 = vmatprep.mubr.msk.bf16.mxu1 %vm1013_vm3, %v8509_v40  ;;  %v7921_v40 = vld [vmem:[%s9497_s3 + $0x2f0] sm:$0xff]  }
 0x2b7   : > { %7324 = vmatprep.subr.bf16.mxu1 %v7918_v52 }
 0x2ba   : > { %7325 = vmatpush3.bf16.msra.mxu1 %v7918_v52 }
 0x2bb   : > { %7334 = vmatprep.subr.bf16.mxu1 %v7919_v39 }
 0x2bd   : > { %7327 = vmatmul.mubr.msk.bf16.vlgmr.msra.gmra.mrb[0].mxu1 %vm1013_vm3, %v8523_v15  ;;  %v7923_v15 = vld [vmem:[%s9497_s3 + $0x300] sm:$0xff]  }
 0x2be   : > { %7335 = vmatpush3.bf16.msra.mxu1 %v7919_v39  ;;  %7330 = vmatprep.mubr.msk.bf16.mxu1 %vm1013_vm3, %v8826_v31  ;;  %v7924_v31 = vld [vmem:[%s9497_s3 + $0x308] sm:$0xff]   ;;  %v7937_v39 = vld [vmem:[%s9499_s5 + $0x10] sm:$0xff]  }
 0x2bf   : > { %7336 = vmatprep.subr.bf16.mxu1 %v7920_v13 }
 0x2c2   : > { %7337 = vmatpush3.bf16.msra.mxu1 %v7920_v13  ;;  %v7938_v13 = vld [vmem:[%s9499_s5 + $0x18] sm:$0xff]  }
 0x2c3   : > { %7338 = vmatprep.subr.bf16.mxu1 %v7921_v40 }
 0x2c5   : > { %7331 = vmatmul.mubr.msk.bf16.gmra.mrb[4].mxu1 %vm1013_vm3, %v3990_v20  ;;  %v7941_v20 = vld [vmem:[%s9499_s5 + $0x50] sm:$0xff]  }
 0x2c6   : > { %7339 = vmatpush3.bf16.msra.mxu1 %v7921_v40  ;;  %7342 = vmatprep.mubr.msk.bf16.mxu1 %vm1013_vm3, %v8545_v38  ;;  %v7925_v38 = vld [vmem:[%s9497_s3 + $0x310] sm:$0xff]   ;;  %v7939_v40 = vld [vmem:[%s9499_s5 + $0x40] sm:$0xff]  }
 0x2c7   : > { %7340 = vmatprep.subr.bf16.mxu1 %v7922_v57 }
 0x2ca   : > { %7341 = vmatpush3.bf16.msra.mxu1 %v7922_v57  ;;  %v7942_v57 = vld [vmem:[%s9499_s5 + $0x58] sm:$0xff]  }
 0x2cb   : > { %7350 = vmatprep.subr.bf16.mxu1 %v7923_v15 }
 0x2cd   : > { %7343 = vmatmul.mubr.msk.bf16.vlgmr.msra.gmra.mrb[0].mxu1 %vm1013_vm3, %v8558_v25  ;;  %v4211_v25 = vld [vmem:[#allocation3 + $0xb4] sm:$0xff] }
 0x2ce   : > { %7351 = vmatpush3.bf16.msra.mxu1 %v7923_v15  ;;  %7346 = vmatprep.mubr.msk.bf16.mxu1 %vm1013_vm3, %v8852_v37  ;;  %v4212_v37 = vpack.c.bf16 %v4211_v25, %v9009_v29  ;;  %v7943_v15 = vld [vmem:[%s9499_s5 + $0x60] sm:$0xff]  }
 0x2cf   : > { %7352 = vmatprep.subr.bf16.mxu1 %v7924_v31 }
 0x2d2   : > { %7353 = vmatpush3.bf16.msra.mxu1 %v7924_v31 }
 0x2d3   : > { %7354 = vmatprep.subr.bf16.mxu1 %v7925_v38 }
 0x2d5   : > { %7347 = vmatmul.mubr.msk.bf16.gmra.mrb[4].mxu1 %vm1013_vm3, %v4101_v61  ;;  %v7944_v61 = vld [vmem:[%s9499_s5 + $0x68] sm:$0xff]  }
 0x2d6   : > { %7355 = vmatpush3.bf16.msra.mxu1 %v7925_v38  ;;  %7358 = vmatprep.mubr.msk.bf16.mxu1 %vm1013_vm3, %v8579_v10  ;;  %v7932_v10 = vld [vmem:[%s9499_s5 + $0xe8] sm:$0xff]  }
 0x2d7   : > { %7356 = vmatprep.subr.bf16.mxu1 %v7926_v35 }
 0x2da   : > { %7357 = vmatpush3.bf16.msra.mxu1 %v7926_v35 }
 0x2db   : > { %7558 = vmatprep.subr.bf16.mxu1 %v8009_v48 }
 0x2dd   : > { %7359 = vmatmul.mubr.msk.bf16.vlgmr.msra.gmra.mrb[0].mxu1 %vm1013_vm3, %v8592_v27  ;;  %v7934_v27 = vld [vmem:[%s9499_s5 + $0xf0] sm:$0xff]  }
 0x2de   : > { %7362 = vmatprep.mubr.msk.bf16.mxu1 %vm1013_vm3, %v8878_v53  ;;  %7559 = vmatpush3.bf16.msra.mxu1 %v7931_v18  ;;  %v7936_v53 = vld [vmem:[%s9499_s5 + $0xf8] sm:$0xff]  }
 0x2df   : > { %7560 = vmatprep.subr.bf16.mxu1 %v8009_v48 }
 0x2e2   : > { %7561 = vmatpush3.bf16.msra.mxu1 %v7932_v10  ;;  %v7945_v10 = vld [vmem:[%s9499_s5 + $0x70] sm:$0xff]  }
 0x2e3   : > { %7562 = vmatprep.subr.bf16.mxu1 %v8009_v48 }
 0x2e5   : > { %7363 = vmatmul.mubr.msk.bf16.gmra.mrb[4].mxu1 %vm1013_vm3, %v4212_v37 }
 0x2e6   : > { %7566 = vmatprep.mubr.msk.bf16.mxu1 %vm8010_vm5, %v8009_v48  ;;  %7563 = vmatpush3.bf16.msra.mxu1 %v7934_v27 }
 0x2e7   : > { %7564 = vmatprep.subr.bf16.mxu1 %v8009_v48 }
 0x2ea   : > { %7565 = vmatpush3.bf16.msra.mxu1 %v7936_v53  ;;  %v7946_v53 = vld [vmem:[%s9499_s5 + $0x78] sm:$0xff]  }
 0x3b0   : > { %v7360_v60 = vpop.f32.mrb[0].mxu1 }
 0x3b1   : > { %v4331_v62 = vadd.f32 %v7360_v60, %v6330_v58  ;;  %v4283_v43 = vpop.f32.mrb[1].mxu1  ;;  %v7947_v60 = vld [vmem:[%s9499_s5 + $0x80] sm:$0xff]  }
 0x3b2   : > { %v4329_v21 = vadd.f32 %v6330_v58, %v4283_v43  ;;  %v7361_v17 = vpop.f32.mrb[2].mxu1  ;;  %v7948_v43 = vld [vmem:[%s9499_s5 + $0x88] sm:$0xff]  }
 0x3b3   : > { %4339 = vst.msk [vmem:[#allocation4 + $0x10] sm:$0xff] %vm1013_vm3, %v4331_v62  ;;  %v4332_v44 = vadd.f32 %v7361_v17, %v6330_v58  ;;  %v4286_v22 = vpop.f32.mrb[3].mxu1 }
 0x3b4   : > { %4337 = vst.msk [vmem:[#allocation4] sm:$0xff] %vm1013_vm3, %v4329_v21  ;;  %v4330_v16 = vadd.f32 %v6330_v58, %v4286_v22  ;;  %v7949_v21 = vld [vmem:[%s9499_s5 + $0x90] sm:$0xff]  }
 0x3b5   : > { %4340 = vst.msk [vmem:[#allocation4 + $0x18] sm:$0xff] %vm1013_vm3, %v4332_v44  ;;  %v7950_v44 = vld [vmem:[%s9499_s5 + $0x98] sm:$0xff]  }
 0x3b6   : > { %4338 = vst.msk [vmem:[#allocation4 + $0x8] sm:$0xff] %vm1013_vm3, %v4330_v16 }
 0x3b8   : > { %v7364_v0 = vpop.f32.mrb[4].mxu1 }
 0x3b9   : > { %v4335_v5 = vadd.f32 %v7364_v0, %v6330_v58  ;;  %v4299_v33 = vpop.f32.mrb[5].mxu1  ;;  %v7951_v0 = vld [vmem:[%s9499_s5 + $0xa0] sm:$0xff]  }
 0x3ba   : > { %v4333_v1 = vadd.f32 %v6330_v58, %v4299_v33  ;;  %v7365_v14 = vpop.f32.mrb[6].mxu1  ;;  %v4358_v35 = vld [vmem:[#allocation4 + $0x10] ss:$2 sm:$0xf]  ;;  %v7952_v33 = vld [vmem:[%s9499_s5 + $0xa8] sm:$0xff]  }
 0x3bb   : > { %4343 = vst.msk [vmem:[#allocation4 + $0x30] sm:$0xff] %vm1013_vm3, %v4335_v5  ;;  %v4336_v23 = vadd.f32 %v7365_v14, %v6330_v58  ;;  %v4302_v32 = vpop.f32.mrb[7].mxu1  ;;  %v4345_v41 = vld [vmem:[#allocation4] ss:$2 sm:$0xf]  ;;  %v7954_v14 = vld [vmem:[%s9499_s5 + $0xb8] sm:$0xff]  }
 0x3bc   : > { %4341 = vst.msk [vmem:[#allocation4 + $0x20] sm:$0xff] %vm1013_vm3, %v4333_v1  ;;  %v4334_v59 = vadd.f32 %v6330_v58, %v4302_v32  ;;  %v4347_v54 = vld [vmem:[#allocation4 + $0x1] ss:$2 sm:$0xf]  ;;  %v7953_v1 = vld [vmem:[%s9499_s5 + $0xb0] sm:$0xff]  }
 0x3bd   : > { %4344 = vst.msk [vmem:[#allocation4 + $0x38] sm:$0xff] %vm1013_vm3, %v4336_v23  ;;  %v4350_v6 = vld [vmem:[#allocation4 + $0x8] ss:$2 sm:$0xf]  ;;  %v4348_v26 = vmax.f32 %v4345_v41, %v4347_v54  ;;  %v7955_v23 = vld [vmem:[%s9499_s5 + $0xc0] sm:$0xff]  }
 0x3be   : > { %v4352_v2 = vld [vmem:[#allocation4 + $0x9] ss:$2 sm:$0xf]  ;;  %4342 = vst.msk [vmem:[#allocation4 + $0x28] sm:$0xff] %vm1013_vm3, %v4334_v59 }
 0x3bf   : > { %v4353_v30 = vmax.f32 %v4350_v6, %v4352_v2  ;;  %v4363_v38 = vld [vmem:[#allocation4 + $0x18] ss:$2 sm:$0xf]  ;;  %v4365_v55 = vld [vmem:[#allocation4 + $0x19] ss:$2 sm:$0xf] }
 0x3c0   : > { %v4360_v25 = vld [vmem:[#allocation4 + $0x11] ss:$2 sm:$0xf]  ;;  %v4366_v37 = vmax.f32 %v4363_v38, %v4365_v55  ;;  %v7956_v54 = vld [vmem:[%s9499_s5 + $0xc8] sm:$0xff]   ;;  %v7978_v38 = vld [vmem:[%s9499_s5 + $0x58] sm:$0xff]  }
 0x3c1   : > { %v4354_v28 = vmax.f32 %v4348_v26, %v4353_v30  ;;  %v4361_v18 = vmax.f32 %v4358_v35, %v4360_v25  ;;  %v7979_v55 = vld [vmem:[%s9499_s5 + $0x60] sm:$0xff]   ;;  %v7981_v35 = vld [vmem:[%s9499_s5 + $0x70] sm:$0xff]   ;;  %v7982_v25 = vld [vmem:[%s9499_s5 + $0x78] sm:$0xff]  }
 0x3c2   : > { %v4384_v56 = vld [vmem:[#allocation4 + $0x30] ss:$2 sm:$0xf]  ;;  %v4386_v7 = vld [vmem:[#allocation4 + $0x31] ss:$2 sm:$0xf] }
 0x3c3   : > { %v4355_v24 = vmax.f32 %v4354_v28, 0.0  ;;  %v4387_v29 = vmax.f32 %v4384_v56, %v4386_v7  ;;  %v4367_v27 = vmax.f32 %v4361_v18, %v4366_v37  ;;  %v4371_v6 = vld [vmem:[#allocation4 + $0x20] ss:$2 sm:$0xf]  ;;  %v7957_v28 = vld [vmem:[%s9499_s5 + $0xd0] sm:$0xff]   ;;  %v7958_v56 = vld [vmem:[%s9499_s5 + $0xd8] sm:$0xff]  }
 0x3c4   : > { %v4389_v11 = vld [vmem:[#allocation4 + $0x38] ss:$2 sm:$0xf]  ;;  %v4391_v19 = vld [vmem:[#allocation4 + $0x39] ss:$2 sm:$0xf] }
 0x3c5   : > { %v4356_v3 = vpack.c.bf16 %v4355_v24, %v4355_v24  ;;  %v4392_v12 = vmax.f32 %v4389_v11, %v4391_v19  ;;  %v4368_v58 = vmax.f32 %v4367_v27, 0.0  ;;  %v4376_v41 = vld [vmem:[#allocation4 + $0x28] ss:$2 sm:$0xf]  ;;  %v7983_v37 = vld [vmem:[%s9499_s5 + $0x80] sm:$0xff]   ;;  %v7986_v27 = vld [vmem:[%s9499_s5 + $0x98] sm:$0xff]  }
 0x3c6   : > { %v4378_v59 = vld [vmem:[#allocation4 + $0x29] ss:$2 sm:$0xf]  ;;  %v4373_v2 = vld [vmem:[#allocation4 + $0x21] ss:$2 sm:$0xf] }
 0x3c7   : > { %v4416_v8 = vshll.u32 %v4356_v3, 16  ;;  %v4393_v4 = vmax.f32 %v4387_v29, %v4392_v12  ;;  %v4414_v9 = vshrl.u32 %v4356_v3, 16  ;;  %v4563_v31 = vrot.slane %v4356_v3, 1  ;;  %v7960_v19 = vld [vmem:[%s9499_s5 + $0xe8] sm:$0xff]   ;;  %v7961_v29 = vld [vmem:[%s9499_s5 + $0xf0] sm:$0xff]  }
 0x3c8   : > { %v9200_v62 = vpack.c.bf16 %v4368_v58, %v4368_v58  ;;  %v4379_v26 = vmax.f32 %v4376_v41, %v4378_v59  ;;  %v4374_v30 = vmax.f32 %v4371_v6, %v4373_v2  ;;  %v7984_v18 = vld [vmem:[%s9499_s5 + $0x88] sm:$0xff]   ;;  %v7993_v59 = vld [vmem:[%s9499_s5 + $0xd0] sm:$0xff]   ;;  %v7994_v6 = vld [vmem:[%s9499_s5 + $0xd8] sm:$0xff]  }
 0x3c9   : > { %v4418_v47 = vrot.slane %v4416_v8, 1  ;;  %v4394_v49 = vmax.f32 %v4393_v4, 0.0  ;;  %v7962_v8 = vld [vmem:[%s9499_s5 + $0xf8] sm:$0xff]   ;;  %v7988_v58 = vld [vmem:[%s9499_s5 + $0xa8] sm:$0xff]   ;;  %v7995_v2 = vld [vmem:[%s9499_s5 + $0x100] sm:$0xff]  }
 0x3ca   : > { %v4720_v17 = vshll.u32 %v9200_v62, 16  ;;  %v4718_v16 = vshrl.u32 %v9200_v62, 16  ;;  %v4802_v32 = vrot.slane %v9200_v62, 1  ;;  %v4380_v24 = vmax.f32 %v4374_v30, %v4379_v26  ;;  %v7996_v26 = vld [vmem:[%s9499_s5 + $0x108] sm:$0xff]  }
 0x3cb   : > { %v4419_v46 = vor.u32 %v4418_v47, %v4414_v9  ;;  %v9139_v51 = vpack.c.bf16 %v4394_v49, %v4394_v49  ;;  %v7963_v47 = vld [vmem:[%s9499_s5 + $0x100] sm:$0xff]   ;;  %v7964_v49 = vld [vmem:[%s9499_s5 + $0x108] sm:$0xff]  }
 0x3cc   : > { %v4722_v22 = vrot.slane %v4720_v17, 1  ;;  %v4381_v7 = vmax.f32 %v4380_v24, 0.0 }
 0x3cd   : > { %7375 = vmatmul.mubr.msk.bf16.vlgmr.msra.gmra.mrb[72].mxu0 %vm1013_vm3, %v4419_v46  ;;  %v5641_v45 = vshll.u32 %v9139_v51, 16  ;;  %v5639_v50 = vshrl.u32 %v9139_v51, 16  ;;  %v7965_v46 = vld [vmem:[%s9499_s5 + $0x110] sm:$0xff]  }
 0x3ce   : > { %7379 = vmatpush3.bf16.msra.mxu0 %v7933_v42  ;;  %7386 = vmatprep.mubr.msk.bf16.mxu0 %vm8010_vm5, %v8009_v48  ;;  %v9224_v5 = vor.u32 %v4722_v22, %v4718_v16  ;;  %v9268_v11 = vpack.c.bf16 %v4381_v7, %v4381_v7  ;;  %v7997_v7 = vld [vmem:[%s9499_s5 + $0x110] sm:$0xff]  }
 0x3cf   : > { %7380 = vmatprep.subr.bf16.mxu0 %v8009_v48  ;;  %v5643_v36 = vrot.slane %v5641_v45, 1  ;;  %v7967_v45 = vld [vmem:[%s9499_s5 + $0x20] sm:$0xff]  }
 0x3d0   : > { %v4959_v12 = vshll.u32 %v9268_v11, 16  ;;  %v4957_v9 = vshrl.u32 %v9268_v11, 16 }
 0x3d1   : > { %v5644_v52 = vor.u32 %v5643_v36, %v5639_v50  ;;  %v5041_v50 = vrot.slane %v9268_v11, 1  ;;  %v7968_v36 = vld [vmem:[%s9499_s5 + $0x28] sm:$0xff]  }
 0x3d2   : > { %7381 = vmatpush3.bf16.msra.mxu0 %v7935_v63  ;;  %v4961_v4 = vrot.slane %v4959_v12, 1  ;;  %v7966_v63 = vld [vmem:[%s9499_s5 + $0x118] sm:$0xff]  }
 0x3d3   : > { %7382 = vmatprep.subr.bf16.mxu0 %v8009_v48  ;;  %7567 = vmatmul.mubr.msk.bf16.vlgmr.msra.gmra.mrb[8].mxu1 %vm1013_vm3, %v5644_v52  ;;  %v7969_v52 = vld [vmem:[%s9499_s5 + $0x30] sm:$0xff]  }
 0x3d4   : > { %v9292_v42 = vor.u32 %v4961_v4, %v4957_v9 }
 0x3d6   : > { %7383 = vmatpush3.bf16.msra.mxu0 %v7937_v39  ;;  %v7970_v39 = vld [vmem:[%s9499_s5 + $0x38] sm:$0xff]  }
 0x3d7   : > { %7384 = vmatprep.subr.bf16.mxu0 %v8009_v48 }
 0x3da   : > { %7385 = vmatpush3.bf16.msra.mxu0 %v7938_v13  ;;  %v7971_v13 = vld [vmem:[%s9499_s5] sm:$0xff]  }
 0x3db   : > { %7390 = vmatprep.subr.bf16.mxu0 %v8009_v48 }
 0x3dd   : > { %7387 = vmatmul.mubr.msk.bf16.vlgmr.msra.gmra.mrb[76].mxu0 %vm1013_vm3, %v4356_v3  ;;  %v7959_v3 = vld [vmem:[%s9499_s5 + $0xe0] sm:$0xff]  }
 0x3de   : > { %7391 = vmatpush3.bf16.msra.mxu0 %v7939_v40  ;;  %7398 = vmatprep.mubr.msk.bf16.mxu0 %vm8010_vm5, %v8009_v48  ;;  %v7972_v40 = vld [vmem:[%s9499_s5 + $0x8] sm:$0xff]  }
 0x3df   : > { %7392 = vmatprep.subr.bf16.mxu0 %v8009_v48 }
 0x3e2   : > { %7393 = vmatpush3.bf16.msra.mxu0 %v7940_v34  ;;  %v7973_v34 = vld [vmem:[%s9499_s5 + $0x10] sm:$0xff]  }
 0x3e3   : > { %7394 = vmatprep.subr.bf16.mxu0 %v8009_v48 }
 0x3e6   : > { %7395 = vmatpush3.bf16.msra.mxu0 %v7941_v20  ;;  %v7974_v20 = vld [vmem:[%s9499_s5 + $0x18] sm:$0xff]  }
 0x3e7   : > { %7396 = vmatprep.subr.bf16.mxu0 %v8009_v48 }
 0x3ea   : > { %7397 = vmatpush3.bf16.msra.mxu0 %v7942_v57  ;;  %v7975_v57 = vld [vmem:[%s9499_s5 + $0x40] sm:$0xff]  }
 0x3eb   : > { %7402 = vmatprep.subr.bf16.mxu0 %v8009_v48 }
 0x3ed   : > { %7399 = vmatmul.mubr.msk.bf16.vlgmr.msra.gmra.mrb[80].mxu0 %vm1013_vm3, %v4563_v31  ;;  %v7977_v31 = vld [vmem:[%s9499_s5 + $0x50] sm:$0xff]  }
 0x3ee   : > { %7403 = vmatpush3.bf16.msra.mxu0 %v7943_v15  ;;  %7410 = vmatprep.mubr.msk.bf16.mxu0 %vm8010_vm5, %v8009_v48  ;;  %v7976_v15 = vld [vmem:[%s9499_s5 + $0x48] sm:$0xff]  }
 0x3ef   : > { %7404 = vmatprep.subr.bf16.mxu0 %v8009_v48 }
 0x3f2   : > { %7405 = vmatpush3.bf16.msra.mxu0 %v7944_v61  ;;  %v7980_v61 = vld [vmem:[%s9499_s5 + $0x68] sm:$0xff]  }
 0x3f3   : > { %7406 = vmatprep.subr.bf16.mxu0 %v8009_v48 }
 0x3f6   : > { %7407 = vmatpush3.bf16.msra.mxu0 %v7945_v10  ;;  %v7985_v10 = vld [vmem:[%s9499_s5 + $0x90] sm:$0xff]  }
 0x3f7   : > { %7408 = vmatprep.subr.bf16.mxu0 %v8009_v48 }
 0x3fa   : > { %7409 = vmatpush3.bf16.msra.mxu0 %v7946_v53  ;;  %v7987_v53 = vld [vmem:[%s9499_s5 + $0xa0] sm:$0xff]  }
 0x3fb   : > { %7414 = vmatprep.subr.bf16.mxu0 %v8009_v48 }
 0x3fd   : > { %7411 = vmatmul.mubr.msk.bf16.vlgmr.msra.gmra.mrb[84].mxu0 %vm1013_vm3, %v9200_v62 }
 0x3fe   : > { %7415 = vmatpush3.bf16.msra.mxu0 %v7947_v60  ;;  %7422 = vmatprep.mubr.msk.bf16.mxu0 %vm8010_vm5, %v8009_v48 }
 0x3ff   : > { %7416 = vmatprep.subr.bf16.mxu0 %v8009_v48 }
 0x402   : > { %7417 = vmatpush3.bf16.msra.mxu0 %v7948_v43 }
 0x403   : > { %7418 = vmatprep.subr.bf16.mxu0 %v8009_v48 }
 0x406   : > { %7419 = vmatpush3.bf16.msra.mxu0 %v7949_v21  ;;  %v7989_v21 = vld [vmem:[%s9499_s5 + $0xb0] sm:$0xff]  }
 0x407   : > { %7420 = vmatprep.subr.bf16.mxu0 %v8009_v48 }
 0x40a   : > { %7421 = vmatpush3.bf16.msra.mxu0 %v7950_v44  ;;  %v7990_v44 = vld [vmem:[%s9499_s5 + $0xb8] sm:$0xff]  }
 0x40b   : > { %7426 = vmatprep.subr.bf16.mxu0 %v8009_v48 }
 0x40d   : > { %7423 = vmatmul.mubr.msk.bf16.vlgmr.msra.gmra.mrb[88].mxu0 %vm1013_vm3, %v9224_v5 }
 0x40e   : > { %7427 = vmatpush3.bf16.msra.mxu0 %v7951_v0  ;;  %7434 = vmatprep.mubr.msk.bf16.mxu0 %vm8010_vm5, %v8009_v48 }
 0x40f   : > { %7428 = vmatprep.subr.bf16.mxu0 %v8009_v48 }
 0x412   : > { %7429 = vmatpush3.bf16.msra.mxu0 %v7952_v33  ;;  %v7991_v33 = vld [vmem:[%s9499_s5 + $0xc0] sm:$0xff]  }
 0x413   : > { %7430 = vmatprep.subr.bf16.mxu0 %v8009_v48 }
 0x416   : > { %7431 = vmatpush3.bf16.msra.mxu0 %v7953_v1  ;;  %v7992_v1 = vld [vmem:[%s9499_s5 + $0xc8] sm:$0xff]  }
 0x417   : > { %7432 = vmatprep.subr.bf16.mxu0 %v8009_v48 }
 0x41a   : > { %7433 = vmatpush3.bf16.msra.mxu0 %v7954_v14 }
 0x41b   : > { %7438 = vmatprep.subr.bf16.mxu0 %v8009_v48 }
 0x41d   : > { %7435 = vmatmul.mubr.msk.bf16.vlgmr.msra.gmra.mrb[92].mxu0 %vm1013_vm3, %v4802_v32 }
 0x41e   : > { %7439 = vmatpush3.bf16.msra.mxu0 %v7955_v23  ;;  %7446 = vmatprep.mubr.msk.bf16.mxu0 %vm8010_vm5, %v8009_v48 }
 0x41f   : > { %7440 = vmatprep.subr.bf16.mxu0 %v8009_v48 }
 0x422   : > { %7441 = vmatpush3.bf16.msra.mxu0 %v7956_v54 }
 0x423   : > { %7442 = vmatprep.subr.bf16.mxu0 %v8009_v48 }
 0x426   : > { %7443 = vmatpush3.bf16.msra.mxu0 %v7957_v28 }
 0x427   : > { %7444 = vmatprep.subr.bf16.mxu0 %v8009_v48 }
 0x42a   : > { %7445 = vmatpush3.bf16.msra.mxu0 %v7958_v56 }
 0x42b   : > { %7450 = vmatprep.subr.bf16.mxu0 %v8009_v48 }
 0x42d   : > { %7447 = vmatmul.mubr.msk.bf16.vlgmr.msra.gmra.mrb[96].mxu0 %vm1013_vm3, %v9268_v11 }
 0x42e   : > { %7451 = vmatpush3.bf16.msra.mxu0 %v7959_v3  ;;  %7458 = vmatprep.mubr.msk.bf16.mxu0 %vm8010_vm5, %v8009_v48 }
 0x42f   : > { %7452 = vmatprep.subr.bf16.mxu0 %v8009_v48 }
 0x432   : > { %7453 = vmatpush3.bf16.msra.mxu0 %v7960_v19  ;;  %v5722_v19 = vrot.slane %v9139_v51, 1 }
 0x433   : > { %7454 = vmatprep.subr.bf16.mxu0 %v8009_v48 }
 0x436   : > { %7455 = vmatpush3.bf16.msra.mxu0 %v7961_v29 }
 0x437   : > { %7456 = vmatprep.subr.bf16.mxu0 %v8009_v48 }
 0x43a   : > { %7457 = vmatpush3.bf16.msra.mxu0 %v7962_v8 }
 0x43b   : > { %7462 = vmatprep.subr.bf16.mxu0 %v8009_v48 }
 0x43d   : > { %7459 = vmatmul.mubr.msk.bf16.vlgmr.msra.gmra.mrb[100].mxu0 %vm1013_vm3, %v9292_v42 }
 0x43e   : > { %7463 = vmatpush3.bf16.msra.mxu0 %v7963_v47  ;;  %7470 = vmatprep.mubr.msk.bf16.mxu0 %vm8010_vm5, %v8009_v48 }
 0x43f   : > { %7464 = vmatprep.subr.bf16.mxu0 %v8009_v48 }
 0x442   : > { %7465 = vmatpush3.bf16.msra.mxu0 %v7964_v49 }
 0x443   : > { %7466 = vmatprep.subr.bf16.mxu0 %v8009_v48 }
 0x446   : > { %7467 = vmatpush3.bf16.msra.mxu0 %v7965_v46 }
 0x447   : > { %7468 = vmatprep.subr.bf16.mxu0 %v8009_v48 }
 0x44a   : > { %7469 = vmatpush3.bf16.msra.mxu0 %v7966_v63 }
 0x44b   : > { %7474 = vmatprep.subr.bf16.mxu0 %v8009_v48 }
 0x44d   : > { %7471 = vmatmul.mubr.msk.bf16.vlgmr.msra.gmra.mrb[104].mxu0 %vm1013_vm3, %v5041_v50 }
 0x44e   : > { %7475 = vmatpush3.bf16.msra.mxu0 %v7967_v45  ;;  %7482 = vmatprep.mubr.msk.bf16.mxu0 %vm8010_vm5, %v8009_v48 }
 0x44f   : > { %7476 = vmatprep.subr.bf16.mxu0 %v8009_v48 }
 0x452   : > { %7477 = vmatpush3.bf16.msra.mxu0 %v7968_v36 }
 0x453   : > { %7478 = vmatprep.subr.bf16.mxu0 %v8009_v48 }
 0x456   : > { %7479 = vmatpush3.bf16.msra.mxu0 %v7969_v52 }
 0x457   : > { %7480 = vmatprep.subr.bf16.mxu0 %v8009_v48 }
 0x45a   : > { %7481 = vmatpush3.bf16.msra.mxu0 %v7970_v39 }
 0x45b   : > { %7486 = vmatprep.subr.bf16.mxu0 %v8009_v48 }
 0x45d   : > { %7483 = vmatmul.mubr.msk.bf16.vlgmr.msra.gmra.mrb[108].mxu0 %vm1013_vm3, %v9224_v5 }
 0x45e   : > { %7487 = vmatpush3.bf16.msra.mxu0 %v7971_v13  ;;  %7494 = vmatprep.mubr.msk.bf16.mxu0 %vm8010_vm5, %v8009_v48 }
 0x45f   : > { %7488 = vmatprep.subr.bf16.mxu0 %v8009_v48 }
 0x462   : > { %7489 = vmatpush3.bf16.msra.mxu0 %v7972_v40 }
 0x463   : > { %7490 = vmatprep.subr.bf16.mxu0 %v8009_v48 }
 0x466   : > { %7491 = vmatpush3.bf16.msra.mxu0 %v7973_v34 }
 0x467   : > { %7492 = vmatprep.subr.bf16.mxu0 %v8009_v48 }
 0x46a   : > { %7493 = vmatpush3.bf16.msra.mxu0 %v7974_v20 }
 0x46b   : > { %7498 = vmatprep.subr.bf16.mxu0 %v8009_v48 }
 0x46d   : > { %7495 = vmatmul.mubr.msk.bf16.vlgmr.msra.gmra.mrb[112].mxu0 %vm1013_vm3, %v9200_v62 }
 0x46e   : > { %7499 = vmatpush3.bf16.msra.mxu0 %v7975_v57  ;;  %7506 = vmatprep.mubr.msk.bf16.mxu0 %vm8010_vm5, %v8009_v48 }
 0x46f   : > { %7500 = vmatprep.subr.bf16.mxu0 %v8009_v48 }
 0x472   : > { %7501 = vmatpush3.bf16.msra.mxu0 %v7976_v15 }
 0x473   : > { %7502 = vmatprep.subr.bf16.mxu0 %v8009_v48 }
 0x476   : > { %7503 = vmatpush3.bf16.msra.mxu0 %v7977_v31 }
 0x477   : > { %7504 = vmatprep.subr.bf16.mxu0 %v8009_v48 }
 0x47a   : > { %7505 = vmatpush3.bf16.msra.mxu0 %v7978_v38 }
 0x47b   : > { %7510 = vmatprep.subr.bf16.mxu0 %v8009_v48 }
 0x47d   : > { %7507 = vmatmul.mubr.msk.bf16.vlgmr.msra.gmra.mrb[116].mxu0 %vm1013_vm3, %v4802_v32 }
 0x47e   : > { %7511 = vmatpush3.bf16.msra.mxu0 %v7979_v55  ;;  %7518 = vmatprep.mubr.msk.bf16.mxu0 %vm8010_vm5, %v8009_v48 }
 0x47f   : > { %7512 = vmatprep.subr.bf16.mxu0 %v8009_v48 }
 0x482   : > { %7513 = vmatpush3.bf16.msra.mxu0 %v7980_v61  ;;  %v6440_v61 = vld [vmem:[%s9500_s6] ss:$0 sm:$0xff] }
 0x483   : > { %7514 = vmatprep.subr.bf16.mxu0 %v8009_v48 }
 0x486   : > { %7515 = vmatpush3.bf16.msra.mxu0 %v7981_v35 }
 0x487   : > { %7516 = vmatprep.subr.bf16.mxu0 %v8009_v48 }
 0x48a   : > { %7517 = vmatpush3.bf16.msra.mxu0 %v7982_v25 }
 0x48b   : > { %7522 = vmatprep.subr.bf16.mxu0 %v8009_v48 }
 0x48d   : > { %7519 = vmatmul.mubr.msk.bf16.vlgmr.msra.gmra.mrb[120].mxu0 %vm1013_vm3, %v9268_v11  ;;  %v7998_v11 = vld [vmem:[%s9499_s5 + $0x118] sm:$0xff]  }
 0x48e   : > { %7523 = vmatpush3.bf16.msra.mxu0 %v7983_v37  ;;  %7530 = vmatprep.mubr.msk.bf16.mxu0 %vm8010_vm5, %v8009_v48 }
 0x48f   : > { %7524 = vmatprep.subr.bf16.mxu0 %v8009_v48 }
 0x492   : > { %7525 = vmatpush3.bf16.msra.mxu0 %v7984_v18 }
 0x493   : > { %7526 = vmatprep.subr.bf16.mxu0 %v8009_v48 }
 0x496   : > { %7527 = vmatpush3.bf16.msra.mxu0 %v7985_v10 }
 0x497   : > { %7528 = vmatprep.subr.bf16.mxu0 %v8009_v48 }
 0x49a   : > { %7529 = vmatpush3.bf16.msra.mxu0 %v7986_v27 }
 0x49b   : > { %7534 = vmatprep.subr.bf16.mxu0 %v8009_v48 }
 0x49d   : > { %7531 = vmatmul.mubr.msk.bf16.vlgmr.msra.gmra.mrb[124].mxu0 %vm1013_vm3, %v9292_v42 }
 0x49e   : > { %7535 = vmatpush3.bf16.msra.mxu0 %v7987_v53  ;;  %7542 = vmatprep.mubr.msk.bf16.mxu0 %vm8010_vm5, %v8009_v48 }
 0x49f   : > { %7536 = vmatprep.subr.bf16.mxu0 %v8009_v48 }
 0x4a0   : > { %v4481_v60 = vpop.f32.mrb[72].mxu0 }
 0x4a1   : > { %v7376_v62 = vpop.f32.mrb[73].mxu0 }
 0x4a2   : > { %7537 = vmatpush3.bf16.msra.mxu0 %v7988_v58  ;;  %v4484_v43 = vpop.f32.mrb[74].mxu0 }
 0x4a3   : > { %v7377_v17 = vpop.f32.mrb[75].mxu0  ;;  %7538 = vmatprep.subr.bf16.mxu0 %v8009_v48 }
 0x4a6   : > { %7539 = vmatpush3.bf16.msra.mxu0 %v7989_v21  ;;  %v9433_v22 = vpop.f32.mrb[8].mxu1 }
 0x4a7   : > { %7540 = vmatprep.subr.bf16.mxu0 %v8009_v48  ;;  %v7568_v16 = vpop.f32.mrb[9].mxu1 }
 0x4a8   : > { %v5709_v0 = vpop.f32.mrb[10].mxu1 }
 0x4a9   : > { %v7569_v5 = vpop.f32.mrb[11].mxu1 }
 0x4aa   : > { %7541 = vmatpush3.bf16.msra.mxu0 %v7990_v44 }
 0x4ab   : > { %7546 = vmatprep.subr.bf16.mxu0 %v8009_v48 }
 0x4ad   : > { %7543 = vmatmul.mubr.msk.bf16.vlgmr.msra.gmra.mrb[128].mxu0 %vm1013_vm3, %v5041_v50 }
 0x4ae   : > { %7547 = vmatpush3.bf16.msra.mxu0 %v7991_v33  ;;  %7554 = vmatprep.mubr.msk.bf16.mxu0 %vm8010_vm5, %v8009_v48 }
 0x4af   : > { %7548 = vmatprep.subr.bf16.mxu0 %v8009_v48 }
 0x4b0   : > { %v4547_v14 = vpop.f32.mrb[76].mxu0 }
 0x4b1   : > { %v4548_v23 = vadd.f32 %v4547_v14, %v4481_v60  ;;  %v7388_v32 = vpop.f32.mrb[77].mxu0 }
 0x4b2   : > { %v4550_v41 = vpop.f32.mrb[78].mxu0  ;;  %7549 = vmatpush3.bf16.msra.mxu0 %v7992_v1 }
 0x4b3   : > { %v7389_v54 = vpop.f32.mrb[79].mxu0  ;;  %7550 = vmatprep.subr.bf16.mxu0 %v8009_v48 }
 0x4b6   : > { %7551 = vmatpush3.bf16.msra.mxu0 %v7993_v59 }
 0x4b7   : > { %7552 = vmatprep.subr.bf16.mxu0 %v8009_v48 }
 0x4ba   : > { %7553 = vmatpush3.bf16.msra.mxu0 %v7994_v6 }
 0x4bb   : > { %7570 = vmatprep.subr.bf16.mxu0 %v8009_v48 }
 0x4bd   : > { %7555 = vmatmul.mubr.msk.bf16.vlgmr.msra.gmra.mrb[132].mxu0 %vm1013_vm3, %v9139_v51 }
 0x4be   : > { %7571 = vmatpush3.bf16.msra.mxu0 %v7995_v2  ;;  %7578 = vmatprep.mubr.msk.bf16.mxu0 %vm8010_vm5, %v8009_v48 }
 0x4bf   : > { %7572 = vmatprep.subr.bf16.mxu0 %v8009_v48 }
 0x4c0   : > { %v4625_v30 = vpop.f32.mrb[80].mxu0 }
 0x4c1   : > { %v4631_v28 = vadd.f32 %v4625_v30, %v4548_v23  ;;  %v7400_v24 = vpop.f32.mrb[81].mxu0 }
 0x4c2   : > { %v4628_v56 = vpop.f32.mrb[82].mxu0  ;;  %7573 = vmatpush3.bf16.msra.mxu0 %v7996_v26 }
 0x4c3   : > { %v7401_v3 = vpop.f32.mrb[83].mxu0  ;;  %7574 = vmatprep.subr.bf16.mxu0 %v8009_v48 }
 0x4c6   : > { %7575 = vmatpush3.bf16.msra.mxu0 %v7997_v7 }
 0x4c7   : > { %7576 = vmatprep.subr.bf16.mxu0 %v8009_v48 }
 0x4ca   : > { %7577 = vmatpush3.bf16.msra.mxu0 %v7998_v11 }
 0x4cd   : > { %7579 = vmatmul.mubr.msk.bf16.vlgmr.msra.gmra.mrb[136].mxu0 %vm1013_vm3, %v5722_v19 }
 0x4d0   : > { %v4702_v29 = vpop.f32.mrb[84].mxu0 }
 0x4d1   : > { %v4708_v12 = vadd.f32 %v4702_v29, %v4631_v28  ;;  %v7412_v8 = vpop.f32.mrb[85].mxu0 }
 0x4d2   : > { %v4705_v4 = vpop.f32.mrb[86].mxu0 }
 0x4d3   : > { %v7413_v9 = vpop.f32.mrb[87].mxu0 }
 0x4e0   : > { %v4785_v47 = vpop.f32.mrb[88].mxu0 }
 0x4e1   : > { %v4791_v42 = vadd.f32 %v4785_v47, %v4708_v12  ;;  %v7424_v49 = vpop.f32.mrb[89].mxu0 }
 0x4e2   : > { %v4788_v46 = vpop.f32.mrb[90].mxu0 }
 0x4e3   : > { %v7425_v63 = vpop.f32.mrb[91].mxu0 }
 0x4f0   : > { %v4864_v45 = vpop.f32.mrb[92].mxu0 }
 0x4f1   : > { %v4870_v50 = vadd.f32 %v4864_v45, %v4791_v42  ;;  %v7436_v36 = vpop.f32.mrb[93].mxu0 }
 0x4f2   : > { %v4867_v48 = vpop.f32.mrb[94].mxu0 }
 0x4f3   : > { %v7437_v52 = vpop.f32.mrb[95].mxu0 }
 0x500   : > { %v4941_v39 = vpop.f32.mrb[96].mxu0 }
 0x501   : > { %v4947_v51 = vadd.f32 %v4941_v39, %v4870_v50  ;;  %v7448_v13 = vpop.f32.mrb[97].mxu0 }
 0x502   : > { %v4944_v40 = vpop.f32.mrb[98].mxu0 }
 0x503   : > { %v7449_v34 = vpop.f32.mrb[99].mxu0 }
 0x510   : > { %v5024_v20 = vpop.f32.mrb[100].mxu0 }
 0x511   : > { %v5030_v57 = vadd.f32 %v5024_v20, %v4947_v51  ;;  %v7460_v15 = vpop.f32.mrb[101].mxu0 }
 0x512   : > { %v5027_v31 = vpop.f32.mrb[102].mxu0 }
 0x513   : > { %v7461_v38 = vpop.f32.mrb[103].mxu0 }
 0x520   : > { %v5103_v55 = vpop.f32.mrb[104].mxu0 }
 0x521   : > { %v5109_v35 = vadd.f32 %v5103_v55, %v5030_v57  ;;  %v7472_v25 = vpop.f32.mrb[105].mxu0 }
 0x522   : > { %v5106_v37 = vpop.f32.mrb[106].mxu0 }
 0x523   : > { %v5117_v18 = vadd.f32 %v6440_v61, %v5109_v35  ;;  %v7473_v10 = vpop.f32.mrb[107].mxu0 }
 0x525   : > { %5118 = vst [vmem:[%s9486_s15] sm:$0x3] %v5117_v18 }
 0x530   : > { %v5193_v27 = vpop.f32.mrb[108].mxu0 }
 0x531   : > { %v7484_v53 = vpop.f32.mrb[109].mxu0 }
 0x532   : > { %v5196_v58 = vpop.f32.mrb[110].mxu0 }
 0x533   : > { %v7485_v60 = vpop.f32.mrb[111].mxu0 }
 0x540   : > { %v5257_v62 = vpop.f32.mrb[112].mxu0 }
 0x541   : > { %v5258_v43 = vadd.f32 %v5257_v62, %v5193_v27  ;;  %v7496_v21 = vpop.f32.mrb[113].mxu0 }
 0x542   : > { %v5260_v17 = vpop.f32.mrb[114].mxu0 }
 0x543   : > { %v7497_v44 = vpop.f32.mrb[115].mxu0 }
 0x550   : > { %v5329_v16 = vpop.f32.mrb[116].mxu0 }
 0x551   : > { %v5335_v0 = vadd.f32 %v5329_v16, %v5258_v43  ;;  %v7508_v5 = vpop.f32.mrb[117].mxu0 }
 0x552   : > { %v5332_v33 = vpop.f32.mrb[118].mxu0 }
 0x553   : > { %v7509_v1 = vpop.f32.mrb[119].mxu0 }
 0x560   : > { %v5402_v14 = vpop.f32.mrb[120].mxu0 }
 0x561   : > { %v5408_v23 = vadd.f32 %v5402_v14, %v5335_v0  ;;  %v7520_v32 = vpop.f32.mrb[121].mxu0 }
 0x562   : > { %v5405_v41 = vpop.f32.mrb[122].mxu0 }
 0x563   : > { %v7521_v59 = vpop.f32.mrb[123].mxu0 }
 0x570   : > { %v5475_v54 = vpop.f32.mrb[124].mxu0 }
 0x571   : > { %v5481_v6 = vadd.f32 %v5475_v54, %v5408_v23  ;;  %v7532_v2 = vpop.f32.mrb[125].mxu0 }
 0x572   : > { %v5478_v26 = vpop.f32.mrb[126].mxu0 }
 0x573   : > { %v7533_v30 = vpop.f32.mrb[127].mxu0 }
 0x580   : > { %v5548_v28 = vpop.f32.mrb[128].mxu0 }
 0x581   : > { %v5554_v24 = vadd.f32 %v5548_v28, %v5481_v6  ;;  %v7544_v56 = vpop.f32.mrb[129].mxu0 }
 0x582   : > { %v5551_v7 = vpop.f32.mrb[130].mxu0 }
 0x583   : > { %v7545_v3 = vpop.f32.mrb[131].mxu0 }
 0x590   : > { %v5624_v11 = vpop.f32.mrb[132].mxu0 }
 0x591   : > { %v5630_v19 = vadd.f32 %v5624_v11, %v5554_v24  ;;  %v7556_v29 = vpop.f32.mrb[133].mxu0 }
 0x592   : > { %v5627_v12 = vpop.f32.mrb[134].mxu0 }
 0x593   : > { %v7557_v8 = vpop.f32.mrb[135].mxu0  ;;  %v5712_v4 = vadd.f32 %v9433_v22, %v5630_v19 }
 0x5a0   : > { %v5784_v9 = vpop.f32.mrb[136].mxu0 }
 0x5a1   : > { %v5790_v47 = vadd.f32 %v5784_v9, %v5712_v4  ;;  %v7580_v42 = vpop.f32.mrb[137].mxu0 }
 0x5a2   : > { %v5787_v49 = vpop.f32.mrb[138].mxu0 }
 0x5a3   : > { %v5798_v46 = vadd.f32 %v6440_v61, %v5790_v47  ;;  %v7581_v63 = vpop.f32.mrb[139].mxu0 }
 0x5a5   : > { %5799 = vst [vmem:[%s9486_s15 + $0x2] sm:$0x3] %v5798_v46 }
 0x5a6 PF: > { %s17_s24 = sadd.s32 1, %s8006_s24  }
 0x5a7   : > { %p14_p4 = scmp.ge.s32.totalorder %s17_s24, 4  }
 0x5a9   :  { %16 = sbr.rel (!%p14_p4) target bundleno = 1 (0x1), region = 231 }

</bundles_post_ra>
